<compile_context>
chip_gen: v7x
topology: tpu7x:2x2x1
jax: 0.10.0
libtpu: 0.0.40
codegen_flags: <defaults>
</compile_context>

<pallas_src>
import jax
import jax.numpy as jnp
from jax.experimental import pallas as pl
from jax.experimental.pallas import tpu as pltpu


# ----------------------------------------------------------------------------
# Fused Pallas kernel: conv1+relu+pool1 -> conv2+relu+pool2 -> conv3+relu
#                      -> linear1+relu -> linear2, one image per grid step.
# ----------------------------------------------------------------------------
def _lenet_kernel(a1_ref, w1_ref, b1_ref, w2_ref, b2_ref, w3_ref, b3_ref,
                  wf1_ref, bf1_ref, wf2_ref, bf2_ref, o_ref):
    def dense(a, w, b, relu=True):
        y = jnp.dot(a, w, preferred_element_type=jnp.float32) + b
        return jnp.maximum(y, 0.0) if relu else y

    # ---- conv1 + ReLU -------------------------------------------------------
    # a1 rows are ordered (dh, dw, h2, w2) with (h, w) = (2*h2+dh, 2*w2+dw),
    # so AvgPool2x2(ReLU(conv1)) is the mean of four contiguous 196-row blocks.
    y1 = dense(a1_ref[0], w1_ref[...], b1_ref[...])                    # (784, 6)
    p1 = 0.25 * (y1[0:196] + y1[196:392] + y1[392:588] + y1[588:784])  # (196, 6)  14x14 raster

    # ---- conv2 + ReLU -------------------------------------------------------
    # "Over-slice" im2col: tap (kh, kw) is the contiguous 136-row window of the
    # 14x14 raster starting at kh*14+kw; valid conv outputs land at rows
    # j = ho*14 + wo (ho, wo in 0..9), junk rows are discarded by the pool.
    a2 = jnp.concatenate(
        [p1[kh * 14 + kw: kh * 14 + kw + 136, :]
         for kh in range(5) for kw in range(5)],
        axis=1)                                                        # (136, 150)
    y2 = dense(a2, w2_ref[...], b2_ref[...])                           # (136, 16)

    # AvgPool2x2 on the 10x10 output embedded in the 14-wide raster.
    t2 = y2[0:121] + y2[1:122] + y2[14:135] + y2[15:136]               # (121, 16)
    p2 = 0.25 * jnp.concatenate(
        [t2[28 * h3 + 2 * w3: 28 * h3 + 2 * w3 + 1, :]
         for h3 in range(5) for w3 in range(5)],
        axis=0)                                                        # (25, 16)  5x5 raster

    # ---- conv3 (5x5 -> 1x1) + ReLU == flatten, Cout padded 120 -> 128 -------
    a3 = jnp.concatenate([p2[t: t + 1, :] for t in range(25)], axis=1)  # (1, 400)
    h = dense(a3, w3_ref[...], b3_ref[...])                            # (1, 128)

    # ---- linear1 + ReLU, linear2 (padded to 128x128, padded lanes stay 0) ---
    h = dense(h, wf1_ref[...], bf1_ref[...])                           # (1, 128)
    out = dense(h, wf2_ref[...], bf2_ref[...], relu=False)             # (1, 128)
    o_ref[0] = out


# ----------------------------------------------------------------------------
# Plain-JAX glue: conv1 im2col (pool-tap-major row order) + weight packing.
# ----------------------------------------------------------------------------
def _build_a1(x):
    """x: (N, 32, 32) f32 -> (N, 784, 25); rows ordered (dh, dw, h2, w2)."""
    n = x.shape[0]
    blocks = []
    for dh in (0, 1):
        for dw in (0, 1):
            taps = [
                x[:, dh + kh: dh + kh + 27: 2, dw + kw: dw + kw + 27: 2]
                .reshape(n, 196, 1)
                for kh in range(5) for kw in range(5)
            ]
            blocks.append(jnp.concatenate(taps, axis=-1))              # (N, 196, 25)
    return jnp.concatenate(blocks, axis=1)                             # (N, 784, 25)


def conv_w_to_mat(w):
    """(Cout, Cin, K, K) torch conv weight -> (K*K*Cin, Cout), (kh,kw,cin) order."""
    cout, cin, kh, kw = w.shape
    return jnp.transpose(w, (2, 3, 1, 0)).reshape(kh * kw * cin, cout)


def _prep_params(params):
    w1, b1 = params["conv1"]
    w2, b2 = params["conv2"]
    w3, b3 = params["conv3"]
    wl1, bl1 = params["linear1"]
    wl2, bl2 = params["linear2"]

    w1m = conv_w_to_mat(w1)                                    # (25, 6)
    w2m = conv_w_to_mat(w2)                                    # (150, 16)
    w3m = jnp.pad(conv_w_to_mat(w3), ((0, 0), (0, 8)))         # (400, 128)
    b3p = jnp.pad(b3, (0, 8)).reshape(1, 128)
    wf1 = jnp.pad(wl1.T, ((0, 8), (0, 44)))                    # (128, 128)
    bf1 = jnp.pad(bl1, (0, 44)).reshape(1, 128)
    wf2 = jnp.pad(wl2.T, ((0, 44), (0, 118)))                  # (128, 128)
    bf2 = jnp.pad(bl2, (0, 118)).reshape(1, 128)
    return (w1m, b1.reshape(1, 6), w2m, b2.reshape(1, 16),
            w3m, b3p, wf1, bf1, wf2, bf2)


# ----------------------------------------------------------------------------
# Forward pass (public interface: NCHW float32, x: [N, 1, 32, 32])
# ----------------------------------------------------------------------------
def lenet_forward(x_nchw, params):
    n = x_nchw.shape[0]
    a1 = _build_a1(x_nchw.reshape(n, 32, 32))                  # (N, 784, 25)
    weights = _prep_params(params)

    flops = n * 2 * (784 * 25 * 6 + 136 * 150 * 16 + 400 * 128 + 2 * 128 * 128)
    w_bytes = 4 * sum(int(w.size) for w in weights)
    bytes_accessed = n * 4 * (784 * 25 + 128) + w_bytes

    const = lambda i: (0, 0)
    out = pl.pallas_call(
        _lenet_kernel,
        grid=(n,),
        out_shape=jax.ShapeDtypeStruct((n, 1, 128), jnp.float32),
        in_specs=[
            pl.BlockSpec((1, 784, 25), lambda i: (i, 0, 0)),   # per-image im2col
            pl.BlockSpec((25, 6), const),                      # conv1 W
            pl.BlockSpec((1, 6), const),                       # conv1 b
            pl.BlockSpec((150, 16), const),                    # conv2 W
            pl.BlockSpec((1, 16), const),                      # conv2 b
            pl.BlockSpec((400, 128), const),                   # conv3 W (padded)
            pl.BlockSpec((1, 128), const),                     # conv3 b
            pl.BlockSpec((128, 128), const),                   # linear1 W (padded)
            pl.BlockSpec((1, 128), const),                     # linear1 b
            pl.BlockSpec((128, 128), const),                   # linear2 W (padded)
            pl.BlockSpec((1, 128), const),                     # linear2 b
        ],
        out_specs=pl.BlockSpec((1, 1, 128), lambda i: (i, 0, 0)),
        compiler_params=pltpu.CompilerParams(
            dimension_semantics=("parallel",)),
        cost_estimate=pl.CostEstimate(
            flops=flops, transcendentals=0, bytes_accessed=bytes_accessed),
    )(a1, *weights)
    return out.reshape(n, 128)[:, :10]


# ----------------------------------------------------------------------------
# Pure-JAX reference (for correctness checking)
# ----------------------------------------------------------------------------
def lenet_reference(x, params):
    def conv_relu(x, w, b):
        y = jax.lax.conv_general_dilated(
            x, w, (1, 1), "VALID", dimension_numbers=("NCHW", "OIHW", "NCHW"))
        return jnp.maximum(y + b[None, :, None, None], 0.0)

    def pool(x):
        return jax.lax.reduce_window(
            x, 0.0, jax.lax.add, (1, 1, 2, 2), (1, 1, 2, 2), "VALID") * 0.25

    x = pool(conv_relu(x, *params["conv1"]))
    x = pool(conv_relu(x, *params["conv2"]))
    x = conv_relu(x, *params["conv3"])
    x = x.reshape(x.shape[0], -1)
    w, b = params["linear1"]
    x = jnp.maximum(x @ w.T + b, 0.0)
    w, b = params["linear2"]
    return x @ w.T + b


# ----------------------------------------------------------------------------
# Deterministic parameter init (torch default: U(-1/sqrt(fan_in), 1/sqrt(fan_in)))
# ----------------------------------------------------------------------------
def init_params(key):
    def conv_init(k, cout, cin, ks):
        bound = 1.0 / (cin * ks * ks) ** 0.5
        kw_, kb_ = jax.random.split(k)
        w = jax.random.uniform(kw_, (cout, cin, ks, ks), jnp.float32, -bound, bound)
        b = jax.random.uniform(kb_, (cout,), jnp.float32, -bound, bound)
        return w, b

    def lin_init(k, cout, cin):
        bound = 1.0 / cin ** 0.5
        kw_, kb_ = jax.random.split(k)
        w = jax.random.uniform(kw_, (cout, cin), jnp.float32, -bound, bound)
        b = jax.random.uniform(kb_, (cout,), jnp.float32, -bound, bound)
        return w, b

    k1, k2, k3, k4, k5 = jax.random.split(key, 5)
    return {
        "conv1": conv_init(k1, 6, 1, 5),
        "conv2": conv_init(k2, 16, 6, 5),
        "conv3": conv_init(k3, 120, 16, 5),
        "linear1": lin_init(k4, 84, 120),
        "linear2": lin_init(k5, 10, 84),
    }


if __name__ == "__main__":
    key = jax.random.PRNGKey(0)
    kx, kp = jax.random.split(key)
    # LeNet requires 32x32 spatial input (32->28->14->10->5->1); small batch.
    x = jax.random.normal(kx, (2, 1, 32, 32), jnp.float32)
    params = init_params(kp)

    fwd = jax.jit(lenet_forward)
    out = jax.block_until_ready(fwd(x, params))
    ref = jax.block_until_ready(lenet_reference(x, params))

    assert out.shape == (2, 10), out.shape
    assert jnp.allclose(out, ref, atol=1e-2, rtol=1e-2), float(
        jnp.max(jnp.abs(out - ref)))
    print("KERNEL_OK")
</pallas_src>

<mosaic_0001>
module attributes {stable_mosaic.version = 11 : i64} {
  func.func @_lenet_kernel(%arg0: i32, %arg1: memref<1x784x25xf32, #tpu.memory_space<vmem>>, %arg2: memref<25x6xf32, #tpu.memory_space<vmem>>, %arg3: memref<1x6xf32, #tpu.memory_space<vmem>>, %arg4: memref<150x16xf32, #tpu.memory_space<vmem>>, %arg5: memref<1x16xf32, #tpu.memory_space<vmem>>, %arg6: memref<400x128xf32, #tpu.memory_space<vmem>>, %arg7: memref<1x128xf32, #tpu.memory_space<vmem>>, %arg8: memref<128x128xf32, #tpu.memory_space<vmem>>, %arg9: memref<1x128xf32, #tpu.memory_space<vmem>>, %arg10: memref<128x128xf32, #tpu.memory_space<vmem>>, %arg11: memref<1x128xf32, #tpu.memory_space<vmem>>, %arg12: memref<1x1x128xf32, #tpu.memory_space<vmem>>) attributes {dimension_semantics = [#tpu.dimension_semantics<parallel>], iteration_bounds = array<i64: 2>, scalar_prefetch = 0 : i64, scratch_operands = 0 : i64, tpu.core_type = #tpu.core_type<tc>, window_params = [{transform_indices = @transform_0, window_bounds = array<i64: 1, 784, 25>}, {pipeline_mode = #tpu.pipeline_mode<synchronous>, transform_indices = @transform_1, window_bounds = array<i64: 25, 6>}, {pipeline_mode = #tpu.pipeline_mode<synchronous>, transform_indices = @transform_2, window_bounds = array<i64: 1, 6>}, {pipeline_mode = #tpu.pipeline_mode<synchronous>, transform_indices = @transform_3, window_bounds = array<i64: 150, 16>}, {pipeline_mode = #tpu.pipeline_mode<synchronous>, transform_indices = @transform_4, window_bounds = array<i64: 1, 16>}, {pipeline_mode = #tpu.pipeline_mode<synchronous>, transform_indices = @transform_5, window_bounds = array<i64: 400, 128>}, {pipeline_mode = #tpu.pipeline_mode<synchronous>, transform_indices = @transform_6, window_bounds = array<i64: 1, 128>}, {pipeline_mode = #tpu.pipeline_mode<synchronous>, transform_indices = @transform_7, window_bounds = array<i64: 128, 128>}, {pipeline_mode = #tpu.pipeline_mode<synchronous>, transform_indices = @transform_8, window_bounds = array<i64: 1, 128>}, {pipeline_mode = #tpu.pipeline_mode<synchronous>, transform_indices = @transform_9, window_bounds = array<i64: 128, 128>}, {pipeline_mode = #tpu.pipeline_mode<synchronous>, transform_indices = @transform_10, window_bounds = array<i64: 1, 128>}, {transform_indices = @transform_11, window_bounds = array<i64: 1, 1, 128>}]} {
    %c0 = arith.constant 0 : index
    %c0_0 = arith.constant 0 : index
    %c0_1 = arith.constant 0 : index
    %0 = vector.load %arg1[%c0, %c0_0, %c0_1] : memref<1x784x25xf32, #tpu.memory_space<vmem>>, vector<1x784x25xf32>
    %1 = vector.shape_cast %0 : vector<1x784x25xf32> to vector<784x25xf32>
    %c0_2 = arith.constant 0 : index
    %c0_3 = arith.constant 0 : index
    %2 = vector.load %arg2[%c0_2, %c0_3] : memref<25x6xf32, #tpu.memory_space<vmem>>, vector<25x6xf32>
    %c0_4 = arith.constant 0 : index
    %c0_5 = arith.constant 0 : index
    %3 = vector.load %arg3[%c0_4, %c0_5] : memref<1x6xf32, #tpu.memory_space<vmem>>, vector<1x6xf32>
    %cst = arith.constant dense<0.000000e+00> : vector<784x6xf32>
    %4 = tpu.matmul %1, %2, %cst {dimension_numbers = #tpu.dot_dimension_numbers<[1], [0], [0], [1], [0, 0, 1, 1], [], []>} : vector<784x25xf32>, vector<25x6xf32>, vector<784x6xf32> -> vector<784x6xf32>
    %5 = vector.broadcast %3 : vector<1x6xf32> to vector<784x6xf32>
    %6 = arith.addf %4, %5 : vector<784x6xf32>
    %cst_6 = arith.constant 0.000000e+00 : f32
    %7 = vector.broadcast %cst_6 : f32 to vector<784x6xf32>
    %8 = arith.maximumf %6, %7 : vector<784x6xf32>
    %9 = vector.extract_strided_slice %8 {offsets = [0, 0], sizes = [196, 6], strides = [1, 1]} : vector<784x6xf32> to vector<196x6xf32>
    %10 = vector.extract_strided_slice %8 {offsets = [196, 0], sizes = [196, 6], strides = [1, 1]} : vector<784x6xf32> to vector<196x6xf32>
    %11 = arith.addf %9, %10 : vector<196x6xf32>
    %12 = vector.extract_strided_slice %8 {offsets = [392, 0], sizes = [196, 6], strides = [1, 1]} : vector<784x6xf32> to vector<196x6xf32>
    %13 = arith.addf %11, %12 : vector<196x6xf32>
    %14 = vector.extract_strided_slice %8 {offsets = [588, 0], sizes = [196, 6], strides = [1, 1]} : vector<784x6xf32> to vector<196x6xf32>
    %15 = arith.addf %13, %14 : vector<196x6xf32>
    %cst_7 = arith.constant 2.500000e-01 : f32
    %16 = vector.broadcast %cst_7 : f32 to vector<196x6xf32>
    %17 = arith.mulf %16, %15 : vector<196x6xf32>
    %18 = vector.extract_strided_slice %17 {offsets = [0, 0], sizes = [136, 6], strides = [1, 1]} : vector<196x6xf32> to vector<136x6xf32>
    %19 = vector.extract_strided_slice %17 {offsets = [1, 0], sizes = [136, 6], strides = [1, 1]} : vector<196x6xf32> to vector<136x6xf32>
    %20 = vector.extract_strided_slice %17 {offsets = [2, 0], sizes = [136, 6], strides = [1, 1]} : vector<196x6xf32> to vector<136x6xf32>
    %21 = vector.extract_strided_slice %17 {offsets = [3, 0], sizes = [136, 6], strides = [1, 1]} : vector<196x6xf32> to vector<136x6xf32>
    %22 = vector.extract_strided_slice %17 {offsets = [4, 0], sizes = [136, 6], strides = [1, 1]} : vector<196x6xf32> to vector<136x6xf32>
    %23 = vector.extract_strided_slice %17 {offsets = [14, 0], sizes = [136, 6], strides = [1, 1]} : vector<196x6xf32> to vector<136x6xf32>
    %24 = vector.extract_strided_slice %17 {offsets = [15, 0], sizes = [136, 6], strides = [1, 1]} : vector<196x6xf32> to vector<136x6xf32>
    %25 = vector.extract_strided_slice %17 {offsets = [16, 0], sizes = [136, 6], strides = [1, 1]} : vector<196x6xf32> to vector<136x6xf32>
    %26 = vector.extract_strided_slice %17 {offsets = [17, 0], sizes = [136, 6], strides = [1, 1]} : vector<196x6xf32> to vector<136x6xf32>
    %27 = vector.extract_strided_slice %17 {offsets = [18, 0], sizes = [136, 6], strides = [1, 1]} : vector<196x6xf32> to vector<136x6xf32>
    %28 = vector.extract_strided_slice %17 {offsets = [28, 0], sizes = [136, 6], strides = [1, 1]} : vector<196x6xf32> to vector<136x6xf32>
    %29 = vector.extract_strided_slice %17 {offsets = [29, 0], sizes = [136, 6], strides = [1, 1]} : vector<196x6xf32> to vector<136x6xf32>
    %30 = vector.extract_strided_slice %17 {offsets = [30, 0], sizes = [136, 6], strides = [1, 1]} : vector<196x6xf32> to vector<136x6xf32>
    %31 = vector.extract_strided_slice %17 {offsets = [31, 0], sizes = [136, 6], strides = [1, 1]} : vector<196x6xf32> to vector<136x6xf32>
    %32 = vector.extract_strided_slice %17 {offsets = [32, 0], sizes = [136, 6], strides = [1, 1]} : vector<196x6xf32> to vector<136x6xf32>
    %33 = vector.extract_strided_slice %17 {offsets = [42, 0], sizes = [136, 6], strides = [1, 1]} : vector<196x6xf32> to vector<136x6xf32>
    %34 = vector.extract_strided_slice %17 {offsets = [43, 0], sizes = [136, 6], strides = [1, 1]} : vector<196x6xf32> to vector<136x6xf32>
    %35 = vector.extract_strided_slice %17 {offsets = [44, 0], sizes = [136, 6], strides = [1, 1]} : vector<196x6xf32> to vector<136x6xf32>
    %36 = vector.extract_strided_slice %17 {offsets = [45, 0], sizes = [136, 6], strides = [1, 1]} : vector<196x6xf32> to vector<136x6xf32>
    %37 = vector.extract_strided_slice %17 {offsets = [46, 0], sizes = [136, 6], strides = [1, 1]} : vector<196x6xf32> to vector<136x6xf32>
    %38 = vector.extract_strided_slice %17 {offsets = [56, 0], sizes = [136, 6], strides = [1, 1]} : vector<196x6xf32> to vector<136x6xf32>
    %39 = vector.extract_strided_slice %17 {offsets = [57, 0], sizes = [136, 6], strides = [1, 1]} : vector<196x6xf32> to vector<136x6xf32>
    %40 = vector.extract_strided_slice %17 {offsets = [58, 0], sizes = [136, 6], strides = [1, 1]} : vector<196x6xf32> to vector<136x6xf32>
    %41 = vector.extract_strided_slice %17 {offsets = [59, 0], sizes = [136, 6], strides = [1, 1]} : vector<196x6xf32> to vector<136x6xf32>
    %42 = vector.extract_strided_slice %17 {offsets = [60, 0], sizes = [136, 6], strides = [1, 1]} : vector<196x6xf32> to vector<136x6xf32>
    %43 = tpu.concatenate %18, %19, %20, %21, %22, %23, %24, %25, %26, %27, %28, %29, %30, %31, %32, %33 in 1 : vector<136x6xf32>, vector<136x6xf32>, vector<136x6xf32>, vector<136x6xf32>, vector<136x6xf32>, vector<136x6xf32>, vector<136x6xf32>, vector<136x6xf32>, vector<136x6xf32>, vector<136x6xf32>, vector<136x6xf32>, vector<136x6xf32>, vector<136x6xf32>, vector<136x6xf32>, vector<136x6xf32>, vector<136x6xf32> -> vector<136x96xf32>
    %44 = tpu.concatenate %34, %35, %36, %37, %38, %39, %40, %41, %42 in 1 : vector<136x6xf32>, vector<136x6xf32>, vector<136x6xf32>, vector<136x6xf32>, vector<136x6xf32>, vector<136x6xf32>, vector<136x6xf32>, vector<136x6xf32>, vector<136x6xf32> -> vector<136x54xf32>
    %45 = tpu.concatenate %43, %44 in 1 : vector<136x96xf32>, vector<136x54xf32> -> vector<136x150xf32>
    %c0_8 = arith.constant 0 : index
    %c0_9 = arith.constant 0 : index
    %46 = vector.load %arg4[%c0_8, %c0_9] : memref<150x16xf32, #tpu.memory_space<vmem>>, vector<150x16xf32>
    %c0_10 = arith.constant 0 : index
    %c0_11 = arith.constant 0 : index
    %47 = vector.load %arg5[%c0_10, %c0_11] : memref<1x16xf32, #tpu.memory_space<vmem>>, vector<1x16xf32>
    %cst_12 = arith.constant dense<0.000000e+00> : vector<136x16xf32>
    %48 = tpu.matmul %45, %46, %cst_12 {dimension_numbers = #tpu.dot_dimension_numbers<[1], [0], [0], [1], [0, 0, 1, 1], [], []>} : vector<136x150xf32>, vector<150x16xf32>, vector<136x16xf32> -> vector<136x16xf32>
    %49 = vector.broadcast %47 : vector<1x16xf32> to vector<136x16xf32>
    %50 = arith.addf %48, %49 : vector<136x16xf32>
    %cst_13 = arith.constant 0.000000e+00 : f32
    %51 = vector.broadcast %cst_13 : f32 to vector<136x16xf32>
    %52 = arith.maximumf %50, %51 : vector<136x16xf32>
    %53 = vector.extract_strided_slice %52 {offsets = [0, 0], sizes = [121, 16], strides = [1, 1]} : vector<136x16xf32> to vector<121x16xf32>
    %54 = vector.extract_strided_slice %52 {offsets = [1, 0], sizes = [121, 16], strides = [1, 1]} : vector<136x16xf32> to vector<121x16xf32>
    %55 = arith.addf %53, %54 : vector<121x16xf32>
    %56 = vector.extract_strided_slice %52 {offsets = [14, 0], sizes = [121, 16], strides = [1, 1]} : vector<136x16xf32> to vector<121x16xf32>
    %57 = arith.addf %55, %56 : vector<121x16xf32>
    %58 = vector.extract_strided_slice %52 {offsets = [15, 0], sizes = [121, 16], strides = [1, 1]} : vector<136x16xf32> to vector<121x16xf32>
    %59 = arith.addf %57, %58 : vector<121x16xf32>
    %60 = vector.extract_strided_slice %59 {offsets = [0, 0], sizes = [1, 16], strides = [1, 1]} : vector<121x16xf32> to vector<1x16xf32>
    %61 = vector.extract_strided_slice %59 {offsets = [2, 0], sizes = [1, 16], strides = [1, 1]} : vector<121x16xf32> to vector<1x16xf32>
    %62 = vector.extract_strided_slice %59 {offsets = [4, 0], sizes = [1, 16], strides = [1, 1]} : vector<121x16xf32> to vector<1x16xf32>
    %63 = vector.extract_strided_slice %59 {offsets = [6, 0], sizes = [1, 16], strides = [1, 1]} : vector<121x16xf32> to vector<1x16xf32>
    %64 = vector.extract_strided_slice %59 {offsets = [8, 0], sizes = [1, 16], strides = [1, 1]} : vector<121x16xf32> to vector<1x16xf32>
    %65 = vector.extract_strided_slice %59 {offsets = [28, 0], sizes = [1, 16], strides = [1, 1]} : vector<121x16xf32> to vector<1x16xf32>
    %66 = vector.extract_strided_slice %59 {offsets = [30, 0], sizes = [1, 16], strides = [1, 1]} : vector<121x16xf32> to vector<1x16xf32>
    %67 = vector.extract_strided_slice %59 {offsets = [32, 0], sizes = [1, 16], strides = [1, 1]} : vector<121x16xf32> to vector<1x16xf32>
    %68 = vector.extract_strided_slice %59 {offsets = [34, 0], sizes = [1, 16], strides = [1, 1]} : vector<121x16xf32> to vector<1x16xf32>
    %69 = vector.extract_strided_slice %59 {offsets = [36, 0], sizes = [1, 16], strides = [1, 1]} : vector<121x16xf32> to vector<1x16xf32>
    %70 = vector.extract_strided_slice %59 {offsets = [56, 0], sizes = [1, 16], strides = [1, 1]} : vector<121x16xf32> to vector<1x16xf32>
    %71 = vector.extract_strided_slice %59 {offsets = [58, 0], sizes = [1, 16], strides = [1, 1]} : vector<121x16xf32> to vector<1x16xf32>
    %72 = vector.extract_strided_slice %59 {offsets = [60, 0], sizes = [1, 16], strides = [1, 1]} : vector<121x16xf32> to vector<1x16xf32>
    %73 = vector.extract_strided_slice %59 {offsets = [62, 0], sizes = [1, 16], strides = [1, 1]} : vector<121x16xf32> to vector<1x16xf32>
    %74 = vector.extract_strided_slice %59 {offsets = [64, 0], sizes = [1, 16], strides = [1, 1]} : vector<121x16xf32> to vector<1x16xf32>
    %75 = vector.extract_strided_slice %59 {offsets = [84, 0], sizes = [1, 16], strides = [1, 1]} : vector<121x16xf32> to vector<1x16xf32>
    %76 = vector.extract_strided_slice %59 {offsets = [86, 0], sizes = [1, 16], strides = [1, 1]} : vector<121x16xf32> to vector<1x16xf32>
    %77 = vector.extract_strided_slice %59 {offsets = [88, 0], sizes = [1, 16], strides = [1, 1]} : vector<121x16xf32> to vector<1x16xf32>
    %78 = vector.extract_strided_slice %59 {offsets = [90, 0], sizes = [1, 16], strides = [1, 1]} : vector<121x16xf32> to vector<1x16xf32>
    %79 = vector.extract_strided_slice %59 {offsets = [92, 0], sizes = [1, 16], strides = [1, 1]} : vector<121x16xf32> to vector<1x16xf32>
    %80 = vector.extract_strided_slice %59 {offsets = [112, 0], sizes = [1, 16], strides = [1, 1]} : vector<121x16xf32> to vector<1x16xf32>
    %81 = vector.extract_strided_slice %59 {offsets = [114, 0], sizes = [1, 16], strides = [1, 1]} : vector<121x16xf32> to vector<1x16xf32>
    %82 = vector.extract_strided_slice %59 {offsets = [116, 0], sizes = [1, 16], strides = [1, 1]} : vector<121x16xf32> to vector<1x16xf32>
    %83 = vector.extract_strided_slice %59 {offsets = [118, 0], sizes = [1, 16], strides = [1, 1]} : vector<121x16xf32> to vector<1x16xf32>
    %84 = vector.extract_strided_slice %59 {offsets = [120, 0], sizes = [1, 16], strides = [1, 1]} : vector<121x16xf32> to vector<1x16xf32>
    %85 = tpu.concatenate %60, %61, %62, %63, %64, %65, %66, %67, %68, %69, %70, %71, %72, %73, %74, %75 in 0 : vector<1x16xf32>, vector<1x16xf32>, vector<1x16xf32>, vector<1x16xf32>, vector<1x16xf32>, vector<1x16xf32>, vector<1x16xf32>, vector<1x16xf32>, vector<1x16xf32>, vector<1x16xf32>, vector<1x16xf32>, vector<1x16xf32>, vector<1x16xf32>, vector<1x16xf32>, vector<1x16xf32>, vector<1x16xf32> -> vector<16x16xf32>
    %86 = tpu.concatenate %76, %77, %78, %79, %80, %81, %82, %83, %84 in 0 : vector<1x16xf32>, vector<1x16xf32>, vector<1x16xf32>, vector<1x16xf32>, vector<1x16xf32>, vector<1x16xf32>, vector<1x16xf32>, vector<1x16xf32>, vector<1x16xf32> -> vector<9x16xf32>
    %87 = tpu.concatenate %85, %86 in 0 : vector<16x16xf32>, vector<9x16xf32> -> vector<25x16xf32>
    %cst_14 = arith.constant 2.500000e-01 : f32
    %88 = vector.broadcast %cst_14 : f32 to vector<25x16xf32>
    %89 = arith.mulf %88, %87 : vector<25x16xf32>
    %90 = vector.extract_strided_slice %89 {offsets = [0, 0], sizes = [1, 16], strides = [1, 1]} : vector<25x16xf32> to vector<1x16xf32>
    %91 = vector.extract_strided_slice %89 {offsets = [1, 0], sizes = [1, 16], strides = [1, 1]} : vector<25x16xf32> to vector<1x16xf32>
    %92 = vector.extract_strided_slice %89 {offsets = [2, 0], sizes = [1, 16], strides = [1, 1]} : vector<25x16xf32> to vector<1x16xf32>
    %93 = vector.extract_strided_slice %89 {offsets = [3, 0], sizes = [1, 16], strides = [1, 1]} : vector<25x16xf32> to vector<1x16xf32>
    %94 = vector.extract_strided_slice %89 {offsets = [4, 0], sizes = [1, 16], strides = [1, 1]} : vector<25x16xf32> to vector<1x16xf32>
    %95 = vector.extract_strided_slice %89 {offsets = [5, 0], sizes = [1, 16], strides = [1, 1]} : vector<25x16xf32> to vector<1x16xf32>
    %96 = vector.extract_strided_slice %89 {offsets = [6, 0], sizes = [1, 16], strides = [1, 1]} : vector<25x16xf32> to vector<1x16xf32>
    %97 = vector.extract_strided_slice %89 {offsets = [7, 0], sizes = [1, 16], strides = [1, 1]} : vector<25x16xf32> to vector<1x16xf32>
    %98 = vector.extract_strided_slice %89 {offsets = [8, 0], sizes = [1, 16], strides = [1, 1]} : vector<25x16xf32> to vector<1x16xf32>
    %99 = vector.extract_strided_slice %89 {offsets = [9, 0], sizes = [1, 16], strides = [1, 1]} : vector<25x16xf32> to vector<1x16xf32>
    %100 = vector.extract_strided_slice %89 {offsets = [10, 0], sizes = [1, 16], strides = [1, 1]} : vector<25x16xf32> to vector<1x16xf32>
    %101 = vector.extract_strided_slice %89 {offsets = [11, 0], sizes = [1, 16], strides = [1, 1]} : vector<25x16xf32> to vector<1x16xf32>
    %102 = vector.extract_strided_slice %89 {offsets = [12, 0], sizes = [1, 16], strides = [1, 1]} : vector<25x16xf32> to vector<1x16xf32>
    %103 = vector.extract_strided_slice %89 {offsets = [13, 0], sizes = [1, 16], strides = [1, 1]} : vector<25x16xf32> to vector<1x16xf32>
    %104 = vector.extract_strided_slice %89 {offsets = [14, 0], sizes = [1, 16], strides = [1, 1]} : vector<25x16xf32> to vector<1x16xf32>
    %105 = vector.extract_strided_slice %89 {offsets = [15, 0], sizes = [1, 16], strides = [1, 1]} : vector<25x16xf32> to vector<1x16xf32>
    %106 = vector.extract_strided_slice %89 {offsets = [16, 0], sizes = [1, 16], strides = [1, 1]} : vector<25x16xf32> to vector<1x16xf32>
    %107 = vector.extract_strided_slice %89 {offsets = [17, 0], sizes = [1, 16], strides = [1, 1]} : vector<25x16xf32> to vector<1x16xf32>
    %108 = vector.extract_strided_slice %89 {offsets = [18, 0], sizes = [1, 16], strides = [1, 1]} : vector<25x16xf32> to vector<1x16xf32>
    %109 = vector.extract_strided_slice %89 {offsets = [19, 0], sizes = [1, 16], strides = [1, 1]} : vector<25x16xf32> to vector<1x16xf32>
    %110 = vector.extract_strided_slice %89 {offsets = [20, 0], sizes = [1, 16], strides = [1, 1]} : vector<25x16xf32> to vector<1x16xf32>
    %111 = vector.extract_strided_slice %89 {offsets = [21, 0], sizes = [1, 16], strides = [1, 1]} : vector<25x16xf32> to vector<1x16xf32>
    %112 = vector.extract_strided_slice %89 {offsets = [22, 0], sizes = [1, 16], strides = [1, 1]} : vector<25x16xf32> to vector<1x16xf32>
    %113 = vector.extract_strided_slice %89 {offsets = [23, 0], sizes = [1, 16], strides = [1, 1]} : vector<25x16xf32> to vector<1x16xf32>
    %114 = vector.extract_strided_slice %89 {offsets = [24, 0], sizes = [1, 16], strides = [1, 1]} : vector<25x16xf32> to vector<1x16xf32>
    %115 = tpu.concatenate %90, %91, %92, %93, %94, %95, %96, %97, %98, %99, %100, %101, %102, %103, %104, %105 in 1 : vector<1x16xf32>, vector<1x16xf32>, vector<1x16xf32>, vector<1x16xf32>, vector<1x16xf32>, vector<1x16xf32>, vector<1x16xf32>, vector<1x16xf32>, vector<1x16xf32>, vector<1x16xf32>, vector<1x16xf32>, vector<1x16xf32>, vector<1x16xf32>, vector<1x16xf32>, vector<1x16xf32>, vector<1x16xf32> -> vector<1x256xf32>
    %116 = tpu.concatenate %106, %107, %108, %109, %110, %111, %112, %113, %114 in 1 : vector<1x16xf32>, vector<1x16xf32>, vector<1x16xf32>, vector<1x16xf32>, vector<1x16xf32>, vector<1x16xf32>, vector<1x16xf32>, vector<1x16xf32>, vector<1x16xf32> -> vector<1x144xf32>
    %117 = tpu.concatenate %115, %116 in 1 : vector<1x256xf32>, vector<1x144xf32> -> vector<1x400xf32>
    %c0_15 = arith.constant 0 : index
    %c0_16 = arith.constant 0 : index
    %118 = vector.load %arg6[%c0_15, %c0_16] : memref<400x128xf32, #tpu.memory_space<vmem>>, vector<400x128xf32>
    %c0_17 = arith.constant 0 : index
    %c0_18 = arith.constant 0 : index
    %119 = vector.load %arg7[%c0_17, %c0_18] : memref<1x128xf32, #tpu.memory_space<vmem>>, vector<1x128xf32>
    %cst_19 = arith.constant dense<0.000000e+00> : vector<1x128xf32>
    %120 = tpu.matmul %117, %118, %cst_19 {dimension_numbers = #tpu.dot_dimension_numbers<[1], [0], [0], [1], [0, 0, 1, 1], [], []>} : vector<1x400xf32>, vector<400x128xf32>, vector<1x128xf32> -> vector<1x128xf32>
    %121 = arith.addf %120, %119 : vector<1x128xf32>
    %cst_20 = arith.constant 0.000000e+00 : f32
    %122 = vector.broadcast %cst_20 : f32 to vector<1x128xf32>
    %123 = arith.maximumf %121, %122 : vector<1x128xf32>
    %c0_21 = arith.constant 0 : index
    %c0_22 = arith.constant 0 : index
    %124 = vector.load %arg8[%c0_21, %c0_22] : memref<128x128xf32, #tpu.memory_space<vmem>>, vector<128x128xf32>
    %c0_23 = arith.constant 0 : index
    %c0_24 = arith.constant 0 : index
    %125 = vector.load %arg9[%c0_23, %c0_24] : memref<1x128xf32, #tpu.memory_space<vmem>>, vector<1x128xf32>
    %cst_25 = arith.constant dense<0.000000e+00> : vector<1x128xf32>
    %126 = tpu.matmul %123, %124, %cst_25 {dimension_numbers = #tpu.dot_dimension_numbers<[1], [0], [0], [1], [0, 0, 1, 1], [], []>} : vector<1x128xf32>, vector<128x128xf32>, vector<1x128xf32> -> vector<1x128xf32>
    %127 = arith.addf %126, %125 : vector<1x128xf32>
    %cst_26 = arith.constant 0.000000e+00 : f32
    %128 = vector.broadcast %cst_26 : f32 to vector<1x128xf32>
    %129 = arith.maximumf %127, %128 : vector<1x128xf32>
    %c0_27 = arith.constant 0 : index
    %c0_28 = arith.constant 0 : index
    %130 = vector.load %arg10[%c0_27, %c0_28] : memref<128x128xf32, #tpu.memory_space<vmem>>, vector<128x128xf32>
    %c0_29 = arith.constant 0 : index
    %c0_30 = arith.constant 0 : index
    %131 = vector.load %arg11[%c0_29, %c0_30] : memref<1x128xf32, #tpu.memory_space<vmem>>, vector<1x128xf32>
    %cst_31 = arith.constant dense<0.000000e+00> : vector<1x128xf32>
    %132 = tpu.matmul %129, %130, %cst_31 {dimension_numbers = #tpu.dot_dimension_numbers<[1], [0], [0], [1], [0, 0, 1, 1], [], []>} : vector<1x128xf32>, vector<128x128xf32>, vector<1x128xf32> -> vector<1x128xf32>
    %133 = arith.addf %132, %131 : vector<1x128xf32>
    %c0_32 = arith.constant 0 : index
    %c0_33 = arith.constant 0 : index
    %c0_34 = arith.constant 0 : index
    %134 = vector.load %arg12[%c0_32, %c0_33, %c0_34] : memref<1x1x128xf32, #tpu.memory_space<vmem>>, vector<1x1x128xf32>
    %135 = vector.shape_cast %134 : vector<1x1x128xf32> to vector<1x128xf32>
    %136 = vector.shape_cast %133 : vector<1x128xf32> to vector<1x1x128xf32>
    tpu.vector_store %arg12[%c0_32, %c0_33, %c0_34], %136 {strides = array<i32>} : memref<1x1x128xf32, #tpu.memory_space<vmem>>, vector<1x1x128xf32>,
    return
  }
  func.func @transform_0(%arg0: i32) -> (i32, i32, i32) {
    %c0_i32 = arith.constant 0 : i32
    %c0_i32_0 = arith.constant 0 : i32
    %c0_i32_1 = arith.constant 0 : i32
    return %arg0, %c0_i32, %c0_i32_0 : i32, i32, i32
  }
  func.func @transform_1(%arg0: i32) -> (i32, i32) {
    %c0_i32 = arith.constant 0 : i32
    %c0_i32_0 = arith.constant 0 : i32
    %c0_i32_1 = arith.constant 0 : i32
    return %c0_i32, %c0_i32_0 : i32, i32
  }
  func.func @transform_2(%arg0: i32) -> (i32, i32) {
    %c0_i32 = arith.constant 0 : i32
    %c0_i32_0 = arith.constant 0 : i32
    %c0_i32_1 = arith.constant 0 : i32
    return %c0_i32, %c0_i32_0 : i32, i32
  }
  func.func @transform_3(%arg0: i32) -> (i32, i32) {
    %c0_i32 = arith.constant 0 : i32
    %c0_i32_0 = arith.constant 0 : i32
    %c0_i32_1 = arith.constant 0 : i32
    return %c0_i32, %c0_i32_0 : i32, i32
  }
  func.func @transform_4(%arg0: i32) -> (i32, i32) {
    %c0_i32 = arith.constant 0 : i32
    %c0_i32_0 = arith.constant 0 : i32
    %c0_i32_1 = arith.constant 0 : i32
    return %c0_i32, %c0_i32_0 : i32, i32
  }
  func.func @transform_5(%arg0: i32) -> (i32, i32) {
    %c0_i32 = arith.constant 0 : i32
    %c0_i32_0 = arith.constant 0 : i32
    %c0_i32_1 = arith.constant 0 : i32
    return %c0_i32, %c0_i32_0 : i32, i32
  }
  func.func @transform_6(%arg0: i32) -> (i32, i32) {
    %c0_i32 = arith.constant 0 : i32
    %c0_i32_0 = arith.constant 0 : i32
    %c0_i32_1 = arith.constant 0 : i32
    return %c0_i32, %c0_i32_0 : i32, i32
  }
  func.func @transform_7(%arg0: i32) -> (i32, i32) {
    %c0_i32 = arith.constant 0 : i32
    %c0_i32_0 = arith.constant 0 : i32
    %c0_i32_1 = arith.constant 0 : i32
    return %c0_i32, %c0_i32_0 : i32, i32
  }
  func.func @transform_8(%arg0: i32) -> (i32, i32) {
    %c0_i32 = arith.constant 0 : i32
    %c0_i32_0 = arith.constant 0 : i32
    %c0_i32_1 = arith.constant 0 : i32
    return %c0_i32, %c0_i32_0 : i32, i32
  }
  func.func @transform_9(%arg0: i32) -> (i32, i32) {
    %c0_i32 = arith.constant 0 : i32
    %c0_i32_0 = arith.constant 0 : i32
    %c0_i32_1 = arith.constant 0 : i32
    return %c0_i32, %c0_i32_0 : i32, i32
  }
  func.func @transform_10(%arg0: i32) -> (i32, i32) {
    %c0_i32 = arith.constant 0 : i32
    %c0_i32_0 = arith.constant 0 : i32
    %c0_i32_1 = arith.constant 0 : i32
    return %c0_i32, %c0_i32_0 : i32, i32
  }
  func.func @transform_11(%arg0: i32) -> (i32, i32, i32) {
    %c0_i32 = arith.constant 0 : i32
    %c0_i32_0 = arith.constant 0 : i32
    %c0_i32_1 = arith.constant 0 : i32
    return %arg0, %c0_i32, %c0_i32_0 : i32, i32, i32
  }
}

</mosaic_0001>

<bundles_post_ra>
// kernel: lenet_forward.1
= control target key start
LH: loop header
LB: loop body
LE: loop exit
PB: predicated region body
PF: predicated region fallthrough
CT: control target
= control target key end

     0   :  { %s9400_s0 = inlined_call_operand.vmem [shape: f32[2,784,25], index: 0, kind: input, shape index: {}]   ;;  %s9401_s1 = inlined_call_operand.vmem [shape: f32[25,6], index: 1, kind: input, shape index: {}]   ;;  %s9402_s2 = inlined_call_operand.vmem [shape: f32[1,6], index: 2, kind: input, shape index: {}]   ;;  %s9403_s3 = inlined_call_operand.vmem [shape: f32[150,16], index: 3, kind: input, shape index: {}]   ;;  %s9404_s4 = inlined_call_operand.vmem [shape: f32[1,16], index: 4, kind: input, shape index: {}]   ;;  %s9405_s5 = inlined_call_operand.vmem [shape: f32[400,128], index: 5, kind: input, shape index: {}]   ;;  %s9406_s6 = inlined_call_operand.vmem [shape: f32[1,128], index: 6, kind: input, shape index: {}]   ;;  %s9407_s7 = inlined_call_operand.vmem [shape: f32[128,128], index: 7, kind: input, shape index: {}]   ;;  %s9408_s8 = inlined_call_operand.vmem [shape: f32[1,128], index: 8, kind: input, shape index: {}]   ;;  %s9409_s9 = inlined_call_operand.vmem [shape: f32[128,128], index: 9, kind: input, shape index: {}]   ;;  %s9410_s10 = inlined_call_operand.vmem [shape: f32[1,128], index: 10, kind: input, shape index: {}]   ;;  %s9411_s11 = inlined_call_operand.hbm [shape: f32[2,1,128], index: 11, kind: output, shape index: {}]  }
   0x1   :  { %9651 = sst [smem:[#allocation164_spill]] %s9400_s0 }
   0x2   :  { %9652 = sst [smem:[#allocation165_spill]] %s9401_s1 }
   0x3   :  { %9653 = sst [smem:[#allocation166_spill]] %s9402_s2 }
   0x4   :  { %16 = vsyncpa [#allocation3], 0 }
   0x5   :  { %18 = vsyncpa [#allocation3 + $0x1], 0  ;;  %s5862_s17 = smov 0   ;;  %s5864_s18 = smov 0  }
   0x6   :  { %s5866_s19 = smov 0   ;;  %s5868_s20 = smov 0  }
   0x7 LB: > { %9654 = sst [smem:[#allocation5_spill]] %s5762_s17  ;;  %s5883_s21 = sadd.s32 4294967295, %s5774_s20   ;;  %s5774_s20 = sphi %s5868_s20, %s10161_s20   ;;  %s5770_s19 = sphi %s5866_s19, %s10163_s19   ;;  %s5766_s18 = sphi %s5864_s18, %s10165_s18   ;;  %s5762_s17 = sphi %s5862_s17, %s10164_s17  }
   0x8   : > { %9655 = sst [smem:[#allocation6_spill]] %s5770_s19  ;;  %s4543_s22 = sadd.s32 4294967294, %s5774_s20  }
   0x9   : > { %9656 = sst [smem:[#allocation7_spill]] %s5774_s20  ;;  %s5887_s23 = sadd.s32 1, %s5774_s20  }
   0xa   : > { %9657 = sst [smem:[#allocation8_spill]] %s5887_s23  ;;  %s267_s24 = sadd.s32 1, %s5770_s19 }
   0xb   : > { %s264_s25 = ssub.s32 %s5774_s20, %s5887_s23  ;;  %p277_p0 = scmp.ne.s32.totalorder %s5770_s19, %s5766_s18 }
   0xc   : > { %p265_p1 = scmp.eq.s32.totalorder %s264_s25, 0  ;;  %p278_p2 = scmp.eq.s32.totalorder %s5883_s21, 1 }
   0xd   : > { %p283_p3 = scmp.ne.s32.totalorder %s5766_s18, %s5762_s17  ;;  %p284_p4 = scmp.eq.s32.totalorder %s4543_s22, 1 }
   0xe   : > { %s5898_s26 = scalar_select %p265_p1, %s5770_s19, %s267_s24  }
   0xf   : > { %p5900_p5 = por %p278_p2, %p277_p0  ;;  %p5904_p6 = por %p284_p4, %p283_p3 }
  0x10   : > { %9658 = sst [smem:[#allocation9_spill]] %s5898_s26  ;;  %p4546_p7 = scmp.ge.s32.totalorder %s5774_s20, 1 }
  0x11   : > { %s9660_s28 = scalar_select %p5904_p6, 1, 0 }
  0x12   : > { %p340_p8 = scmp.lt.s32.totalorder %s5774_s20, 3 }
  0x13   : > { %9661 = sst [smem:[#allocation10_spill]] %s9660_s28 }
  0x14   : > { %p341_p9 = pnand %p4546_p7, %p340_p8 }
  0x16   : > { %344 = sbr.rel (%p341_p9) target bundleno = 2122 (0x84a), region = 64 }
  0x1d   : > { %s9662_s1 = sld [smem:[#allocation165_spill]]  ;;  %vm9632_vm0 = vcmask 1040384   ;;  %p379_p10 = scmp.lt.s32.totalorder %s5883_s21, 1  ;;  %vm5776_vm1 = vmmov 1   ;;  %vm493_vm3 = vcmask 203776   ;;  %vm9630_vm4 = vcmask 1043456  }
  0x1e   : > { %vm5072_vm2 = vmpackc.low %vm9632_vm0, %vm5776_vm1  ;;  %s9663_s0 = sld [smem:[#allocation164_spill]]  ;;  %s9664_s2 = sld [smem:[#allocation166_spill]]  ;;  %vm9644_vm5 = vcmask 1046528   ;;  %vm9629_vm6 = vcmask 1045504   ;;  %vm9647_vm7 = vcmask 1044480   ;;  %vm9637_vm8 = vcmask 1041408  }
  0x1f   : > { %s380_s24 = scalar_select %p379_p10, %s5883_s21, 1  ;;  %vm9631_vm9 = vcmask 1042432   ;;  %vm2810_vm10 = vcmask 48128   ;;  %vm2828_vm11 = vcmask 97280   ;;  %vm2846_vm12 = vcmask 146432  }
  0x20   : > { %s9432_s15 = smov 42   ;;  %s9434_s16 = smov 24   ;;  %vm2864_vm13 = vcmask 195584   ;;  %vm2882_vm14 = vcmask 244736   ;;  %vm9649_vm15 = vcmask 293888   ;;  %vm2918_vm1 = vcmask 343040  }
  0x21   : > { %s5211_s25 = smul.u32 784, %s380_s24  ;;  %s9424_s22 = smov 6  }
  0x22   : > { %s9436_s24 = smov 36   ;;  %s9416_s29 = smov 84  }
  0x23   : > { %v482_v0 = vld [vmem:[%s9662_s1] sm:$0xff]  ;;  %v483_v1 = vld [vmem:[%s9662_s1 + $0x8] sm:$0xff]  ;;  %v484_v2 = vld [vmem:[%s9662_s1 + $0x10] sm:$0xff]  ;;  %s9438_s30 = smov 18   ;;  %s9440_s13 = smov 30  }
  0x24   : > { %v5067_v3 = vpack.c.bf16 %v483_v1, %v482_v0  ;;  %v485_v4 = vld [vmem:[%s9662_s1 + $0x18] sm:$0x1]  ;;  %s5928_s12 = scalar_lea.vmem %s9663_s0, %s5211_s25  ;;  %s9422_s25 = smov 12  }
  0x25   : > { %v5071_v5 = vpack.c.bf16 %v485_v4, %v484_v2  ;;  %v384_v6 = vld [vmem:[%s5928_s12] sm:$0xff]  ;;  %v385_v7 = vld [vmem:[%s5928_s12 + $0x8] sm:$0xff]  ;;  %v386_v8 = vld [vmem:[%s5928_s12 + $0x10] sm:$0xff]  ;;  %s9412_s14 = smov 54   ;;  %s9696_s0 = smov 90  }
  0x26   : > { %5068 = vmatprep.subr.bf16.mxu0 %v5067_v3  ;;  %4850 = vmatprep.mubr.msk.f32.mxu0 %vm493_vm3, %v384_v6  ;;  %v387_v9 = vld [vmem:[%s5928_s12 + $0x18] sm:$0xff]  ;;  %v388_v10 = vld [vmem:[%s5928_s12 + $0x20] sm:$0xff]  ;;  %v389_v11 = vld [vmem:[%s5928_s12 + $0x28] sm:$0xff]  ;;  %s9698_s1 = smov 72   ;;  %s9706_s26 = smov 42  }
  0x27   : > { %5070 = vmatpush3.bf16.msra.mxu0 %v5067_v3  ;;  %v390_v12 = vld [vmem:[%s5928_s12 + $0x30] sm:$0xff]  ;;  %v391_v13 = vld [vmem:[%s5928_s12 + $0x38] sm:$0xff]  ;;  %v392_v14 = vld [vmem:[%s5928_s12 + $0x40] sm:$0xff]  ;;  %s9713_s19 = smov 30   ;;  %s5795_s23 = smov 32  }
  0x28   : > { %5073 = vmatprep.subr.msk.bf16.mxu0 %vm5072_vm2, %v5071_v5  ;;  %v393_v15 = vld [vmem:[%s5928_s12 + $0x48] sm:$0xff]  ;;  %v394_v16 = vld [vmem:[%s5928_s12 + $0x50] sm:$0xff]  ;;  %v395_v17 = vld [vmem:[%s5928_s12 + $0x58] sm:$0xff]  ;;  %s5796_s28 = smov 16  }
  0x29   : > { %v396_v18 = vld [vmem:[%s5928_s12 + $0x60] sm:$0xff]  ;;  %v397_v19 = vld [vmem:[%s5928_s12 + $0x68] sm:$0xff]  ;;  %v398_v20 = vld [vmem:[%s5928_s12 + $0x70] sm:$0xff] }
  0x2a   : > { %v399_v21 = vld [vmem:[%s5928_s12 + $0x78] sm:$0xff]  ;;  %v400_v22 = vld [vmem:[%s5928_s12 + $0x80] sm:$0xff]  ;;  %v401_v23 = vld [vmem:[%s5928_s12 + $0x88] sm:$0xff] }
  0x2b   : > { %5076 = vmatpush3.bf16.msk.msra.mxu0 %vm5072_vm2, %v5071_v5  ;;  %v402_v24 = vld [vmem:[%s5928_s12 + $0x90] sm:$0xff]  ;;  %v403_v25 = vld [vmem:[%s5928_s12 + $0x98] sm:$0xff]  ;;  %v404_v26 = vld [vmem:[%s5928_s12 + $0xa0] sm:$0xff]  ;;  %vm2936_vm2 = vcmask 392192  }
  0x2c   : > { %v405_v27 = vld [vmem:[%s5928_s12 + $0xa8] sm:$0xff]  ;;  %v406_v28 = vld [vmem:[%s5928_s12 + $0xb0] sm:$0xff]  ;;  %v407_v29 = vld [vmem:[%s5928_s12 + $0xb8] sm:$0xff] }
  0x2d   : > { %v408_v30 = vld [vmem:[%s5928_s12 + $0xc0] sm:$0xff]  ;;  %v409_v31 = vld [vmem:[%s5928_s12 + $0xc8] sm:$0xff]  ;;  %v410_v32 = vld [vmem:[%s5928_s12 + $0xd0] sm:$0xff] }
  0x2e   : > { %4851 = vmatmul.mubr.msk.f32.vlgmr.msra.gmra.mrb[0].mxu0 %vm493_vm3, %v385_v7  ;;  %v411_v33 = vld [vmem:[%s5928_s12 + $0xd8] sm:$0xff]  ;;  %v412_v34 = vld [vmem:[%s5928_s12 + $0xe0] sm:$0xff]  ;;  %v413_v35 = vld [vmem:[%s5928_s12 + $0xe8] sm:$0xff] }
  0x2f   : > { %4853 = vmatprep.mubr.msk.f32.mxu0 %vm493_vm3, %v386_v8  ;;  %v414_v36 = vld [vmem:[%s5928_s12 + $0xf0] sm:$0xff]  ;;  %v415_v37 = vld [vmem:[%s5928_s12 + $0xf8] sm:$0xff]  ;;  %v416_v38 = vld [vmem:[%s5928_s12 + $0x100] sm:$0xff] }
  0x30   : > { %v417_v39 = vld [vmem:[%s5928_s12 + $0x108] sm:$0xff]  ;;  %v418_v40 = vld [vmem:[%s5928_s12 + $0x110] sm:$0xff]  ;;  %v419_v41 = vld [vmem:[%s5928_s12 + $0x118] sm:$0xff] }
  0x31   : > { %v420_v42 = vld [vmem:[%s5928_s12 + $0x120] sm:$0xff]  ;;  %v421_v43 = vld [vmem:[%s5928_s12 + $0x128] sm:$0xff]  ;;  %v422_v44 = vld [vmem:[%s5928_s12 + $0x130] sm:$0xff] }
  0x32   : > { %4854 = vmatmul.mubr.msk.f32.gmra.mrb[2].mxu0 %vm493_vm3, %v387_v9  ;;  %v423_v45 = vld [vmem:[%s5928_s12 + $0x138] sm:$0xff]  ;;  %v424_v46 = vld [vmem:[%s5928_s12 + $0x140] sm:$0xff]  ;;  %v425_v47 = vld [vmem:[%s5928_s12 + $0x148] sm:$0xff] }
  0x33   : > { %4856 = vmatprep.mubr.msk.f32.mxu0 %vm493_vm3, %v388_v10  ;;  %v426_v48 = vld [vmem:[%s5928_s12 + $0x150] sm:$0xff]  ;;  %v427_v49 = vld [vmem:[%s5928_s12 + $0x158] sm:$0xff]  ;;  %v428_v50 = vld [vmem:[%s5928_s12 + $0x160] sm:$0xff] }
  0x34   : > { %v429_v51 = vld [vmem:[%s5928_s12 + $0x168] sm:$0xff]  ;;  %v430_v52 = vld [vmem:[%s5928_s12 + $0x170] sm:$0xff]  ;;  %v431_v53 = vld [vmem:[%s5928_s12 + $0x178] sm:$0xff] }
  0x35   : > { %v432_v54 = vld [vmem:[%s5928_s12 + $0x180] sm:$0xff]  ;;  %v433_v55 = vld [vmem:[%s5928_s12 + $0x188] sm:$0xff]  ;;  %v434_v56 = vld [vmem:[%s5928_s12 + $0x190] sm:$0xff] }
  0x36   : > { %4857 = vmatmul.mubr.msk.f32.gmra.mrb[4].mxu0 %vm493_vm3, %v389_v11  ;;  %v435_v57 = vld [vmem:[%s5928_s12 + $0x198] sm:$0xff]  ;;  %v436_v58 = vld [vmem:[%s5928_s12 + $0x1a0] sm:$0xff]  ;;  %v437_v59 = vld [vmem:[%s5928_s12 + $0x1a8] sm:$0xff] }
  0x37   : > { %4859 = vmatprep.mubr.msk.f32.mxu0 %vm493_vm3, %v390_v12  ;;  %v438_v60 = vld [vmem:[%s5928_s12 + $0x1b0] sm:$0xff]  ;;  %v439_v61 = vld [vmem:[%s5928_s12 + $0x1b8] sm:$0xff]  ;;  %v440_v62 = vld [vmem:[%s5928_s12 + $0x1c0] sm:$0xff] }
  0x38   : > { %v441_v63 = vld [vmem:[%s5928_s12 + $0x1c8] sm:$0xff]  ;;  %v442_v0 = vld [vmem:[%s5928_s12 + $0x1d0] sm:$0xff]  ;;  %v443_v1 = vld [vmem:[%s5928_s12 + $0x1d8] sm:$0xff] }
  0x39   : > { %v444_v2 = vld [vmem:[%s5928_s12 + $0x1e0] sm:$0xff]  ;;  %v445_v3 = vld [vmem:[%s5928_s12 + $0x1e8] sm:$0xff]  ;;  %v446_v4 = vld [vmem:[%s5928_s12 + $0x1f0] sm:$0xff] }
  0x3a   : > { %4860 = vmatmul.mubr.msk.f32.gmra.mrb[6].mxu0 %vm493_vm3, %v391_v13  ;;  %v447_v5 = vld [vmem:[%s5928_s12 + $0x1f8] sm:$0xff]  ;;  %v448_v6 = vld [vmem:[%s5928_s12 + $0x200] sm:$0xff]  ;;  %v449_v7 = vld [vmem:[%s5928_s12 + $0x208] sm:$0xff] }
  0x3b   : > { %4862 = vmatprep.mubr.msk.f32.mxu0 %vm493_vm3, %v392_v14  ;;  %v450_v8 = vld [vmem:[%s5928_s12 + $0x210] sm:$0xff]  ;;  %v451_v9 = vld [vmem:[%s5928_s12 + $0x218] sm:$0xff]  ;;  %v452_v10 = vld [vmem:[%s5928_s12 + $0x220] sm:$0xff] }
  0x3c   : > { %v453_v11 = vld [vmem:[%s5928_s12 + $0x228] sm:$0xff]  ;;  %v454_v12 = vld [vmem:[%s5928_s12 + $0x230] sm:$0xff]  ;;  %v455_v13 = vld [vmem:[%s5928_s12 + $0x238] sm:$0xff] }
  0x3d   : > { %v456_v14 = vld [vmem:[%s5928_s12 + $0x240] sm:$0xff] }
  0x3e   : > { %4863 = vmatmul.mubr.msk.f32.gmra.mrb[8].mxu0 %vm493_vm3, %v393_v15  ;;  %v457_v15 = vld [vmem:[%s5928_s12 + $0x248] sm:$0xff] }
  0x3f   : > { %4865 = vmatprep.mubr.msk.f32.mxu0 %vm493_vm3, %v394_v16  ;;  %v458_v16 = vld [vmem:[%s5928_s12 + $0x250] sm:$0xff] }
  0x42   : > { %4866 = vmatmul.mubr.msk.f32.gmra.mrb[10].mxu0 %vm493_vm3, %v395_v17  ;;  %v459_v17 = vld [vmem:[%s5928_s12 + $0x258] sm:$0xff] }
  0x43   : > { %4868 = vmatprep.mubr.msk.f32.mxu0 %vm493_vm3, %v396_v18  ;;  %v460_v18 = vld [vmem:[%s5928_s12 + $0x260] sm:$0xff] }
  0x46   : > { %4869 = vmatmul.mubr.msk.f32.gmra.mrb[12].mxu0 %vm493_vm3, %v397_v19  ;;  %v461_v19 = vld [vmem:[%s5928_s12 + $0x268] sm:$0xff] }
  0x47   : > { %4871 = vmatprep.mubr.msk.f32.mxu0 %vm493_vm3, %v398_v20  ;;  %v462_v20 = vld [vmem:[%s5928_s12 + $0x270] sm:$0xff] }
  0x4a   : > { %4872 = vmatmul.mubr.msk.f32.gmra.mrb[14].mxu0 %vm493_vm3, %v399_v21  ;;  %v463_v21 = vld [vmem:[%s5928_s12 + $0x278] sm:$0xff] }
  0x4b   : > { %4874 = vmatprep.mubr.msk.f32.mxu0 %vm493_vm3, %v400_v22  ;;  %v464_v22 = vld [vmem:[%s5928_s12 + $0x280] sm:$0xff] }
  0x4e   : > { %4875 = vmatmul.mubr.msk.f32.gmra.mrb[16].mxu0 %vm493_vm3, %v401_v23  ;;  %v465_v23 = vld [vmem:[%s5928_s12 + $0x288] sm:$0xff] }
  0x4f   : > { %4877 = vmatprep.mubr.msk.f32.mxu0 %vm493_vm3, %v402_v24  ;;  %v466_v24 = vld [vmem:[%s5928_s12 + $0x290] sm:$0xff] }
  0x52   : > { %4878 = vmatmul.mubr.msk.f32.gmra.mrb[18].mxu0 %vm493_vm3, %v403_v25  ;;  %v467_v25 = vld [vmem:[%s5928_s12 + $0x298] sm:$0xff] }
  0x53   : > { %4880 = vmatprep.mubr.msk.f32.mxu0 %vm493_vm3, %v404_v26  ;;  %v468_v26 = vld [vmem:[%s5928_s12 + $0x2a0] sm:$0xff] }
  0x56   : > { %4881 = vmatmul.mubr.msk.f32.gmra.mrb[20].mxu0 %vm493_vm3, %v405_v27  ;;  %v469_v27 = vld [vmem:[%s5928_s12 + $0x2a8] sm:$0xff] }
  0x57   : > { %4883 = vmatprep.mubr.msk.f32.mxu0 %vm493_vm3, %v406_v28  ;;  %v470_v28 = vld [vmem:[%s5928_s12 + $0x2b0] sm:$0xff] }
  0x5a   : > { %4884 = vmatmul.mubr.msk.f32.gmra.mrb[22].mxu0 %vm493_vm3, %v407_v29  ;;  %v471_v29 = vld [vmem:[%s5928_s12 + $0x2b8] sm:$0xff] }
  0x5b   : > { %4886 = vmatprep.mubr.msk.f32.mxu0 %vm493_vm3, %v408_v30  ;;  %v472_v30 = vld [vmem:[%s5928_s12 + $0x2c0] sm:$0xff] }
  0x5e   : > { %4887 = vmatmul.mubr.msk.f32.gmra.mrb[24].mxu0 %vm493_vm3, %v409_v31  ;;  %v473_v31 = vld [vmem:[%s5928_s12 + $0x2c8] sm:$0xff] }
  0x5f   : > { %4889 = vmatprep.mubr.msk.f32.mxu0 %vm493_vm3, %v410_v32  ;;  %v474_v32 = vld [vmem:[%s5928_s12 + $0x2d0] sm:$0xff] }
  0x62   : > { %4890 = vmatmul.mubr.msk.f32.gmra.mrb[26].mxu0 %vm493_vm3, %v411_v33  ;;  %v475_v33 = vld [vmem:[%s5928_s12 + $0x2d8] sm:$0xff] }
  0x63   : > { %4892 = vmatprep.mubr.msk.f32.mxu0 %vm493_vm3, %v412_v34  ;;  %v476_v34 = vld [vmem:[%s5928_s12 + $0x2e0] sm:$0xff] }
  0x66   : > { %4893 = vmatmul.mubr.msk.f32.gmra.mrb[28].mxu0 %vm493_vm3, %v413_v35  ;;  %v477_v35 = vld [vmem:[%s5928_s12 + $0x2e8] sm:$0xff] }
  0x67   : > { %4895 = vmatprep.mubr.msk.f32.mxu0 %vm493_vm3, %v414_v36  ;;  %v478_v36 = vld [vmem:[%s5928_s12 + $0x2f0] sm:$0xff] }
  0x6a   : > { %4896 = vmatmul.mubr.msk.f32.gmra.mrb[30].mxu0 %vm493_vm3, %v415_v37  ;;  %v479_v37 = vld [vmem:[%s5928_s12 + $0x2f8] sm:$0xff] }
  0x6b   : > { %4898 = vmatprep.mubr.msk.f32.mxu0 %vm493_vm3, %v416_v38  ;;  %v480_v38 = vld [vmem:[%s5928_s12 + $0x300] sm:$0xff] }
  0x6e   : > { %4899 = vmatmul.mubr.msk.f32.gmra.mrb[32].mxu0 %vm493_vm3, %v417_v39  ;;  %v481_v39 = vld [vmem:[%s5928_s12 + $0x308] sm:$0xff]  ;;  %s9414_s12 = smov 48  }
  0x6f   : > { %4901 = vmatprep.mubr.msk.f32.mxu0 %vm493_vm3, %v418_v40 }
  0x72   : > { %4902 = vmatmul.mubr.msk.f32.gmra.mrb[34].mxu0 %vm493_vm3, %v419_v41 }
  0x73   : > { %4904 = vmatprep.mubr.msk.f32.mxu0 %vm493_vm3, %v420_v42 }
  0x76   : > { %4905 = vmatmul.mubr.msk.f32.gmra.mrb[36].mxu0 %vm493_vm3, %v421_v43 }
  0x77   : > { %4907 = vmatprep.mubr.msk.f32.mxu0 %vm493_vm3, %v422_v44 }
  0x7a   : > { %4908 = vmatmul.mubr.msk.f32.gmra.mrb[38].mxu0 %vm493_vm3, %v423_v45 }
  0x7b   : > { %4910 = vmatprep.mubr.msk.f32.mxu0 %vm493_vm3, %v424_v46 }
  0x7e   : > { %4911 = vmatmul.mubr.msk.f32.gmra.mrb[40].mxu0 %vm493_vm3, %v425_v47 }
  0x7f   : > { %4913 = vmatprep.mubr.msk.f32.mxu0 %vm493_vm3, %v426_v48 }
  0x82   : > { %4914 = vmatmul.mubr.msk.f32.gmra.mrb[42].mxu0 %vm493_vm3, %v427_v49 }
  0x83   : > { %4916 = vmatprep.mubr.msk.f32.mxu0 %vm493_vm3, %v428_v50 }
  0x86   : > { %4917 = vmatmul.mubr.msk.f32.gmra.mrb[44].mxu0 %vm493_vm3, %v429_v51 }
  0x87   : > { %4919 = vmatprep.mubr.msk.f32.mxu0 %vm493_vm3, %v430_v52 }
  0x8a   : > { %4920 = vmatmul.mubr.msk.f32.gmra.mrb[46].mxu0 %vm493_vm3, %v431_v53 }
  0x8b   : > { %4922 = vmatprep.mubr.msk.f32.mxu0 %vm493_vm3, %v432_v54 }
  0x8e   : > { %4923 = vmatmul.mubr.msk.f32.gmra.mrb[48].mxu0 %vm493_vm3, %v433_v55 }
  0x8f   : > { %4925 = vmatprep.mubr.msk.f32.mxu0 %vm493_vm3, %v434_v56 }
  0x92   : > { %4926 = vmatmul.mubr.msk.f32.gmra.mrb[50].mxu0 %vm493_vm3, %v435_v57 }
  0x93   : > { %4928 = vmatprep.mubr.msk.f32.mxu0 %vm493_vm3, %v436_v58 }
  0x96   : > { %4929 = vmatmul.mubr.msk.f32.gmra.mrb[52].mxu0 %vm493_vm3, %v437_v59 }
  0x97   : > { %4931 = vmatprep.mubr.msk.f32.mxu0 %vm493_vm3, %v438_v60 }
  0x9a   : > { %4932 = vmatmul.mubr.msk.f32.gmra.mrb[54].mxu0 %vm493_vm3, %v439_v61 }
  0x9b   : > { %4934 = vmatprep.mubr.msk.f32.mxu0 %vm493_vm3, %v440_v62 }
  0x9e   : > { %4935 = vmatmul.mubr.msk.f32.gmra.mrb[56].mxu0 %vm493_vm3, %v441_v63 }
  0x9f   : > { %4937 = vmatprep.mubr.msk.f32.mxu0 %vm493_vm3, %v442_v0  ;;  %v6167_v0 = vld [vmem:[%s9664_s2] ss:$0 sm:$0xff] }
  0xa2   : > { %4938 = vmatmul.mubr.msk.f32.gmra.mrb[58].mxu0 %vm493_vm3, %v443_v1 }
  0xa3   : > { %4940 = vmatprep.mubr.msk.f32.mxu0 %vm493_vm3, %v444_v2 }
  0xa6   : > { %4941 = vmatmul.mubr.msk.f32.gmra.mrb[60].mxu0 %vm493_vm3, %v445_v3 }
  0xa7   : > { %4943 = vmatprep.mubr.msk.f32.mxu0 %vm493_vm3, %v446_v4 }
  0xaa   : > { %4944 = vmatmul.mubr.msk.f32.gmra.mrb[62].mxu0 %vm493_vm3, %v447_v5 }
  0xab   : > { %4946 = vmatprep.mubr.msk.f32.mxu0 %vm493_vm3, %v448_v6 }
  0xae   : > { %4947 = vmatmul.mubr.msk.f32.gmra.mrb[64].mxu0 %vm493_vm3, %v449_v7 }
  0xaf   : > { %4949 = vmatprep.mubr.msk.f32.mxu0 %vm493_vm3, %v450_v8 }
  0xb2   : > { %4950 = vmatmul.mubr.msk.f32.gmra.mrb[66].mxu0 %vm493_vm3, %v451_v9 }
  0xb3   : > { %4952 = vmatprep.mubr.msk.f32.mxu0 %vm493_vm3, %v452_v10 }
  0xb6   : > { %4953 = vmatmul.mubr.msk.f32.gmra.mrb[68].mxu0 %vm493_vm3, %v453_v11 }
  0xb7   : > { %4955 = vmatprep.mubr.msk.f32.mxu0 %vm493_vm3, %v454_v12 }
  0xba   : > { %4956 = vmatmul.mubr.msk.f32.gmra.mrb[70].mxu0 %vm493_vm3, %v455_v13 }
  0xbb   : > { %4958 = vmatprep.mubr.msk.f32.mxu0 %vm493_vm3, %v456_v14 }
  0xbe   : > { %4959 = vmatmul.mubr.msk.f32.gmra.mrb[72].mxu0 %vm493_vm3, %v457_v15 }
  0xbf   : > { %4961 = vmatprep.mubr.msk.f32.mxu0 %vm493_vm3, %v458_v16 }
  0xc2   : > { %4962 = vmatmul.mubr.msk.f32.gmra.mrb[74].mxu0 %vm493_vm3, %v459_v17 }
  0xc3   : > { %4964 = vmatprep.mubr.msk.f32.mxu0 %vm493_vm3, %v460_v18 }
  0xc6   : > { %4965 = vmatmul.mubr.msk.f32.gmra.mrb[76].mxu0 %vm493_vm3, %v461_v19 }
  0xc7   : > { %4967 = vmatprep.mubr.msk.f32.mxu0 %vm493_vm3, %v462_v20 }
  0xca   : > { %4968 = vmatmul.mubr.msk.f32.gmra.mrb[78].mxu0 %vm493_vm3, %v463_v21 }
  0xcb   : > { %4970 = vmatprep.mubr.msk.f32.mxu0 %vm493_vm3, %v464_v22 }
  0xce   : > { %4971 = vmatmul.mubr.msk.f32.gmra.mrb[80].mxu0 %vm493_vm3, %v465_v23 }
  0xcf   : > { %4973 = vmatprep.mubr.msk.f32.mxu0 %vm493_vm3, %v466_v24 }
  0xd2   : > { %4974 = vmatmul.mubr.msk.f32.gmra.mrb[82].mxu0 %vm493_vm3, %v467_v25 }
  0xd3   : > { %4976 = vmatprep.mubr.msk.f32.mxu0 %vm493_vm3, %v468_v26 }
  0xd6   : > { %4977 = vmatmul.mubr.msk.f32.gmra.mrb[84].mxu0 %vm493_vm3, %v469_v27 }
  0xd7   : > { %4979 = vmatprep.mubr.msk.f32.mxu0 %vm493_vm3, %v470_v28 }
  0xda   : > { %4980 = vmatmul.mubr.msk.f32.gmra.mrb[86].mxu0 %vm493_vm3, %v471_v29 }
  0xdb   : > { %4982 = vmatprep.mubr.msk.f32.mxu0 %vm493_vm3, %v472_v30 }
  0xde   : > { %4983 = vmatmul.mubr.msk.f32.gmra.mrb[88].mxu0 %vm493_vm3, %v473_v31 }
  0xdf   : > { %4985 = vmatprep.mubr.msk.f32.mxu0 %vm493_vm3, %v474_v32 }
  0xe2   : > { %4986 = vmatmul.mubr.msk.f32.gmra.mrb[90].mxu0 %vm493_vm3, %v475_v33 }
  0xe3   : > { %4988 = vmatprep.mubr.msk.f32.mxu0 %vm493_vm3, %v476_v34 }
  0xe6   : > { %4989 = vmatmul.mubr.msk.f32.gmra.mrb[92].mxu0 %vm493_vm3, %v477_v35 }
  0xe7   : > { %4991 = vmatprep.mubr.msk.f32.mxu0 %vm493_vm3, %v478_v36 }
  0xea   : > { %4992 = vmatmul.mubr.msk.f32.gmra.mrb[94].mxu0 %vm493_vm3, %v479_v37 }
  0xeb   : > { %4994 = vmatprep.mubr.msk.f32.mxu0 %vm493_vm3, %v480_v38 }
  0xee   : > { %4995 = vmatmul.mubr.msk.f32.gmra.mrb[96].mxu0 %vm493_vm3, %v481_v39  ;;  %vm2954_vm3 = vcmask 441344  }
 0x101   : > { %v4852_v40 = vpop.f32.mrb[0].mxu0 }
 0x102   : > { %v858_v41 = vpop.f32.mrb[1].mxu0  ;;  %v864_v14 = vadd.f32 %v4852_v40, %v6167_v0 }
 0x103   : > { %v859_v5 = vadd.f32 %v6167_v0, %v858_v41 }
 0x104   : > { %v1348_v28 = vmax.f32 %v864_v14, 0.0 }
 0x105   : > { %v4855_v42 = vpop.f32.mrb[2].mxu0  ;;  %v1347_v15 = vmax.f32 %v859_v5, 0.0 }
 0x106   : > { %v868_v43 = vpop.f32.mrb[3].mxu0  ;;  %v874_v25 = vadd.f32 %v4855_v42, %v6167_v0 }
 0x107   : > { %v869_v16 = vadd.f32 %v6167_v0, %v868_v43 }
 0x108   : > { %v1350_v41 = vmax.f32 %v874_v25, 0.0 }
 0x109   : > { %v6126_v44 = vpop.f32.mrb[4].mxu0  ;;  %v1349_v29 = vmax.f32 %v869_v16, 0.0 }
 0x10a   : > { %v878_v45 = vpop.f32.mrb[5].mxu0 }
 0x10b   : > { %v879_v30 = vadd.f32 %v6167_v0, %v878_v45  ;;  %v884_v45 = vadd.f32 %v6126_v44, %v6167_v0 }
 0x10d   : > { %v6128_v46 = vpop.f32.mrb[6].mxu0  ;;  %v1352_v16 = vmax.f32 %v884_v45, 0.0 }
 0x10e   : > { %v6130_v47 = vpop.f32.mrb[7].mxu0  ;;  %v894_v44 = vadd.f32 %v6128_v46, %v6167_v0 }
 0x111   : > { %v6132_v48 = vpop.f32.mrb[8].mxu0 }
 0x112   : > { %v6134_v49 = vpop.f32.mrb[9].mxu0 }
 0x115   : > { %v6136_v50 = vpop.f32.mrb[10].mxu0 }
 0x116   : > { %v6138_v51 = vpop.f32.mrb[11].mxu0 }
 0x119   : > { %v6140_v52 = vpop.f32.mrb[12].mxu0 }
 0x11a   : > { %v6142_v53 = vpop.f32.mrb[13].mxu0 }
 0x11d   : > { %v6144_v54 = vpop.f32.mrb[14].mxu0 }
 0x11e   : > { %v6146_v55 = vpop.f32.mrb[15].mxu0 }
 0x121   : > { %v6148_v56 = vpop.f32.mrb[16].mxu0 }
 0x122   : > { %v6150_v57 = vpop.f32.mrb[17].mxu0 }
 0x125   : > { %v6152_v58 = vpop.f32.mrb[18].mxu0 }
 0x126   : > { %v6154_v59 = vpop.f32.mrb[19].mxu0 }
 0x129   : > { %v6156_v60 = vpop.f32.mrb[20].mxu0 }
 0x12a   : > { %v6158_v61 = vpop.f32.mrb[21].mxu0 }
 0x12d   : > { %v6160_v62 = vpop.f32.mrb[22].mxu0 }
 0x12e   : > { %v6162_v63 = vpop.f32.mrb[23].mxu0 }
 0x131   : > { %v4888_v1 = vpop.f32.mrb[24].mxu0 }
 0x132   : > { %v984_v2 = vadd.f32 %v4888_v1, %v6167_v0  ;;  %v978_v3 = vpop.f32.mrb[25].mxu0  ;;  %v1351_v1 = vmax.f32 %v879_v30, 0.0 }
 0x133   : > { %v6171_v4 = vadd.f32 %v6167_v0, %v978_v3 }
 0x134   : > { %v1372_v6 = vmax.f32 %v984_v2, 0.0  ;;  %v889_v2 = vadd.f32 %v6167_v0, %v6130_v47 }
 0x135   : > { %v1371_v7 = vmax.f32 %v6171_v4, 0.0  ;;  %v4891_v8 = vpop.f32.mrb[26].mxu0 }
 0x136   : > { %v1472_v9 = vrot.slane %v1372_v6, 4  ;;  %v994_v10 = vadd.f32 %v4891_v8, %v6167_v0  ;;  %v988_v11 = vpop.f32.mrb[27].mxu0 }
 0x137   : > { %v1471_v12 = vrot.slane %v1371_v7, 4  ;;  %v989_v13 = vadd.f32 %v6167_v0, %v988_v11 }
 0x138   : > { %v1374_v17 = vmax.f32 %v994_v10, 0.0 }
 0x139   : > { %v1373_v18 = vmax.f32 %v989_v13, 0.0  ;;  %v4894_v19 = vpop.f32.mrb[28].mxu0  ;;  %v1473_v20 = vsel %vm9630_vm4, %v1471_v12, %v1472_v9 }
 0x13a   : > { %v1476_v21 = vrot.slane %v1374_v17, 4  ;;  %v1004_v22 = vadd.f32 %v4894_v19, %v6167_v0  ;;  %v998_v23 = vpop.f32.mrb[29].mxu0  ;;  %v6183_v24 = vadd.f32 %v1473_v20, %v1347_v15  ;;  %v1353_v17 = vmax.f32 %v889_v2, 0.0 }
 0x13b   : > { %v1474_v26 = vrot.slane %v1373_v18, 4  ;;  %v999_v27 = vadd.f32 %v6167_v0, %v998_v23  ;;  %v899_v18 = vadd.f32 %v6167_v0, %v6134_v49  ;;  %v904_v49 = vadd.f32 %v6132_v48, %v6167_v0 }
 0x13c   : > { %v1376_v31 = vmax.f32 %v1004_v22, 0.0  ;;  %v914_v48 = vadd.f32 %v6136_v50, %v6167_v0 }
 0x13d   : > { %v1375_v32 = vmax.f32 %v999_v27, 0.0  ;;  %v4897_v33 = vpop.f32.mrb[30].mxu0  ;;  %v1477_v34 = vsel %vm9630_vm4, %v1474_v26, %v1476_v21  ;;  %v1475_v35 = vsel %vm9630_vm4, %v1472_v9, %v1474_v26 }
 0x13e   : > { %v1480_v36 = vrot.slane %v1376_v31, 4  ;;  %v1014_v37 = vadd.f32 %v4897_v33, %v6167_v0  ;;  %v1008_v38 = vpop.f32.mrb[31].mxu0  ;;  %v6191_v39 = vadd.f32 %v1477_v34, %v1349_v29  ;;  %v6193_v40 = vadd.f32 %v1475_v35, %v1348_v28 }
 0x13f   : > { %v1478_v42 = vrot.slane %v1375_v32, 4  ;;  %v1009_v43 = vadd.f32 %v6167_v0, %v1008_v38  ;;  %v1354_v29 = vmax.f32 %v894_v44, 0.0  ;;  %v1355_v32 = vmax.f32 %v899_v18, 0.0 }
 0x140   : > { %v1378_v3 = vmax.f32 %v1014_v37, 0.0  ;;  %v909_v33 = vadd.f32 %v6167_v0, %v6138_v51 }
 0x141   : > { %v1377_v5 = vmax.f32 %v1009_v43, 0.0  ;;  %v4900_v6 = vpop.f32.mrb[32].mxu0  ;;  %v1481_v8 = vsel %vm9630_vm4, %v1478_v42, %v1480_v36  ;;  %v1479_v9 = vsel %vm9630_vm4, %v1476_v21, %v1478_v42 }
 0x142   : > { %v1484_v10 = vrot.slane %v1378_v3, 4  ;;  %v1024_v11 = vadd.f32 %v4900_v6, %v6167_v0  ;;  %v1018_v12 = vpop.f32.mrb[33].mxu0  ;;  %v6203_v13 = vadd.f32 %v1481_v8, %v1351_v1  ;;  %v6205_v14 = vadd.f32 %v1479_v9, %v1350_v41 }
 0x143   : > { %v1482_v15 = vrot.slane %v1377_v5, 4  ;;  %v1019_v47 = vadd.f32 %v6167_v0, %v1018_v12  ;;  %v1356_v3 = vmax.f32 %v904_v49, 0.0  ;;  %v1357_v5 = vmax.f32 %v909_v33, 0.0 }
 0x144   : > { %v1380_v19 = vmax.f32 %v1024_v11, 0.0  ;;  %v919_v6 = vadd.f32 %v6167_v0, %v6142_v53  ;;  %v924_v53 = vadd.f32 %v6140_v52, %v6167_v0  ;;  %v934_v52 = vadd.f32 %v6144_v54, %v6167_v0 }
 0x145   : > { %v1379_v20 = vmax.f32 %v1019_v47, 0.0  ;;  %v4903_v21 = vpop.f32.mrb[34].mxu0  ;;  %v1485_v22 = vsel %vm9630_vm4, %v1482_v15, %v1484_v10  ;;  %v1483_v23 = vsel %vm9630_vm4, %v1480_v36, %v1482_v15 }
 0x146   : > { %v1488_v25 = vrot.slane %v1380_v19, 4  ;;  %v1034_v26 = vadd.f32 %v4903_v21, %v6167_v0  ;;  %v1028_v27 = vpop.f32.mrb[35].mxu0  ;;  %v6215_v46 = vadd.f32 %v1485_v22, %v1353_v17  ;;  %v6217_v28 = vadd.f32 %v1483_v23, %v1352_v16 }
 0x147   : > { %v1486_v30 = vrot.slane %v1379_v20, 4  ;;  %v1029_v31 = vadd.f32 %v6167_v0, %v1028_v27  ;;  %v1358_v17 = vmax.f32 %v914_v48, 0.0  ;;  %v1359_v20 = vmax.f32 %v919_v6, 0.0 }
 0x148   : > { %v1382_v34 = vmax.f32 %v1034_v26, 0.0  ;;  %v929_v21 = vadd.f32 %v6167_v0, %v6146_v55 }
 0x149   : > { %v1381_v35 = vmax.f32 %v1029_v31, 0.0  ;;  %v4906_v36 = vpop.f32.mrb[36].mxu0  ;;  %v1489_v37 = vsel %vm9630_vm4, %v1486_v30, %v1488_v25  ;;  %v1487_v38 = vsel %vm9630_vm4, %v1484_v10, %v1486_v30 }
 0x14a   : > { %v1492_v41 = vrot.slane %v1382_v34, 4  ;;  %v1044_v42 = vadd.f32 %v4906_v36, %v6167_v0  ;;  %v1038_v43 = vpop.f32.mrb[37].mxu0  ;;  %v6227_v45 = vadd.f32 %v1489_v37, %v1355_v32  ;;  %v6229_v1 = vadd.f32 %v1487_v38, %v1354_v29 }
 0x14b   : > { %v1490_v2 = vrot.slane %v1381_v35, 4  ;;  %v1039_v51 = vadd.f32 %v6167_v0, %v1038_v43  ;;  %v1360_v34 = vmax.f32 %v924_v53, 0.0  ;;  %v1361_v35 = vmax.f32 %v929_v21, 0.0 }
 0x14c   : > { %v1384_v8 = vmax.f32 %v1044_v42, 0.0  ;;  %v939_v36 = vadd.f32 %v6167_v0, %v6150_v57  ;;  %v944_v57 = vadd.f32 %v6148_v56, %v6167_v0  ;;  %v954_v56 = vadd.f32 %v6152_v58, %v6167_v0 }
 0x14d   : > { %v1383_v9 = vmax.f32 %v1039_v51, 0.0  ;;  %v4909_v10 = vpop.f32.mrb[38].mxu0  ;;  %v1493_v11 = vsel %vm9630_vm4, %v1490_v2, %v1492_v41  ;;  %v1491_v12 = vsel %vm9630_vm4, %v1488_v25, %v1490_v2 }
 0x14e   : > { %v1496_v44 = vrot.slane %v1384_v8, 4  ;;  %v1054_v15 = vadd.f32 %v4909_v10, %v6167_v0  ;;  %v1048_v47 = vpop.f32.mrb[39].mxu0  ;;  %v6239_v50 = vadd.f32 %v1493_v11, %v1357_v5  ;;  %v6241_v16 = vadd.f32 %v1491_v12, %v1356_v3 }
 0x14f   : > { %v1494_v18 = vrot.slane %v1383_v9, 4  ;;  %v1049_v19 = vadd.f32 %v6167_v0, %v1048_v47  ;;  %v1362_v5 = vmax.f32 %v934_v52, 0.0  ;;  %v1363_v9 = vmax.f32 %v939_v36, 0.0 }
 0x150   : > { %v1386_v22 = vmax.f32 %v1054_v15, 0.0  ;;  %v949_v10 = vadd.f32 %v6167_v0, %v6154_v59 }
 0x151   : > { %v1385_v23 = vmax.f32 %v1049_v19, 0.0  ;;  %v4912_v25 = vpop.f32.mrb[40].mxu0  ;;  %v1497_v26 = vsel %vm9630_vm4, %v1494_v18, %v1496_v44  ;;  %v1495_v27 = vsel %vm9630_vm4, %v1492_v41, %v1494_v18 }
 0x152   : > { %v1500_v29 = vrot.slane %v1386_v22, 4  ;;  %v1064_v30 = vadd.f32 %v4912_v25, %v6167_v0  ;;  %v1058_v31 = vpop.f32.mrb[41].mxu0  ;;  %v6251_v49 = vadd.f32 %v1497_v26, %v1359_v20  ;;  %v6253_v32 = vadd.f32 %v1495_v27, %v1358_v17 }
 0x153   : > { %v1498_v33 = vrot.slane %v1385_v23, 4  ;;  %v1059_v55 = vadd.f32 %v6167_v0, %v1058_v31  ;;  %v1364_v22 = vmax.f32 %v944_v57, 0.0  ;;  %v1365_v23 = vmax.f32 %v949_v10, 0.0 }
 0x154   : > { %v1388_v37 = vmax.f32 %v1064_v30, 0.0  ;;  %v959_v25 = vadd.f32 %v6167_v0, %v6158_v61  ;;  %v964_v61 = vadd.f32 %v6156_v60, %v6167_v0 }
 0x155   : > { %v1387_v38 = vmax.f32 %v1059_v55, 0.0  ;;  %v4915_v41 = vpop.f32.mrb[42].mxu0  ;;  %v1501_v42 = vsel %vm9630_vm4, %v1498_v33, %v1500_v29  ;;  %v1499_v43 = vsel %vm9630_vm4, %v1496_v44, %v1498_v33 }
 0x156   : > { %v1504_v48 = vrot.slane %v1388_v37, 4  ;;  %v1074_v2 = vadd.f32 %v4915_v41, %v6167_v0  ;;  %v1068_v51 = vpop.f32.mrb[43].mxu0  ;;  %v6263_v54 = vadd.f32 %v1501_v42, %v1361_v35  ;;  %v6265_v3 = vadd.f32 %v1499_v43, %v1360_v34 }
 0x157   : > { %v1502_v6 = vrot.slane %v1387_v38, 4  ;;  %v1069_v8 = vadd.f32 %v6167_v0, %v1068_v51  ;;  %v1366_v35 = vmax.f32 %v954_v56, 0.0  ;;  %v1367_v38 = vmax.f32 %v959_v25, 0.0 }
 0x158   : > { %v1390_v11 = vmax.f32 %v1074_v2, 0.0  ;;  %v969_v41 = vadd.f32 %v6167_v0, %v6162_v63  ;;  %v974_v63 = vadd.f32 %v6160_v62, %v6167_v0 }
 0x159   : > { %v1389_v12 = vmax.f32 %v1069_v8, 0.0  ;;  %v4918_v44 = vpop.f32.mrb[44].mxu0  ;;  %v1505_v15 = vsel %vm9630_vm4, %v1502_v6, %v1504_v48  ;;  %v1503_v47 = vsel %vm9630_vm4, %v1500_v29, %v1502_v6 }
 0x15a   : > { %v1508_v17 = vrot.slane %v1390_v11, 4  ;;  %v1084_v18 = vadd.f32 %v4918_v44, %v6167_v0  ;;  %v1078_v19 = vpop.f32.mrb[45].mxu0  ;;  %v6275_v53 = vadd.f32 %v1505_v15, %v1363_v9  ;;  %v6277_v20 = vadd.f32 %v1503_v47, %v1362_v5 }
 0x15b   : > { %v1506_v21 = vrot.slane %v1389_v12, 4  ;;  %v1079_v59 = vadd.f32 %v6167_v0, %v1078_v19  ;;  %v1368_v11 = vmax.f32 %v964_v61, 0.0  ;;  %v1369_v12 = vmax.f32 %v969_v41, 0.0 }
 0x15c   : > { %v1392_v26 = vmax.f32 %v1084_v18, 0.0  ;;  %v1370_v25 = vmax.f32 %v974_v63, 0.0 }
 0x15d   : > { %v1391_v27 = vmax.f32 %v1079_v59, 0.0  ;;  %v4921_v29 = vpop.f32.mrb[46].mxu0  ;;  %v1509_v30 = vsel %vm9630_vm4, %v1506_v21, %v1508_v17  ;;  %v1507_v31 = vsel %vm9630_vm4, %v1504_v48, %v1506_v21 }
 0x15e   : > { %v1512_v52 = vrot.slane %v1392_v26, 4  ;;  %v1094_v33 = vadd.f32 %v4921_v29, %v6167_v0  ;;  %v1088_v55 = vpop.f32.mrb[47].mxu0  ;;  %v6287_v58 = vadd.f32 %v1509_v30, %v1365_v23  ;;  %v6289_v34 = vadd.f32 %v1507_v31, %v1364_v22 }
 0x15f   : > { %v1510_v36 = vrot.slane %v1391_v27, 4  ;;  %v1089_v37 = vadd.f32 %v6167_v0, %v1088_v55 }
 0x160   : > { %v1394_v42 = vmax.f32 %v1094_v33, 0.0 }
 0x161   : > { %v1393_v43 = vmax.f32 %v1089_v37, 0.0  ;;  %v4924_v48 = vpop.f32.mrb[48].mxu0  ;;  %v1513_v2 = vsel %vm9630_vm4, %v1510_v36, %v1512_v52  ;;  %v1511_v51 = vsel %vm9630_vm4, %v1508_v17, %v1510_v36 }
 0x162   : > { %v1516_v5 = vrot.slane %v1394_v42, 4  ;;  %v1104_v6 = vadd.f32 %v4924_v48, %v6167_v0  ;;  %v1098_v8 = vpop.f32.mrb[49].mxu0  ;;  %v6299_v57 = vadd.f32 %v1513_v2, %v1367_v38  ;;  %v6301_v9 = vadd.f32 %v1511_v51, %v1366_v35 }
 0x163   : > { %v1514_v60 = vrot.slane %v1393_v43, 4  ;;  %v1099_v10 = vadd.f32 %v6167_v0, %v1098_v8 }
 0x164   : > { %v1396_v44 = vmax.f32 %v1104_v6, 0.0 }
 0x165   : > { %v1395_v15 = vmax.f32 %v1099_v10, 0.0  ;;  %v4927_v47 = vpop.f32.mrb[50].mxu0  ;;  %v1517_v17 = vsel %vm9630_vm4, %v1514_v60, %v1516_v5  ;;  %v1515_v18 = vsel %vm9630_vm4, %v1512_v52, %v1514_v60 }
 0x166   : > { %v6309_v19 = vadd.f32 %v6183_v24, %v1396_v44  ;;  %v1114_v56 = vadd.f32 %v4927_v47, %v6167_v0  ;;  %v1108_v21 = vpop.f32.mrb[51].mxu0  ;;  %v6312_v59 = vadd.f32 %v1517_v17, %v1369_v12  ;;  %v6314_v22 = vadd.f32 %v1515_v18, %v1368_v11 }
 0x167   : > { %v1518_v23 = vrot.slane %v1395_v15, 4  ;;  %v1109_v62 = vadd.f32 %v6167_v0, %v1108_v21 }
 0x168   : > { %v1398_v26 = vmax.f32 %v1114_v56, 0.0 }
 0x169   : > { %v6319_v27 = vadd.f32 %v1518_v23, %v1371_v7  ;;  %v1397_v29 = vmax.f32 %v1109_v62, 0.0  ;;  %v4930_v30 = vpop.f32.mrb[52].mxu0  ;;  %v1519_v24 = vsel %vm9630_vm4, %v1516_v5, %v1518_v23 }
 0x16a   : > { %v6323_v31 = vadd.f32 %v6191_v39, %v1398_v26  ;;  %v1124_v52 = vadd.f32 %v4930_v30, %v6167_v0  ;;  %v1118_v33 = vpop.f32.mrb[53].mxu0  ;;  %v6326_v55 = vadd.f32 %v1519_v24, %v1370_v25 }
 0x16b   : > { %v6329_v35 = vadd.f32 %v6193_v40, %v1397_v29  ;;  %v1119_v36 = vadd.f32 %v6167_v0, %v1118_v33 }
 0x16c   : > { %v1400_v4 = vmax.f32 %v1124_v52, 0.0 }
 0x16d   : > { %v1399_v7 = vmax.f32 %v1119_v36, 0.0  ;;  %v4933_v37 = vpop.f32.mrb[54].mxu0 }
 0x16e   : > { %v6333_v61 = vadd.f32 %v6203_v13, %v1400_v4  ;;  %v1134_v38 = vadd.f32 %v4933_v37, %v6167_v0  ;;  %v1128_v39 = vpop.f32.mrb[55].mxu0 }
 0x16f   : > { %v6337_v41 = vadd.f32 %v6205_v14, %v1399_v7  ;;  %v1129_v42 = vadd.f32 %v6167_v0, %v1128_v39 }
 0x170   : > { %v1402_v43 = vmax.f32 %v1134_v38, 0.0 }
 0x171   : > { %v1401_v48 = vmax.f32 %v1129_v42, 0.0  ;;  %v4936_v40 = vpop.f32.mrb[56].mxu0 }
 0x172   : > { %v6341_v2 = vadd.f32 %v6215_v46, %v1402_v43  ;;  %v1144_v51 = vadd.f32 %v4936_v40, %v6167_v0  ;;  %v1138_v5 = vpop.f32.mrb[57].mxu0 }
 0x173   : > { %v6345_v13 = vadd.f32 %v6217_v28, %v1401_v48  ;;  %v1139_v6 = vadd.f32 %v6167_v0, %v1138_v5 }
 0x174   : > { %v1404_v8 = vmax.f32 %v1144_v51, 0.0 }
 0x175   : > { %v1403_v60 = vmax.f32 %v1139_v6, 0.0  ;;  %v4939_v14 = vpop.f32.mrb[58].mxu0 }
 0x176   : > { %v6349_v10 = vadd.f32 %v6227_v45, %v1404_v8  ;;  %v1154_v11 = vadd.f32 %v4939_v14, %v6167_v0  ;;  %v1148_v63 = vpop.f32.mrb[59].mxu0 }
 0x177   : > { %v6353_v46 = vadd.f32 %v6229_v1, %v1403_v60  ;;  %v1149_v12 = vadd.f32 %v6167_v0, %v1148_v63 }
 0x178   : > { %v1406_v44 = vmax.f32 %v1154_v11, 0.0 }
 0x179   : > { %v1405_v15 = vmax.f32 %v1149_v12, 0.0  ;;  %v4942_v28 = vpop.f32.mrb[60].mxu0 }
 0x17a   : > { %v6357_v47 = vadd.f32 %v6239_v50, %v1406_v44  ;;  %v1164_v17 = vadd.f32 %v4942_v28, %v6167_v0  ;;  %v1158_v18 = vpop.f32.mrb[61].mxu0 }
 0x17b   : > { %v6361_v45 = vadd.f32 %v6241_v16, %v1405_v15  ;;  %v1159_v56 = vadd.f32 %v6167_v0, %v1158_v18 }
 0x17c   : > { %v1408_v21 = vmax.f32 %v1164_v17, 0.0 }
 0x17d   : > { %v1407_v23 = vmax.f32 %v1159_v56, 0.0  ;;  %v4945_v1 = vpop.f32.mrb[62].mxu0 }
 0x17e   : > { %v6365_v62 = vadd.f32 %v6251_v49, %v1408_v21  ;;  %v1174_v25 = vadd.f32 %v4945_v1, %v6167_v0  ;;  %v1168_v26 = vpop.f32.mrb[63].mxu0 }
 0x17f   : > { %v6369_v50 = vadd.f32 %v6253_v32, %v1407_v23  ;;  %v1169_v29 = vadd.f32 %v6167_v0, %v1168_v26 }
 0x180   : > { %v1410_v30 = vmax.f32 %v1174_v25, 0.0 }
 0x181   : > { %v1409_v24 = vmax.f32 %v1169_v29, 0.0  ;;  %v4948_v16 = vpop.f32.mrb[64].mxu0 }
 0x182   : > { %v6373_v52 = vadd.f32 %v6263_v54, %v1410_v30  ;;  %v1184_v33 = vadd.f32 %v4948_v16, %v6167_v0  ;;  %v1178_v36 = vpop.f32.mrb[65].mxu0 }
 0x183   : > { %v6377_v49 = vadd.f32 %v6265_v3, %v1409_v24  ;;  %v1179_v4 = vadd.f32 %v6167_v0, %v1178_v36 }
 0x184   : > { %v1412_v7 = vmax.f32 %v1184_v33, 0.0 }
 0x185   : > { %v1411_v37 = vmax.f32 %v1179_v4, 0.0  ;;  %v4951_v32 = vpop.f32.mrb[66].mxu0 }
 0x186   : > { %v6381_v38 = vadd.f32 %v6275_v53, %v1412_v7  ;;  %v1194_v39 = vadd.f32 %v4951_v32, %v6167_v0  ;;  %v1188_v42 = vpop.f32.mrb[67].mxu0 }
 0x187   : > { %v6385_v54 = vadd.f32 %v6277_v20, %v1411_v37  ;;  %v1189_v43 = vadd.f32 %v6167_v0, %v1188_v42 }
 0x188   : > { %v1414_v48 = vmax.f32 %v1194_v39, 0.0 }
 0x189   : > { %v1413_v40 = vmax.f32 %v1189_v43, 0.0  ;;  %v4954_v3 = vpop.f32.mrb[68].mxu0 }
 0x18a   : > { %v6389_v51 = vadd.f32 %v6287_v58, %v1414_v48  ;;  %v1204_v5 = vadd.f32 %v4954_v3, %v6167_v0  ;;  %v1198_v6 = vpop.f32.mrb[69].mxu0 }
 0x18b   : > { %v6393_v53 = vadd.f32 %v6289_v34, %v1413_v40  ;;  %v1199_v8 = vadd.f32 %v6167_v0, %v1198_v6 }
 0x18c   : > { %v1416_v60 = vmax.f32 %v1204_v5, 0.0 }
 0x18d   : > { %v1415_v14 = vmax.f32 %v1199_v8, 0.0  ;;  %v4957_v20 = vpop.f32.mrb[70].mxu0 }
 0x18e   : > { %v6397_v11 = vadd.f32 %v6299_v57, %v1416_v60  ;;  %v1214_v63 = vadd.f32 %v4957_v20, %v6167_v0  ;;  %v1208_v12 = vpop.f32.mrb[71].mxu0 }
 0x18f   : > { %v6401_v58 = vadd.f32 %v6301_v9, %v1415_v14  ;;  %v1209_v44 = vadd.f32 %v6167_v0, %v1208_v12 }
 0x190   : > { %v1418_v15 = vmax.f32 %v1214_v63, 0.0 }
 0x191   : > { %v1417_v28 = vmax.f32 %v1209_v44, 0.0  ;;  %v4960_v34 = vpop.f32.mrb[72].mxu0 }
 0x192   : > { %v6405_v17 = vadd.f32 %v6312_v59, %v1418_v15  ;;  %v1224_v18 = vadd.f32 %v4960_v34, %v6167_v0  ;;  %v1218_v56 = vpop.f32.mrb[73].mxu0 }
 0x193   : > { %v6409_v57 = vadd.f32 %v6314_v22, %v1417_v28  ;;  %v1219_v21 = vadd.f32 %v6167_v0, %v1218_v56 }
 0x194   : > { %v1420_v23 = vmax.f32 %v1224_v18, 0.0 }
 0x195   : > { %v1419_v1 = vmax.f32 %v1219_v21, 0.0  ;;  %v4963_v9 = vpop.f32.mrb[74].mxu0 }
 0x196   : > { %v6413_v25 = vadd.f32 %v6319_v27, %v1420_v23  ;;  %v1234_v26 = vadd.f32 %v4963_v9, %v6167_v0  ;;  %v1228_v29 = vpop.f32.mrb[75].mxu0  ;;  %v1620_v7 = vrot.slane %v1420_v23, 4 }
 0x197   : > { %v6417_v59 = vadd.f32 %v6326_v55, %v1419_v1  ;;  %v1229_v30 = vadd.f32 %v6167_v0, %v1228_v29 }
 0x198   : > { %v1422_v24 = vmax.f32 %v1234_v26, 0.0 }
 0x199   : > { %v1421_v16 = vmax.f32 %v1229_v30, 0.0  ;;  %v4966_v22 = vpop.f32.mrb[76].mxu0 }
 0x19a   : > { %v1623_v33 = vrot.slane %v1422_v24, 4  ;;  %v1244_v36 = vadd.f32 %v4966_v22, %v6167_v0  ;;  %v1238_v4 = vpop.f32.mrb[77].mxu0 }
 0x19b   : > { %v1621_v37 = vrot.slane %v1421_v16, 4  ;;  %v1239_v27 = vadd.f32 %v6167_v0, %v1238_v4 }
 0x19c   : > { %v1424_v32 = vmax.f32 %v1244_v36, 0.0 }
 0x19d   : > { %v1622_v39 = vsel %vm9630_vm4, %v1620_v7, %v1621_v37  ;;  %v1624_v42 = vsel %vm9630_vm4, %v1621_v37, %v1623_v33  ;;  %v1423_v55 = vmax.f32 %v1239_v27, 0.0  ;;  %v4969_v43 = vpop.f32.mrb[78].mxu0 }
 0x19e   : > { %v1694_v48 = vadd.f32 %v1622_v39, %v6309_v19  ;;  %v1695_v40 = vadd.f32 %v1624_v42, %v6329_v35  ;;  %v1627_v3 = vrot.slane %v1424_v32, 4  ;;  %v1254_v5 = vadd.f32 %v4969_v43, %v6167_v0  ;;  %v1248_v6 = vpop.f32.mrb[79].mxu0 }
 0x19f   : > { %v1625_v8 = vrot.slane %v1423_v55, 4  ;;  %v1249_v60 = vadd.f32 %v6167_v0, %v1248_v6 }
 0x1a0   : > { %v6428_v14 = vmul.f32 0.25, %v1694_v48  ;;  %v6430_v20 = vmul.f32 0.25, %v1695_v40  ;;  %v1426_v63 = vmax.f32 %v1254_v5, 0.0 }
 0x1a1   : > { %v1626_v12 = vsel %vm9630_vm4, %v1623_v33, %v1625_v8  ;;  %v1628_v44 = vsel %vm9630_vm4, %v1625_v8, %v1627_v3  ;;  %v1425_v15 = vmax.f32 %v1249_v60, 0.0  ;;  %v4972_v19 = vpop.f32.mrb[80].mxu0 }
 0x1a2   : > { %9665 = vst [vmem:[#allocation11_spill] sm:$0xff] %v6428_v14  ;;  %9666 = vst [vmem:[#allocation12_spill] sm:$0xff] %v6430_v20  ;;  %v1696_v35 = vadd.f32 %v1626_v12, %v6323_v31  ;;  %v1697_v28 = vadd.f32 %v1628_v44, %v6337_v41  ;;  %v1631_v34 = vrot.slane %v1426_v63, 4  ;;  %v1264_v18 = vadd.f32 %v4972_v19, %v6167_v0  ;;  %v1258_v56 = vpop.f32.mrb[81].mxu0 }
 0x1a3   : > { %v1629_v21 = vrot.slane %v1425_v15, 4  ;;  %v1259_v23 = vadd.f32 %v6167_v0, %v1258_v56  ;;  %v2023_v1 = vrot.slane %v6428_v14, 4  ;;  %v2024_v30 = vrot.slane %v6430_v20, 4 }
 0x1a4   : > { %v6439_v9 = vmul.f32 0.25, %v1696_v35  ;;  %v6441_v26 = vmul.f32 0.25, %v1697_v28  ;;  %v1428_v29 = vmax.f32 %v1264_v18, 0.0  ;;  %v1763_v43 = vrot.slane %v6428_v14, 1 }
 0x1a5   : > { %v1630_v31 = vsel %vm9630_vm4, %v1627_v3, %v1629_v21  ;;  %v1632_v41 = vsel %vm9630_vm4, %v1629_v21, %v1631_v34  ;;  %v1427_v24 = vmax.f32 %v1259_v23, 0.0  ;;  %v4975_v16 = vpop.f32.mrb[82].mxu0  ;;  %v2025_v55 = vsel %vm9630_vm4, %v2023_v1, %v2024_v30 }
 0x1a6   : > { %9667 = vst [vmem:[#allocation13_spill] sm:$0xff] %v6439_v9  ;;  %9668 = vst [vmem:[#allocation14_spill] sm:$0xff] %v6441_v26  ;;  %v1698_v22 = vadd.f32 %v1630_v31, %v6333_v61  ;;  %v1699_v33 = vadd.f32 %v1632_v41, %v6345_v13  ;;  %v1635_v36 = vrot.slane %v1428_v29, 4  ;;  %v1274_v4 = vadd.f32 %v4975_v16, %v6167_v0  ;;  %v1268_v7 = vpop.f32.mrb[83].mxu0 }
 0x1a7   : > { %v1633_v37 = vrot.slane %v1427_v24, 4  ;;  %v1269_v27 = vadd.f32 %v6167_v0, %v1268_v7  ;;  %v5276_v32 = vpack.i.bf16 %v6441_v26, %v6439_v9  ;;  %v2026_v39 = vrot.slane %v6439_v9, 4 }
 0x1a8   : > { %v1430_v42 = vmax.f32 %v1274_v4, 0.0  ;;  %v1764_v61 = vrot.slane %v6430_v20, 1  ;;  %v6470_v35 = vmul.f32 0.25, %v1698_v22  ;;  %v2198_v4 = vrot.slane %v6439_v9, 7 }
 0x1a9   : > { %v1634_v13 = vsel %vm9630_vm4, %v1631_v34, %v1633_v37  ;;  %v1636_v48 = vsel %vm9630_vm4, %v1633_v37, %v1635_v36  ;;  %v1429_v40 = vmax.f32 %v1269_v27, 0.0  ;;  %5277 = vrot.lane.b32.xlu0 %v5276_v32, %s9432_s15  ;;  %v4978_v3 = vpop.f32.mrb[84].mxu0  ;;  %v2027_v5 = vsel %vm9630_vm4, %v2024_v30, %v2026_v39 }
 0x1aa   : > { %v6463_v6 = vadd.f32 %v1634_v13, %v6341_v2  ;;  %v6466_v8 = vadd.f32 %v1636_v48, %v6353_v46  ;;  %v1639_v60 = vrot.slane %v1430_v42, 4  ;;  %v1284_v63 = vadd.f32 %v4978_v3, %v6167_v0  ;;  %v1278_v12 = vpop.f32.mrb[85].mxu0  ;;  %9669 = vst [vmem:[#allocation15_spill] sm:$0xff] %v6470_v35 }
 0x1ab   : > { %v1637_v44 = vrot.slane %v1429_v40, 4  ;;  %v1279_v15 = vadd.f32 %v6167_v0, %v1278_v12  ;;  %v5296_v19 = vpack.i.bf16 %v2027_v5, %v2025_v55  ;;  %v1766_v34 = vrot.slane %v6439_v9, 1 }
 0x1ac   : > { %v1432_v28 = vmax.f32 %v1284_v63, 0.0  ;;  %v1765_v56 = vsel %vm9644_vm5, %v1763_v43, %v1764_v61  ;;  %v1850_v5 = vrot.slane %v6428_v14, 2 }
 0x1ad   : > { %v1638_v2 = vsel %vm9630_vm4, %v1635_v36, %v1637_v44  ;;  %v1640_v18 = vsel %vm9630_vm4, %v1637_v44, %v1639_v60  ;;  %v1431_v46 = vmax.f32 %v1279_v15, 0.0  ;;  %5297 = vrot.lane.b32.xlu1 %v5296_v19, %s9434_s16  ;;  %v4981_v21 = vpop.f32.mrb[86].mxu0  ;;  %v1767_v30 = vsel %vm9644_vm5, %v1764_v61, %v1766_v34 }
 0x1ae   : > { %v6478_v23 = vadd.f32 %v1638_v2, %v6349_v10  ;;  %v6481_v1 = vadd.f32 %v1640_v18, %v6361_v45  ;;  %v1643_v29 = vrot.slane %v1432_v28, 4  ;;  %v1288_v31 = vpop.f32.mrb[87].mxu0  ;;  %v5281_v24 = vpack.i.bf16 %v1767_v30, %v1765_v56 }
 0x1af   : > { %v1641_v41 = vrot.slane %v1431_v46, 4  ;;  %v1294_v16 = vadd.f32 %v4981_v21, %v6167_v0  ;;  %v1289_v22 = vadd.f32 %v6167_v0, %v1288_v31  ;;  %v6488_v36 = vmul.f32 0.25, %v1699_v33 }
 0x1b0   : > { %v2197_v10 = vrot.slane %v6430_v20, 7  ;;  %v2200_v45 = vrot.slane %v6441_v26, 7  ;;  %5282 = vrot.lane.b32.xlu0 %v5281_v24, %s9424_s22  ;;  %v1938_v31 = vrot.slane %v6430_v20, 3  ;;  %v1940_v24 = vrot.slane %v6439_v9, 3 }
 0x1b1   : > { %v1642_v7 = vsel %vm9630_vm4, %v1639_v60, %v1641_v41  ;;  %v1644_v37 = vsel %vm9630_vm4, %v1641_v41, %v1643_v29  ;;  %v1434_v27 = vmax.f32 %v1294_v16, 0.0  ;;  %v1433_v32 = vmax.f32 %v1289_v22, 0.0  ;;  %v4984_v42 = vpop.f32.mrb[88].mxu0 }
 0x1b2   : > { %v6497_v55 = vadd.f32 %v1642_v7, %v6357_v47  ;;  %v6500_v33 = vadd.f32 %v1644_v37, %v6369_v50  ;;  %v2199_v43 = vsel %vm9632_vm0, %v2197_v10, %v2198_v4  ;;  %v2201_v61 = vsel %vm9632_vm0, %v2198_v4, %v2200_v45  ;;  %v1298_v13 = vpop.f32.mrb[89].mxu0 }
 0x1b3   : > { %v1647_v48 = vrot.slane %v1434_v27, 4  ;;  %v1645_v40 = vrot.slane %v1433_v32, 4  ;;  %v5306_v3 = vpack.i.bf16 %v2201_v61, %v2199_v43  ;;  %v1851_v60 = vrot.slane %v6430_v20, 2 }
 0x1b4   : > { %v1853_v47 = vrot.slane %v6439_v9, 2  ;;  %v1304_v12 = vadd.f32 %v4984_v42, %v6167_v0  ;;  %v1299_v44 = vadd.f32 %v6167_v0, %v1298_v13  ;;  %v6526_v30 = vpack.i.bf16 %v6488_v36, %v6470_v35 }
 0x1b5   : > { %v1646_v50 = vsel %vm9630_vm4, %v1643_v29, %v1645_v40  ;;  %v1648_v63 = vsel %vm9630_vm4, %v1645_v40, %v1647_v48  ;;  %5307 = vrot.lane.b32.xlu1 %v5306_v3, %s9436_s24  ;;  %v4987_v15 = vpop.f32.mrb[90].mxu0  ;;  %v1852_v2 = vsel %vm9629_vm6, %v1850_v5, %v1851_v60  ;;  %v1768_v7 = vrot.slane %v6441_v26, 1 }
 0x1b6   : > { %v6515_v19 = vadd.f32 %v1646_v50, %v6365_v62  ;;  %v6518_v28 = vadd.f32 %v1648_v63, %v6377_v49  ;;  %v1854_v18 = vsel %vm9629_vm6, %v1851_v60, %v1853_v47  ;;  %v1308_v46 = vpop.f32.mrb[91].mxu0  ;;  %v1436_v21 = vmax.f32 %v1304_v12, 0.0 }
 0x1b7   : > { %v5286_v56 = vpack.i.bf16 %v1854_v18, %v1852_v2  ;;  %v1435_v29 = vmax.f32 %v1299_v44, 0.0  ;;  %v1937_v62 = vrot.slane %v6428_v14, 3  ;;  %v1314_v16 = vadd.f32 %v4987_v15, %v6167_v0 }
 0x1b8   : > { %v1651_v49 = vrot.slane %v1436_v21, 4  ;;  %v1309_v4 = vadd.f32 %v6167_v0, %v1308_v46  ;;  %v1770_v37 = vrot.slane %v6470_v35, 1  ;;  %v1941_v43 = vsel %vm9647_vm7, %v1938_v31, %v1940_v24 }
 0x1b9   : > { %5287 = vrot.lane.b32.xlu0 %v5286_v56, %s9422_s25  ;;  %v1649_v41 = vrot.slane %v1435_v29, 4  ;;  %5312 = vrot.lane.b32.xlu1 %v6526_v30, %s9416_s29  ;;  %v4990_v22 = vpop.f32.mrb[92].mxu0  ;;  %v1939_v10 = vsel %vm9647_vm7, %v1937_v62, %v1938_v31  ;;  %v1438_v61 = vmax.f32 %v1314_v16, 0.0  ;;  %v2112_v15 = vrot.slane %v6439_v9, 6  ;;  %s9428_s29 = smov 60  }
 0x1ba   : > { %v1318_v27 = vpop.f32.mrb[93].mxu0  ;;  %v5291_v3 = vpack.i.bf16 %v1941_v43, %v1939_v10  ;;  %v1437_v5 = vmax.f32 %v1309_v4, 0.0  ;;  %v1771_v50 = vsel %vm9644_vm5, %v1768_v7, %v1770_v37  ;;  %v2114_v2 = vrot.slane %v6441_v26, 6 }
 0x1bb   : > { %v1650_v32 = vsel %vm9630_vm4, %v1647_v48, %v1649_v41  ;;  %v1652_v42 = vsel %vm9630_vm4, %v1649_v41, %v1651_v49  ;;  %v1655_v60 = vrot.slane %v1438_v61, 4  ;;  %v1769_v48 = vsel %vm9644_vm5, %v1766_v34, %v1768_v7 }
 0x1bc   : > { %v6545_v13 = vadd.f32 %v1650_v32, %v6373_v52  ;;  %v6548_v40 = vadd.f32 %v1652_v42, %v6385_v54  ;;  %v1653_v52 = vrot.slane %v1437_v5, 4  ;;  %v6557_v12 = vpack.i.bf16 %v1771_v50, %v1769_v48 }
 0x1bd   : > { %v4993_v63 = vpop.f32.mrb[94].mxu0  ;;  %5292 = vrot.lane.b32.xlu0 %v5291_v3, %s9438_s30  ;;  %v2111_v54 = vrot.slane %v6430_v20, 6  ;;  %v1324_v34 = vadd.f32 %v4990_v22, %v6167_v0  ;;  %v1319_v18 = vadd.f32 %v6167_v0, %v1318_v27  ;;  %v1855_v21 = vrot.slane %v6441_v26, 2 }
 0x1be   : > { %v1328_v44 = vpop.f32.mrb[95].mxu0  ;;  %v1654_v46 = vsel %vm9630_vm4, %v1651_v49, %v1653_v52  ;;  %v1656_v56 = vsel %vm9630_vm4, %v1653_v52, %v1655_v60  ;;  %5322 = vrot.lane.b32.xlu1 %v6557_v12, %s9414_s12  ;;  %v1857_v29 = vrot.slane %v6470_v35, 2  ;;  %v2115_v49 = vsel %vm9637_vm8, %v2112_v15, %v2114_v2  ;;  %s9418_s12 = smov 66  }
 0x1bf   : > { %v6571_v62 = vadd.f32 %v1654_v46, %v6381_v38  ;;  %v6574_v31 = vadd.f32 %v1656_v56, %v6393_v53  ;;  %v2113_v41 = vsel %vm9637_vm8, %v2111_v54, %v2112_v15  ;;  %v1440_v10 = vmax.f32 %v1324_v34, 0.0 }
 0x1c0   : > { %v5301_v22 = vpack.i.bf16 %v2115_v49, %v2113_v41  ;;  %v1439_v4 = vmax.f32 %v1319_v18, 0.0  ;;  %v1856_v27 = vsel %vm9629_vm6, %v1853_v47, %v1855_v21  ;;  %v1858_v38 = vsel %vm9629_vm6, %v1855_v21, %v1857_v29 }
 0x1c1   : > { %v4996_v16 = vpop.f32.mrb[96].mxu0  ;;  %v1659_v53 = vrot.slane %v1440_v10, 4  ;;  %v5331_v42 = vpack.i.bf16 %v1858_v38, %v1856_v27  ;;  %v1334_v43 = vadd.f32 %v4993_v63, %v6167_v0  ;;  %v1329_v61 = vadd.f32 %v6167_v0, %v1328_v44 }
 0x1c2   : > { %v1338_v7 = vpop.f32.mrb[97].mxu0  ;;  %5302 = vrot.lane.b32.xlu0 %v5301_v22, %s9440_s13  ;;  %v1657_v32 = vrot.slane %v1439_v4, 4  ;;  %v2028_v3 = vrot.slane %v6441_v26, 4  ;;  %v2030_v5 = vrot.slane %v6470_v35, 4  ;;  %v2032_v47 = vrot.slane %v6488_v36, 4 }
 0x1c3   : > { %5332 = vrot.lane.b32.xlu1 %v5331_v42, %s9412_s14  ;;  %v1442_v52 = vmax.f32 %v1334_v43, 0.0  ;;  %v1441_v0 = vmax.f32 %v1329_v61, 0.0  ;;  %v2504_v22 = vrot.slane %v6441_v26, 5  ;;  %v2118_v43 = vrot.slane %v6488_v36, 6  ;;  %s9430_s14 = smov 72  }
 0x1c4   : > { %v1658_v48 = vsel %vm9630_vm4, %v1655_v60, %v1657_v32  ;;  %v1660_v50 = vsel %vm9630_vm4, %v1657_v32, %v1659_v53  ;;  %v2031_v44 = vsel %vm9630_vm4, %v2028_v3, %v2030_v5  ;;  %v6609_v15 = vsel %vm9630_vm4, %v2030_v5, %v2032_v47 }
 0x1c5   : > { %v6596_v54 = vadd.f32 %v1658_v48, %v6389_v51  ;;  %v6599_v63 = vadd.f32 %v1660_v50, %v6401_v58  ;;  %v1663_v60 = vrot.slane %v1442_v52, 4  ;;  %v5711_v51 = vld [vmem:[%s9664_s2] ss:$0 sm:$0xff]  ;;  %v1661_v18 = vrot.slane %v1441_v0, 4  ;;  %s9700_s2 = smov 60  }
 0x1c6   : > { %5317 = vrot.lane.b32.xlu0 %v6526_v30, %s9432_s15  ;;  %v1344_v58 = vadd.f32 %v5711_v51, %v4996_v16  ;;  %v1339_v34 = vadd.f32 %v5711_v51, %v1338_v7  ;;  %v5341_v46 = vpack.i.bf16 %v6609_v15, %v2031_v44  ;;  %v2505_v30 = vrot.slane %v6470_v35, 5 }
 0x1c7   : > { %v1662_v41 = vsel %vm9630_vm4, %v1659_v53, %v1661_v18  ;;  %v1664_v49 = vsel %vm9630_vm4, %v1661_v18, %v1663_v60  ;;  %v2507_v16 = vrot.slane %v6488_v36, 5  ;;  %v2116_v32 = vrot.slane %v6470_v35, 6 }
 0x1c8   : > { %v1444_v56 = vmax.f32 %v1344_v58, 0.0  ;;  %v1443_v21 = vmax.f32 %v1339_v34, 0.0  ;;  %5342 = vrot.lane.b32.xlu1 %v5341_v46, %s9428_s29  ;;  %v6622_v10 = vadd.f32 %v1662_v41, %v6397_v11  ;;  %v6625_v4 = vadd.f32 %v1664_v49, %v6409_v57 }
 0x1c9   : > { %v2506_v38 = vsel %vm9631_vm9, %v2504_v22, %v2505_v30  ;;  %v2508_v53 = vsel %vm9631_vm9, %v2505_v30, %v2507_v16  ;;  %v2117_v50 = vsel %vm9637_vm8, %v2114_v2, %v2116_v32  ;;  %v1942_v52 = vrot.slane %v6441_v26, 3 }
 0x1ca   : > { %5327 = vrot.lane.b32.xlu0 %v6557_v12, %s9424_s22  ;;  %v1667_v7 = vrot.slane %v1444_v56, 4  ;;  %v1665_v27 = vrot.slane %v1443_v21, 4  ;;  %v5351_v5 = vpack.i.bf16 %v2508_v53, %v2506_v38  ;;  %v2204_v0 = vrot.slane %v6488_v36, 7 }
 0x1cb   : > { %v1943_v2 = vsel %vm9647_vm7, %v1940_v24, %v1942_v52  ;;  %v2029_v24 = vsel %vm9630_vm4, %v2026_v39, %v2028_v3  ;;  %v1772_v56 = vrot.slane %v6488_v36, 1  ;;  %v1946_v21 = vrot.slane %v6488_v36, 3 }
 0x1cc   : > { %v6636_v11 = vadd.f32 %v1667_v7, %v6413_v25  ;;  %v1666_v57 = vsel %vm9630_vm4, %v1663_v60, %v1665_v27  ;;  %v1668_v61 = vsel %vm9630_vm4, %v1665_v27, %v1667_v7  ;;  %v2119_v25 = vsel %vm9637_vm8, %v2116_v32, %v2118_v43  ;;  %5352 = vrot.lane.b32.xlu1 %v5351_v5, %s9418_s12  ;;  %s9420_s12 = smov 78  }
 0x1cd   : > { %v6641_v12 = vadd.f32 %v1666_v57, %v6405_v17  ;;  %v6644_v48 = vadd.f32 %v1668_v61, %v6417_v59  ;;  %v1944_v17 = vrot.slane %v6470_v35, 3  ;;  %v2202_v59 = vrot.slane %v6470_v35, 7 }
 0x1ce   : > { %5337 = vrot.lane.b32.xlu0 %v5331_v42, %s9422_s25  ;;  %v5361_v42 = vpack.i.bf16 %v2119_v25, %v2117_v50  ;;  %v5356_v46 = vpack.i.bf16 %v2031_v44, %v2029_v24  ;;  %v1859_v3 = vrot.slane %v6488_v36, 2  ;;  %v6689_v44 = vmul.f32 0.25, %v6466_v8 }
 0x1cf   : > { %v1945_v60 = vsel %vm9647_vm7, %v1942_v52, %v1944_v17  ;;  %v2203_v58 = vsel %vm9632_vm0, %v2200_v45, %v2202_v59  ;;  %v2205_v34 = vsel %vm9632_vm0, %v2202_v59, %v2204_v0  ;;  %v1773_v45 = vsel %vm9644_vm5, %v1770_v37, %v1772_v56 }
 0x1d0   : > { %v5346_v51 = vpack.i.bf16 %v1945_v60, %v1943_v2  ;;  %5362 = vrot.lane.b32.xlu1 %v5361_v42, %s9430_s14  ;;  %v5371_v18 = vpack.i.bf16 %v2205_v34, %v2203_v58  ;;  %v1947_v39 = vsel %vm9647_vm7, %v1944_v17, %v1946_v21  ;;  %v6692_v30 = vmul.f32 0.25, %v6463_v6 }
 0x1d1   : > { %v1860_v37 = vsel %vm9629_vm6, %v1857_v29, %v1859_v3  ;;  %v6706_v6 = vrot.slane %v6689_v44, 7  ;;  %v2511_v8 = vrot.slane %v6689_v44, 5  ;;  %v6715_v22 = vrot.slane %v6689_v44, 6 }
 0x1d2   : > { %5347 = vrot.lane.b32.xlu0 %v5346_v51, %s9438_s30  ;;  %v5381_v41 = vpack.i.bf16 %v6689_v44, %v6692_v30  ;;  %v1861_v49 = vrot.slane %v6692_v30, 2  ;;  %v1863_v7 = vrot.slane %v6689_v44, 2  ;;  %v1774_v27 = vrot.slane %v6692_v30, 1 }
 0x1d3   : > { %v1948_v53 = vrot.slane %v6692_v30, 3  ;;  %v1950_v32 = vrot.slane %v6689_v44, 3  ;;  %v1776_v61 = vrot.slane %v6689_v44, 1  ;;  %v2034_v50 = vrot.slane %v6692_v30, 4 }
 0x1d4   : > { %5372 = vrot.lane.b32.xlu1 %v5371_v18, %s9420_s12  ;;  %s9670_s12 = smov 84   ;;  %v1862_v29 = vsel %vm9629_vm6, %v1859_v3, %v1861_v49  ;;  %v6725_v38 = vsel %vm9629_vm6, %v1861_v49, %v1863_v7  ;;  %v1775_v57 = vsel %vm9644_vm5, %v1772_v56, %v1774_v27  ;;  %v2036_v25 = vrot.slane %v6689_v44, 4 }
 0x1d5   : > { %v1951_v5 = vsel %vm9647_vm7, %v1948_v53, %v1950_v32  ;;  %v1777_v52 = vsel %vm9644_vm5, %v1774_v27, %v1776_v61  ;;  %v5386_v17 = vpack.i.bf16 %v6725_v38, %v1862_v29  ;;  %v2035_v59 = vsel %vm9630_vm4, %v2032_v47, %v2034_v50 }
 0x1d6   : > { %5357 = vrot.lane.b32.xlu0 %v5356_v46, %s9434_s16  ;;  %v2120_v2 = vrot.slane %v6692_v30, 6  ;;  %v1949_v60 = vsel %vm9647_vm7, %v1946_v21, %v1948_v53  ;;  %v5391_v58 = vpack.i.bf16 %v1775_v57, %v1773_v45  ;;  %v5396_v46 = vpack.i.bf16 %v1862_v29, %v1860_v37 }
 0x1d7   : > { %v2206_v56 = vrot.slane %v6692_v30, 7 }
 0x1d8   : > { %1806 = vrot.lane.b32.xlu1 %v1773_v45, %s9424_s22  ;;  %v2121_v47 = vsel %vm9637_vm8, %v2118_v43, %v2120_v2  ;;  %v2123_v34 = vsel %vm9637_vm8, %v2120_v2, %v6715_v22 }
 0x1d9   : > { %v5416_v24 = vpack.i.bf16 %v2123_v34, %v2121_v47  ;;  %v2209_v3 = vsel %vm9632_vm0, %v2206_v56, %v6706_v6 }
 0x1da   : > { %5367 = vrot.lane.b32.xlu0 %v5361_v42, %s9440_s13  ;;  %v6749_v42 = vsel %vm9630_vm4, %v2034_v50, %v2036_v25 }
 0x1db   : > { %v5401_v51 = vpack.i.bf16 %v6749_v42, %v2035_v59 }
 0x1dc   : > { %1980 = vrot.lane.b32.xlu1 %v1947_v39, %s9438_s30  ;;  %v2207_v39 = vsel %vm9632_vm0, %v2204_v0, %v2206_v56  ;;  %v6787_v0 = vmul.f32 0.25, %v6481_v1 }
 0x1de   : > { %5377 = vrot.lane.b32.xlu0 %v5371_v18, %s9436_s24  ;;  %v2509_v18 = vrot.slane %v6692_v30, 5  ;;  %9675 = vst [vmem:[#allocation16_spill] sm:$0xff] %v6787_v0  ;;  %v9716_v35 = vrot.slane %v6787_v0, 3 }
 0x1e0   : > { %2293 = vrot.lane.b32.xlu1 %v6689_v44, %s9432_s15  ;;  %v2510_v45 = vsel %vm9631_vm9, %v2507_v16, %v2509_v18  ;;  %v2512_v43 = vsel %vm9631_vm9, %v2509_v18, %v2511_v8  ;;  %v6782_v16 = vmul.f32 0.25, %v6478_v23 }
 0x1e1   : > { %v5406_v21 = vpack.i.bf16 %v2512_v43, %v2510_v45  ;;  %v2212_v43 = vrot.slane %v6787_v0, 7 }
 0x1e2   : > { %1893 = vrot.lane.b32.xlu0 %v1860_v37, %s9422_s25  ;;  %v5431_v37 = vpack.i.bf16 %v2209_v3, %v2207_v39  ;;  %v2513_v49 = vrot.slane %v6782_v16, 5  ;;  %v5436_v23 = vpack.i.bf16 %v6787_v0, %v6782_v16  ;;  %v1778_v1 = vrot.slane %v6782_v16, 1 }
 0x1e3   : > { %v1865_v53 = vrot.slane %v6782_v16, 2  ;;  %v2210_v50 = vrot.slane %v6782_v16, 7  ;;  %v1867_v39 = vrot.slane %v6787_v0, 2 }
 0x1e4   : > { %2291 = vrot.lane.b32.xlu1 %v6692_v30, %s9432_s15 }
 0x1e5   : > { %v2213_v3 = vsel %vm9632_vm0, %v2210_v50, %v2212_v43 }
 0x1e6   : > { %5382 = vrot.lane.b32.xlu0 %v5381_v41, %s9670_s12  ;;  %v5411_v41 = vpack.i.bf16 %v2035_v59, %v6609_v15  ;;  %v6795_v15 = vsel %vm9631_vm9, %v2511_v8, %v2513_v49 }
 0x1e8   : > { %3249 = vrot.lane.b32.xlu1 %v6706_v6, %s9436_s24 }
 0x1ea   : > { %3157 = vrot.lane.b32.xlu0 %v2511_v8, %s9434_s16  ;;  %v6810_v8 = vmul.f32 0.25, %v6545_v13  ;;  %v1866_v13 = vsel %vm9629_vm6, %v1863_v7, %v1865_v53  ;;  %v1780_v7 = vrot.slane %v6787_v0, 1 }
 0x1ec   : > { %1895 = vrot.lane.b32.xlu1 %v1862_v29, %s9422_s25  ;;  %v2124_v29 = vrot.slane %v6782_v16, 6  ;;  %9676 = vst [vmem:[#allocation17_spill] sm:$0xff] %v6810_v8  ;;  %v9444_v59 = vrot.slane %v6810_v8, 4 }
 0x1ee   : > { %3220 = vrot.lane.b32.xlu0 %v6715_v22, %s9440_s13  ;;  %v6806_v27 = vsel %vm9637_vm8, %v6715_v22, %v2124_v29  ;;  %v6821_v22 = vmul.f32 0.25, %v6571_v62 }
 0x1f0   : > { %1897 = vrot.lane.b32.xlu1 %v6725_v38, %s9422_s25  ;;  %s9426_s25 = smov 90   ;;  %9679 = vst [vmem:[#allocation19_spill] sm:$0xff] %v6821_v22  ;;  %v9442_v2 = vrot.slane %v6821_v22, 4 }
 0x1f2   : > { %1808 = vrot.lane.b32.xlu0 %v1775_v57, %s9424_s22  ;;  %v6813_v57 = vmul.f32 0.25, %v6548_v40  ;;  %v2211_v40 = vsel %vm9632_vm0, %v6706_v6, %v2210_v50 }
 0x1f4   : > { %1984 = vrot.lane.b32.xlu1 %v1951_v5, %s9438_s30  ;;  %9677 = vst [vmem:[#allocation18_spill] sm:$0xff] %v6813_v57  ;;  %v1779_v5 = vsel %vm9644_vm5, %v1776_v61, %v1778_v1  ;;  %v1952_v61 = vrot.slane %v6782_v16, 3  ;;  %v2052_v62 = vrot.slane %v6813_v57, 4 }
 0x1f6   : > { %1810 = vrot.lane.b32.xlu0 %v1777_v52, %s9424_s22  ;;  %s9671_s22 = smov 48   ;;  %v1953_v6 = vsel %vm9647_vm7, %v1950_v32, %v1952_v61  ;;  %v6854_v47 = vsel %vm9630_vm4, %v2052_v62, %v9442_v2 }
 0x1f7   : > { %9685 = vst [vmem:[#allocation24_spill] sm:$0xff] %v6854_v47 }
 0x1f8   : > { %5387 = vrot.lane.b32.xlu1 %v5386_v17, %s9426_s25  ;;  %s9672_s25 = smov 54  }
 0x1fa   : > { %1982 = vrot.lane.b32.xlu0 %v1949_v60, %s9438_s30  ;;  %v2515_v60 = vrot.slane %v6787_v0, 5 }
 0x1fc   : > { %5402 = vrot.lane.b32.xlu1 %v5401_v51, %s9428_s29  ;;  %s9673_s29 = smov 66   ;;  %v2516_v18 = vsel %vm9631_vm9, %v2513_v49, %v2515_v60  ;;  %v9446_v49 = vrot.slane %v6787_v0, 3 }
 0x1fe   : > { %5392 = vrot.lane.b32.xlu0 %v5391_v58, %s9671_s22  ;;  %v6849_v58 = vsel %vm9630_vm4, %v9444_v59, %v2052_v62  ;;  %v5456_v62 = vpack.i.bf16 %v2516_v18, %v6795_v15 }
 0x1ff   : > { %9684 = vst [vmem:[#allocation23_spill] sm:$0xff] %v6849_v58 }
 0x200   : > { %5417 = vrot.lane.b32.xlu1 %v5416_v24, %s9430_s14  ;;  %s9674_s14 = smov 78  }
 0x202   : > { %5397 = vrot.lane.b32.xlu0 %v5396_v46, %s9672_s25  ;;  %v1781_v46 = vsel %vm9644_vm5, %v1778_v1, %v1780_v7  ;;  %v1955_v1 = vsel %vm9647_vm7, %v1952_v61, %v9446_v49 }
 0x204   : > { %5422 = vrot.lane.b32.xlu1 %v5416_v24, %s9440_s13  ;;  %v2126_v24 = vrot.slane %v6787_v0, 6 }
 0x206   : > { %5407 = vrot.lane.b32.xlu0 %v5406_v21, %s9673_s29  ;;  %v2127_v45 = vsel %vm9637_vm8, %v2124_v29, %v2126_v24  ;;  %v5446_v29 = vpack.i.bf16 %v1866_v13, %v6725_v38 }
 0x208   : > { %5432 = vrot.lane.b32.xlu1 %v5431_v37, %s9436_s24 }
 0x20a   : > { %5412 = vrot.lane.b32.xlu0 %v5411_v41, %s9434_s16  ;;  %v6888_v41 = vsel %vm9629_vm6, %v1865_v53, %v1867_v39  ;;  %v9445_v53 = vrot.slane %v6787_v0, 4 }
 0x20c   : > { %2347 = vrot.lane.b32.xlu1 %v1777_v52, %s9671_s22 }
 0x20e   : > { %5427 = vrot.lane.b32.xlu0 %v5431_v37, %s9674_s14 }
 0x210   : > { %2297 = vrot.lane.b32.xlu1 %v6787_v0, %s9432_s15 }
 0x212   : > { %2295 = vrot.lane.b32.xlu0 %v6782_v16, %s9432_s15  ;;  %s9678_s15 = smov 6  }
 0x214   : > { %3159 = vrot.lane.b32.xlu1 %v6795_v15, %s9434_s16  ;;  %s9681_s16 = smov 12   ;;  %v5466_v15 = vpack.i.bf16 %v2127_v45, %v6806_v27 }
 0x216   : > { %5437 = vrot.lane.b32.xlu0 %v5436_v23, %s9670_s12 }
 0x218   : > { %2158 = vrot.lane.b32.xlu1 %v6806_v27, %s9440_s13 }
 0x21a   : > { %1812 = vrot.lane.b32.xlu0 %v1779_v5, %s9678_s15 }
 0x21b   : > { %v6823_v52 = vpop.permute.xlu0 %5277 }
 0x21c   : > { %9680 = vst [vmem:[#allocation20_spill] sm:$0xff] %v6823_v52  ;;  %1899 = vrot.lane.b32.xlu1 %v1866_v13, %s9681_s16 }
 0x21e   : > { %2244 = vrot.lane.b32.xlu0 %v2211_v40, %s9436_s24  ;;  %s9687_s24 = smov 24  }
 0x21f   : > { %v6832_v17 = vpop.permute.xlu1 %5297 }
 0x220   : > { %9682 = vst [vmem:[#allocation21_spill] sm:$0xff] %v6832_v17  ;;  %2349 = vrot.lane.b32.xlu1 %v1779_v5, %s9671_s22  ;;  %v2038_v5 = vrot.slane %v6782_v16, 4 }
 0x222   : > { %v6844_v51 = vpop.permute.xlu0 %5282  ;;  %1986 = vrot.lane.b32.xlu0 %v1953_v6, %s9438_s30  ;;  %s9691_s30 = smov 36   ;;  %v5441_v6 = vpack.i.bf16 %v6888_v41, %v1866_v13  ;;  %v2039_v38 = vsel %vm9630_vm4, %v2036_v25, %v2038_v5  ;;  %v6916_v61 = vsel %vm9630_vm4, %v2038_v5, %v9445_v53  ;;  %v6930_v5 = vmul.f32 0.25, %v6497_v55 }
 0x223   : > { %9683 = vst [vmem:[#allocation22_spill] sm:$0xff] %v6844_v51  ;;  %v5451_v13 = vpack.i.bf16 %v6916_v61, %v2039_v38  ;;  %v2222_v51 = vrot.slane %v6810_v8, 7 }
 0x224   : > { %3161 = vrot.lane.b32.xlu1 %v2516_v18, %s9687_s24  ;;  %9702 = vst [vmem:[#allocation35_spill] sm:$0xff] %v6930_v5  ;;  %v1782_v55 = vrot.slane %v6930_v5, 1  ;;  %v1956_v53 = vrot.slane %v6930_v5, 3 }
 0x226   : > { %2351 = vrot.lane.b32.xlu0 %v1781_v46, %s9671_s22 }
 0x227   : > { %v6859_v32 = vpop.permute.xlu1 %5307 }
 0x228   : > { %9686 = vst [vmem:[#allocation25_spill] sm:$0xff] %v6859_v32  ;;  %2160 = vrot.lane.b32.xlu1 %v2127_v45, %s9440_s13  ;;  %s9693_s13 = smov 18  }
 0x22a   : > { %1814 = vrot.lane.b32.xlu0 %v1781_v46, %s9678_s15 }
 0x22b   : > { %v6870_v56 = vpop.permute.xlu0 %5287  ;;  %v6876_v21 = vpop.permute.xlu1 %5312 }
 0x22c   : > { %9688 = vst [vmem:[#allocation26_spill] sm:$0xff] %v6870_v56  ;;  %9689 = vst [vmem:[#allocation27_spill] sm:$0xff] %v6876_v21  ;;  %2246 = vrot.lane.b32.xlu1 %v2213_v3, %s9691_s30  ;;  %v1964_v56 = vrot.slane %v6810_v8, 3 }
 0x22e   : > { %1901 = vrot.lane.b32.xlu0 %v6888_v41, %s9681_s16 }
 0x22f   : > { %v6884_v37 = vpop.permute.xlu0 %5292 }
 0x230   : > { %9690 = vst [vmem:[#allocation28_spill] sm:$0xff] %v6884_v37  ;;  %v6893_v23 = vpop.permute.xlu1 %5322  ;;  %5447 = vrot.lane.b32.xlu1 %v5446_v29, %s9672_s25 }
 0x231   : > { %9692 = vst [vmem:[#allocation29_spill] sm:$0xff] %v6893_v23 }
 0x232   : > { %1988 = vrot.lane.b32.xlu0 %v1955_v1, %s9693_s13  ;;  %v5471_v1 = vpack.i.bf16 %v2213_v3, %v2211_v40  ;;  %v2517_v40 = vrot.slane %v6930_v5, 5  ;;  %v1783_v3 = vsel %vm9644_vm5, %v1780_v7, %v1782_v55 }
 0x234   : > { %v6903_v50 = vpop.permute.xlu0 %5302  ;;  %5457 = vrot.lane.b32.xlu1 %v5456_v62, %s9673_s29  ;;  %v6933_v62 = vmul.f32 0.25, %v6500_v33 }
 0x235   : > { %9694 = vst [vmem:[#allocation30_spill] sm:$0xff] %v6903_v50  ;;  %v6907_v46 = vpop.permute.xlu1 %5332 }
 0x236   : > { %9695 = vst [vmem:[#allocation31_spill] sm:$0xff] %v6907_v46  ;;  %5442 = vrot.lane.b32.xlu0 %v5441_v6, %s9696_s0  ;;  %9703 = vst [vmem:[#allocation36_spill] sm:$0xff] %v6933_v62  ;;  %v5461_v6 = vpack.i.bf16 %v2039_v38, %v6749_v42 }
 0x238   : > { %v6919_v29 = vpop.permute.xlu0 %5317  ;;  %5467 = vrot.lane.b32.xlu1 %v5466_v15, %s9698_s1  ;;  %v5476_v15 = vpack.i.bf16 %v6933_v62, %v6930_v5 }
 0x239   : > { %9697 = vst [vmem:[#allocation32_spill] sm:$0xff] %v6919_v29 }
 0x23a   : > { %v6924_v18 = vpop.permute.xlu1 %5342  ;;  %5452 = vrot.lane.b32.xlu0 %v5451_v13, %s9700_s2 }
 0x23b   : > { %9699 = vst [vmem:[#allocation33_spill] sm:$0xff] %v6924_v18 }
 0x23c   : > { %v6927_v25 = vpop.permute.xlu0 %5327  ;;  %5472 = vrot.lane.b32.xlu1 %v5471_v1, %s9674_s14  ;;  %v6966_v1 = vsel %vm9631_vm9, %v2515_v60, %v2517_v40  ;;  %v2214_v60 = vrot.slane %v6930_v5, 7 }
 0x23d   : > { %9701 = vst [vmem:[#allocation34_spill] sm:$0xff] %v6927_v25 }
 0x23e   : > { %5462 = vrot.lane.b32.xlu0 %v5461_v6, %s9687_s24  ;;  %v6940_v45 = vpop.permute.xlu1 %5352  ;;  %v2128_v6 = vrot.slane %v6930_v5, 6  ;;  %v2215_v29 = vsel %vm9632_vm0, %v2212_v43, %v2214_v60 }
 0x23f   : > { %9705 = vst [vmem:[#allocation38_spill] sm:$0xff] %v6940_v45 }
 0x240   : > { %v6938_v27 = vpop.permute.xlu0 %5337  ;;  %2299 = vrot.lane.b32.xlu1 %v6930_v5, %s9706_s26  ;;  %v2129_v2 = vsel %vm9637_vm8, %v2126_v24, %v2128_v6  ;;  %v9452_v24 = vrot.slane %v6933_v62, 5 }
 0x241   : > { %9704 = vst [vmem:[#allocation37_spill] sm:$0xff] %v6938_v27 }
 0x242   : > { %5477 = vrot.lane.b32.xlu0 %v5476_v15, %s9670_s12  ;;  %v6948_v33 = vpop.permute.xlu1 %5362  ;;  %v1869_v15 = vrot.slane %v6930_v5, 2  ;;  %v2520_v43 = vsel %vm9631_vm9, %v2517_v40, %v9452_v24  ;;  %v9458_v40 = vrot.slane %v6933_v62, 7  ;;  %v9457_v24 = vrot.slane %v6933_v62, 2 }
 0x243   : > { %9707 = vst [vmem:[#allocation39_spill] sm:$0xff] %v6948_v33 }
 0x244   : > { %v6950_v42 = vpop.permute.xlu0 %5347  ;;  %2301 = vrot.lane.b32.xlu1 %v6933_v62, %s9706_s26  ;;  %v1870_v59 = vsel %vm9629_vm6, %v1867_v39, %v1869_v15  ;;  %v1957_v39 = vsel %vm9647_vm7, %v9716_v35, %v1956_v53 }
 0x245   : > { %9708 = vst [vmem:[#allocation40_spill] sm:$0xff] %v6950_v42  ;;  %v5486_v45 = vpack.i.bf16 %v1870_v59, %v6888_v41  ;;  %v7074_v41 = vmul.f32 0.25, %v6515_v19 }
 0x246   : > { %2353 = vrot.lane.b32.xlu0 %v1783_v3, %s9671_s22  ;;  %v6959_v38 = vpop.permute.xlu1 %5372 }
 0x247   : > { %9709 = vst [vmem:[#allocation41_spill] sm:$0xff] %v6959_v38  ;;  %9721 = vst [vmem:[#allocation50_spill] sm:$0xff] %v7074_v41  ;;  %v1873_v9 = vrot.slane %v7074_v41, 2  ;;  %v1960_v27 = vrot.slane %v7074_v41, 3 }
 0x248   : > { %v6961_v13 = vpop.permute.xlu0 %5357  ;;  %3163 = vrot.lane.b32.xlu1 %v6966_v1, %s9687_s24 }
 0x249   : > { %9710 = vst [vmem:[#allocation42_spill] sm:$0xff] %v6961_v13 }
 0x24a   : > { %1816 = vrot.lane.b32.xlu0 %v1783_v3, %s9678_s15  ;;  %v6973_v7 = vpop.permute.xlu1 %1806 }
 0x24b   : > { %9711 = vst [vmem:[#allocation43_spill] sm:$0xff] %v6973_v7  ;;  %v9454_v7 = vrot.slane %v6933_v62, 1 }
 0x24c   : > { %v6975_v34 = vpop.permute.xlu0 %5367  ;;  %2162 = vrot.lane.b32.xlu1 %v2129_v2, %s9713_s19 }
 0x24d   : > { %9712 = vst [vmem:[#allocation44_spill] sm:$0xff] %v6975_v34  ;;  %v1785_v35 = vsel %vm9644_vm5, %v1782_v55, %v9454_v7  ;;  %v2217_v7 = vsel %vm9632_vm0, %v2214_v60, %v9458_v40  ;;  %v2042_v60 = vrot.slane %v6930_v5, 4  ;;  %v2527_v5 = vrot.slane %v6813_v57, 5 }
 0x24e   : > { %1903 = vrot.lane.b32.xlu0 %v1870_v59, %s9681_s16  ;;  %v6985_v49 = vpop.permute.xlu1 %1980 }
 0x24f   : > { %9714 = vst [vmem:[#allocation45_spill] sm:$0xff] %v6985_v49 }
 0x250   : > { %v6987_v3 = vpop.permute.xlu0 %5377  ;;  %2248 = vrot.lane.b32.xlu1 %v2215_v29, %s9691_s30 }
 0x251   : > { %9715 = vst [vmem:[#allocation46_spill] sm:$0xff] %v6987_v3  ;;  %v9455_v3 = vrot.slane %v6933_v62, 6 }
 0x252   : > { %1990 = vrot.lane.b32.xlu0 %v1957_v39, %s9693_s13  ;;  %v6999_v34 = vpop.permute.xlu1 %2293 }
 0x254   : > { %v7001_v49 = vpop.permute.xlu0 %1893  ;;  %3165 = vrot.lane.b32.xlu1 %v2520_v43, %s9687_s24 }
 0x255   : > { %9717 = vst [vmem:[#allocation47_spill] sm:$0xff] %v7001_v49  ;;  %v2131_v49 = vsel %vm9637_vm8, %v2128_v6, %v9455_v3  ;;  %v7033_v6 = vsel %vm9629_vm6, %v1869_v15, %v9457_v24  ;;  %v9462_v3 = vrot.slane %v6933_v62, 3  ;;  %v9463_v24 = vrot.slane %v6933_v62, 4 }
 0x256   : > { %2355 = vrot.lane.b32.xlu0 %v1785_v35, %s9671_s22  ;;  %v7012_v38 = vpop.permute.xlu1 %2291  ;;  %v5506_v40 = vpack.i.bf16 %v2131_v49, %v2129_v2  ;;  %v5511_v2 = vpack.i.bf16 %v2217_v7, %v2215_v29  ;;  %v7085_v29 = vmul.f32 0.25, %v6518_v28  ;;  %v9728_v28 = vrot.slane %v6933_v62, 5 }
 0x257   : > { %9718 = vst [vmem:[#allocation48_spill] sm:$0xff] %v7012_v38  ;;  %v5481_v38 = vpack.i.bf16 %v7033_v6, %v1870_v59  ;;  %v1959_v15 = vsel %vm9647_vm7, %v1956_v53, %v9462_v3  ;;  %v9720_v53 = vrot.slane %v6787_v0, 4 }
 0x258   : > { %v7014_v39 = vpop.permute.xlu0 %5382  ;;  %2164 = vrot.lane.b32.xlu1 %v2131_v49, %s9713_s19  ;;  %9723 = vst [vmem:[#allocation52_spill] sm:$0xff] %v7085_v29  ;;  %v1788_v18 = vrot.slane %v7085_v29, 1 }
 0x259   : > { %9719 = vst [vmem:[#allocation49_spill] sm:$0xff] %v7014_v39  ;;  %v2043_v3 = vsel %vm9630_vm4, %v9720_v53, %v2042_v60 }
 0x25a   : > { %1818 = vrot.lane.b32.xlu0 %v1785_v35, %s9678_s15  ;;  %v7023_v13 = vpop.permute.xlu1 %3249  ;;  %v5501_v19 = vpack.i.bf16 %v2043_v3, %v6916_v61  ;;  %v2132_v61 = vrot.slane %v7074_v41, 6 }
 0x25c   : > { %v7025_v55 = vpop.permute.xlu0 %3157  ;;  %2250 = vrot.lane.b32.xlu1 %v2217_v7, %s9691_s30 }
 0x25e   : > { %1905 = vrot.lane.b32.xlu0 %v7033_v6, %s9681_s16  ;;  %v7039_v35 = vpop.permute.xlu1 %1895 }
 0x260   : > { %v7042_v39 = vpop.permute.xlu0 %3220  ;;  %5482 = vrot.lane.b32.xlu1 %v5481_v38, %s9696_s0  ;;  %v7060_v38 = vsel %vm9630_vm4, %v2042_v60, %v9463_v24  ;;  %v5496_v60 = vpack.i.bf16 %v2520_v43, %v6966_v1 }
 0x261   : > { %v5491_v59 = vpack.i.bf16 %v7060_v38, %v2043_v3  ;;  %v1786_v3 = vrot.slane %v7074_v41, 1 }
 0x262   : > { %1992 = vrot.lane.b32.xlu0 %v1959_v15, %s9693_s13  ;;  %v7051_v42 = vpop.permute.xlu1 %1897 }
 0x264   : > { %v7053_v33 = vpop.permute.xlu0 %1808  ;;  %5507 = vrot.lane.b32.xlu1 %v5506_v40, %s9698_s1 }
 0x266   : > { %5487 = vrot.lane.b32.xlu0 %v5486_v45, %s9672_s25  ;;  %v7066_v49 = vpop.permute.xlu1 %1984 }
 0x268   : > { %v7068_v15 = vpop.permute.xlu0 %1810  ;;  %5512 = vrot.lane.b32.xlu1 %v5511_v2, %s9674_s14  ;;  %v2521_v2 = vrot.slane %v7074_v41, 5 }
 0x26a   : > { %5492 = vrot.lane.b32.xlu0 %v5491_v59, %s9700_s2  ;;  %v7076_v40 = vpop.permute.xlu1 %5387  ;;  %v2522_v59 = vsel %vm9631_vm9, %v9728_v28, %v2521_v2  ;;  %v2218_v28 = vrot.slane %v7074_v41, 7 }
 0x26b   : > { %9722 = vst [vmem:[#allocation51_spill] sm:$0xff] %v7076_v40  ;;  %v9732_v40 = vrot.slane %v6933_v62, 1 }
 0x26c   : > { %v7079_v53 = vpop.permute.xlu0 %1982  ;;  %2303 = vrot.lane.b32.xlu1 %v7074_v41, %s9706_s26 }
 0x26e   : > { %5497 = vrot.lane.b32.xlu0 %v5496_v60, %s9673_s29  ;;  %v7087_v45 = vpop.permute.xlu1 %5402  ;;  %v5516_v60 = vpack.i.bf16 %v7085_v29, %v7074_v41 }
 0x26f   : > { %9724 = vst [vmem:[#allocation53_spill] sm:$0xff] %v7087_v45 }
 0x270   : > { %v7089_v7 = vpop.permute.xlu0 %5392  ;;  %2305 = vrot.lane.b32.xlu1 %v7085_v29, %s9706_s26 }
 0x271   : > { %9725 = vst [vmem:[#allocation54_spill] sm:$0xff] %v7089_v7 }
 0x272   : > { %5502 = vrot.lane.b32.xlu0 %v5501_v19, %s9687_s24  ;;  %v7096_v1 = vpop.permute.xlu1 %5417 }
 0x273   : > { %9726 = vst [vmem:[#allocation55_spill] sm:$0xff] %v7096_v1  ;;  %v9731_v1 = vrot.slane %v6933_v62, 6 }
 0x274   : > { %v7098_v43 = vpop.permute.xlu0 %5397  ;;  %3167 = vrot.lane.b32.xlu1 %v2522_v59, %s9687_s24 }
 0x275   : > { %9727 = vst [vmem:[#allocation56_spill] sm:$0xff] %v7098_v43  ;;  %v2133_v45 = vsel %vm9637_vm8, %v9731_v1, %v2132_v61  ;;  %v1787_v43 = vsel %vm9644_vm5, %v9732_v40, %v1786_v3 }
 0x276   : > { %5517 = vrot.lane.b32.xlu0 %v5516_v60, %s9670_s12  ;;  %v7109_v19 = vpop.permute.xlu1 %5422  ;;  %v9478_v60 = vrot.slane %v7085_v29, 5 }
 0x277   : > { %9729 = vst [vmem:[#allocation57_spill] sm:$0xff] %v7109_v19 }
 0x278   : > { %v7111_v24 = vpop.permute.xlu0 %5407  ;;  %2166 = vrot.lane.b32.xlu1 %v2133_v45, %s9713_s19  ;;  %v2524_v40 = vsel %vm9631_vm9, %v2521_v2, %v9478_v60  ;;  %v9487_v60 = vrot.slane %v7085_v29, 7 }
 0x279   : > { %9730 = vst [vmem:[#allocation58_spill] sm:$0xff] %v7111_v24  ;;  %v9735_v24 = vrot.slane %v6933_v62, 7 }
 0x27a   : > { %2357 = vrot.lane.b32.xlu0 %v1787_v43, %s9671_s22  ;;  %v7122_v7 = vpop.permute.xlu1 %5432 }
 0x27b   : > { %9733 = vst [vmem:[#allocation59_spill] sm:$0xff] %v7122_v7  ;;  %v2219_v1 = vsel %vm9632_vm0, %v9735_v24, %v2218_v28  ;;  %v9738_v24 = vrot.slane %v6933_v62, 2 }
 0x27c   : > { %v7125_v19 = vpop.permute.xlu0 %5412  ;;  %2252 = vrot.lane.b32.xlu1 %v2219_v1, %s9691_s30 }
 0x27d   : > { %9734 = vst [vmem:[#allocation60_spill] sm:$0xff] %v7125_v19  ;;  %v9483_v19 = vrot.slane %v7085_v29, 6  ;;  %v1874_v21 = vsel %vm9629_vm6, %v9738_v24, %v1873_v9  ;;  %v9740_v24 = vrot.slane %v6933_v62, 3 }
 0x27e   : > { %1820 = vrot.lane.b32.xlu0 %v1787_v43, %s9678_s15  ;;  %v7133_v26 = vpop.permute.xlu1 %2347 }
 0x27f   : > { %9736 = vst [vmem:[#allocation61_spill] sm:$0xff] %v7133_v26  ;;  %v9486_v26 = vrot.slane %v7085_v29, 2  ;;  %v2135_v2 = vsel %vm9637_vm8, %v2132_v61, %v9483_v19  ;;  %v2221_v19 = vsel %vm9632_vm0, %v2218_v28, %v9487_v60  ;;  %v1962_v60 = vrot.slane %v7085_v29, 3 }
 0x280   : > { %v7138_v7 = vpop.permute.xlu0 %5427  ;;  %3169 = vrot.lane.b32.xlu1 %v2524_v40, %s9687_s24 }
 0x281   : > { %9737 = vst [vmem:[#allocation62_spill] sm:$0xff] %v7138_v7  ;;  %v1961_v7 = vsel %vm9647_vm7, %v9740_v24, %v1960_v27  ;;  %v7167_v23 = vsel %vm9629_vm6, %v1873_v9, %v9486_v26  ;;  %v1789_v24 = vsel %vm9644_vm5, %v1786_v3, %v1788_v18  ;;  %v5526_v9 = vpack.i.bf16 %v1874_v21, %v7033_v6 }
 0x282   : > { %1907 = vrot.lane.b32.xlu0 %v1874_v21, %s9681_s16  ;;  %v7147_v43 = vpop.permute.xlu1 %2297  ;;  %v2046_v3 = vrot.slane %v7074_v41, 4  ;;  %v1792_v41 = vrot.slane %v6813_v57, 1 }
 0x283   : > { %9739 = vst [vmem:[#allocation63_spill] sm:$0xff] %v7147_v43 }
 0x284   : > { %v7150_v25 = vpop.permute.xlu0 %2295  ;;  %2168 = vrot.lane.b32.xlu1 %v2135_v2, %s9713_s19 }
 0x286   : > { %1994 = vrot.lane.b32.xlu0 %v1961_v7, %s9693_s13  ;;  %v7162_v46 = vpop.permute.xlu1 %3159  ;;  %v5521_v7 = vpack.i.bf16 %v7167_v23, %v1874_v21  ;;  %v9742_v21 = vrot.slane %v6933_v62, 4 }
 0x288   : > { %v7169_v61 = vpop.permute.xlu0 %5437  ;;  %2254 = vrot.lane.b32.xlu1 %v2221_v19, %s9691_s30  ;;  %v2047_v6 = vsel %vm9630_vm4, %v9742_v21, %v2046_v3 }
 0x289   : > { %9741 = vst [vmem:[#allocation64_spill] sm:$0xff] %v7169_v61  ;;  %v9493_v61 = vrot.slane %v7085_v29, 4  ;;  %v5541_v21 = vpack.i.bf16 %v2047_v6, %v7060_v38 }
 0x28a   : > { %2359 = vrot.lane.b32.xlu0 %v1789_v24, %s9671_s22  ;;  %v7178_v52 = vpop.permute.xlu1 %2158 }
 0x28b   : > { %v7207_v50 = vsel %vm9630_vm4, %v2046_v3, %v9493_v61  ;;  %v2136_v61 = vrot.slane %v6810_v8, 6 }
 0x28c   : > { %v7180_v32 = vpop.permute.xlu0 %1812  ;;  %5522 = vrot.lane.b32.xlu1 %v5521_v7, %s9696_s0  ;;  %v5536_v7 = vpack.i.bf16 %v2524_v40, %v2522_v59  ;;  %v5546_v59 = vpack.i.bf16 %v2135_v2, %v2133_v45  ;;  %v5531_v20 = vpack.i.bf16 %v7207_v50, %v2047_v6  ;;  %v1790_v45 = vrot.slane %v6810_v8, 1 }
 0x28d   : > { %v1877_v6 = vrot.slane %v6810_v8, 2 }
 0x28e   : > { %1822 = vrot.lane.b32.xlu0 %v1789_v24, %s9678_s15  ;;  %v7185_v26 = vpop.permute.xlu1 %1899 }
 0x290   : > { %v7187_v28 = vpop.permute.xlu0 %2244  ;;  %5527 = vrot.lane.b32.xlu1 %v5526_v9, %s9672_s25  ;;  %v1963_v9 = vsel %vm9647_vm7, %v1960_v27, %v1962_v60 }
 0x292   : > { %1909 = vrot.lane.b32.xlu0 %v7167_v23, %s9681_s16  ;;  %v7195_v17 = vpop.permute.xlu1 %2349 }
 0x294   : > { %v7197_v24 = vpop.permute.xlu0 %1986  ;;  %5537 = vrot.lane.b32.xlu1 %v5536_v7, %s9673_s29  ;;  %v5551_v7 = vpack.i.bf16 %v2221_v19, %v2219_v1  ;;  %v2525_v1 = vrot.slane %v6810_v8, 5 }
 0x296   : > { %1996 = vrot.lane.b32.xlu0 %v1963_v9, %s9693_s13  ;;  %v7210_v40 = vpop.permute.xlu1 %3161 }
 0x298   : > { %v7212_v14 = vpop.permute.xlu0 %2351  ;;  %5547 = vrot.lane.b32.xlu1 %v5546_v59, %s9698_s1 }
 0x299   : > { %9743 = vst [vmem:[#allocation65_spill] sm:$0xff] %v7212_v14 }
 0x29a   : > { %5532 = vrot.lane.b32.xlu0 %v5531_v20, %s9700_s2  ;;  %v7217_v27 = vpop.permute.xlu1 %2160  ;;  %v1791_v20 = vsel %vm9644_vm5, %v1788_v18, %v1790_v45  ;;  %v9747_v18 = vrot.slane %v7085_v29, 5 }
 0x29c   : > { %v7220_v3 = vpop.permute.xlu0 %1814  ;;  %5552 = vrot.lane.b32.xlu1 %v5551_v7, %s9674_s14 }
 0x29e   : > { %5542 = vrot.lane.b32.xlu0 %v5541_v21, %s9687_s24  ;;  %v7225_v2 = vpop.permute.xlu1 %2246  ;;  %v2526_v21 = vsel %vm9631_vm9, %v9747_v18, %v2525_v1 }
 0x2a0   : > { %v7227_v9 = vpop.permute.xlu0 %1901  ;;  %2307 = vrot.lane.b32.xlu1 %v6810_v8, %s9706_s26 }
 0x2a2   : > { %2361 = vrot.lane.b32.xlu0 %v1791_v20, %s9671_s22  ;;  %v7233_v38 = vpop.permute.xlu1 %5447 }
 0x2a3   : > { %9744 = vst [vmem:[#allocation66_spill] sm:$0xff] %v7233_v38  ;;  %v9748_v38 = vrot.slane %v7085_v29, 2 }
 0x2a4   : > { %v7235_v19 = vpop.permute.xlu0 %1988  ;;  %2309 = vrot.lane.b32.xlu1 %v6813_v57, %s9706_s26 }
 0x2a5   : > { %v1878_v37 = vsel %vm9629_vm6, %v9748_v38, %v1877_v6  ;;  %v1965_v38 = vsel %vm9647_vm7, %v1962_v60, %v1964_v56  ;;  %v1793_v60 = vsel %vm9644_vm5, %v1790_v45, %v1792_v41 }
 0x2a6   : > { %1824 = vrot.lane.b32.xlu0 %v1791_v20, %s9678_s15  ;;  %v7242_v59 = vpop.permute.xlu1 %5457 }
 0x2a7   : > { %9745 = vst [vmem:[#allocation67_spill] sm:$0xff] %v7242_v59 }
 0x2a8   : > { %v7244_v7 = vpop.permute.xlu0 %5442  ;;  %3171 = vrot.lane.b32.xlu1 %v2526_v21, %s9687_s24 }
 0x2a9   : > { %9746 = vst [vmem:[#allocation68_spill] sm:$0xff] %v7244_v7  ;;  %v9751_v7 = vrot.slane %v7085_v29, 6 }
 0x2aa   : > { %1911 = vrot.lane.b32.xlu0 %v1878_v37, %s9681_s16  ;;  %v7256_v20 = vpop.permute.xlu1 %5467 }
 0x2ab   : > { %9749 = vst [vmem:[#allocation69_spill] sm:$0xff] %v7256_v20  ;;  %v7263_v18 = vsel %vm9637_vm8, %v9751_v7, %v2136_v61 }
 0x2ac   : > { %v7258_v59 = vpop.permute.xlu0 %5452  ;;  %9752 = vst [vmem:[#allocation71_spill] sm:$0xff] %v7263_v18  ;;  %2170 = vrot.lane.b32.xlu1 %v7263_v18, %s9713_s19 }
 0x2ad   : > { %9750 = vst [vmem:[#allocation70_spill] sm:$0xff] %v7258_v59  ;;  %v9755_v59 = vrot.slane %v7085_v29, 7 }
 0x2ae   : > { %1998 = vrot.lane.b32.xlu0 %v1965_v38, %s9693_s13  ;;  %v7271_v47 = vpop.permute.xlu1 %5472 }
 0x2af   : > { %9753 = vst [vmem:[#allocation72_spill] sm:$0xff] %v7271_v47  ;;  %v7278_v7 = vsel %vm9632_vm0, %v9755_v59, %v2222_v51  ;;  %v2528_v47 = vsel %vm9631_vm9, %v2525_v1, %v2527_v5  ;;  %v1879_v59 = vrot.slane %v6813_v57, 2 }
 0x2b0   : > { %v7273_v20 = vpop.permute.xlu0 %5462  ;;  %9756 = vst [vmem:[#allocation74_spill] sm:$0xff] %v7278_v7  ;;  %2256 = vrot.lane.b32.xlu1 %v7278_v7, %s9691_s30 }
 0x2b1   : > { %9754 = vst [vmem:[#allocation73_spill] sm:$0xff] %v7273_v20  ;;  %v2138_v20 = vrot.slane %v6813_v57, 6  ;;  %v7305_v1 = vsel %vm9629_vm6, %v1877_v6, %v1879_v59  ;;  %v9765_v6 = vrot.slane %v6810_v8, 4 }
 0x2b2   : > { %2363 = vrot.lane.b32.xlu0 %v1793_v60, %s9671_s22  ;;  %v7285_v18 = vpop.permute.xlu1 %2299  ;;  %9762 = vst [vmem:[#allocation80_spill] sm:$0xff] %v7305_v1  ;;  %v5556_v0 = vpack.i.bf16 %v7305_v1, %v1878_v37 }
 0x2b3   : > { %9757 = vst [vmem:[#allocation75_spill] sm:$0xff] %v7285_v18  ;;  %v7299_v45 = vsel %vm9637_vm8, %v2136_v61, %v2138_v20  ;;  %v2224_v18 = vrot.slane %v6813_v57, 7 }
 0x2b4   : > { %v7287_v38 = vpop.permute.xlu0 %5477  ;;  %3173 = vrot.lane.b32.xlu1 %v2528_v47, %s9687_s24  ;;  %9761 = vst [vmem:[#allocation79_spill] sm:$0xff] %v7299_v45 }
 0x2b5   : > { %9758 = vst [vmem:[#allocation76_spill] sm:$0xff] %v7287_v38  ;;  %v1966_v38 = vrot.slane %v6813_v57, 3  ;;  %v7315_v61 = vsel %vm9632_vm0, %v2222_v51, %v2224_v18 }
 0x2b6   : > { %1826 = vrot.lane.b32.xlu0 %v1793_v60, %s9678_s15  ;;  %v7294_v62 = vpop.permute.xlu1 %2301  ;;  %9764 = vst [vmem:[#allocation82_spill] sm:$0xff] %v7315_v61 }
 0x2b7   : > { %9759 = vst [vmem:[#allocation77_spill] sm:$0xff] %v7294_v62 }
 0x2b8   : > { %v7296_v7 = vpop.permute.xlu0 %2353  ;;  %2172 = vrot.lane.b32.xlu1 %v7299_v45, %s9713_s19  ;;  %v1967_v45 = vsel %vm9647_vm7, %v1964_v56, %v1966_v38  ;;  %v5561_v56 = vpack.i.bf16 %v1878_v37, %v7167_v23 }
 0x2b9   : > { %9760 = vst [vmem:[#allocation78_spill] sm:$0xff] %v7296_v7  ;;  %v9766_v7 = vrot.slane %v7085_v29, 4 }
 0x2ba   : > { %1913 = vrot.lane.b32.xlu0 %v7305_v1, %s9681_s16  ;;  %v7310_v60 = vpop.permute.xlu1 %3163  ;;  %v2140_v1 = vrot.slane %v6821_v22, 6 }
 0x2bb   : > { %v2051_v57 = vsel %vm9630_vm4, %v9766_v7, %v9765_v6  ;;  %v5571_v6 = vpack.i.bf16 %v2528_v47, %v2526_v21  ;;  %v7359_v47 = vmul.f32 0.25, %v6574_v31 }
 0x2bc   : > { %v7312_v62 = vpop.permute.xlu0 %1816  ;;  %2258 = vrot.lane.b32.xlu1 %v7315_v61, %s9691_s30  ;;  %v5566_v51 = vpack.i.bf16 %v6849_v58, %v2051_v57  ;;  %v5576_v7 = vpack.i.bf16 %v2051_v57, %v7207_v50  ;;  %v1881_v50 = vrot.slane %v6821_v22, 2 }
 0x2bd   : > { %9763 = vst [vmem:[#allocation81_spill] sm:$0xff] %v7312_v62 }
 0x2be   : > { %2000 = vrot.lane.b32.xlu0 %v1967_v45, %s9693_s13  ;;  %v7327_v43 = vpop.permute.xlu1 %2162  ;;  %v1794_v45 = vrot.slane %v6821_v22, 1 }
 0x2c0   : > { %v7329_v62 = vpop.permute.xlu0 %1903  ;;  %5557 = vrot.lane.b32.xlu1 %v5556_v0, %s9696_s0  ;;  %v1795_v37 = vsel %vm9644_vm5, %v1792_v41, %v1794_v45  ;;  %v2529_v41 = vrot.slane %v6821_v22, 5 }
 0x2c2   : > { %5567 = vrot.lane.b32.xlu0 %v5566_v51, %s9700_s2  ;;  %v7335_v61 = vpop.permute.xlu1 %2248 }
 0x2c3   : > { %9767 = vst [vmem:[#allocation83_spill] sm:$0xff] %v7335_v61 }
 0x2c4   : > { %v7337_v29 = vpop.permute.xlu0 %1990  ;;  %5562 = vrot.lane.b32.xlu1 %v5561_v56, %s9672_s25  ;;  %v7369_v56 = vsel %vm9629_vm6, %v1879_v59, %v1881_v50 }
 0x2c5   : > { %9773 = vst [vmem:[#allocation89_spill] sm:$0xff] %v7369_v56 }
 0x2c6   : > { %5577 = vrot.lane.b32.xlu0 %v5576_v7, %s9687_s24  ;;  %v7343_v58 = vpop.permute.xlu1 %3165  ;;  %v1968_v7 = vrot.slane %v6821_v22, 3 }
 0x2c8   : > { %v7345_v0 = vpop.permute.xlu0 %2355  ;;  %5572 = vrot.lane.b32.xlu1 %v5571_v6, %s9673_s29  ;;  %v1969_v59 = vsel %vm9647_vm7, %v1966_v38, %v1968_v7 }
 0x2c9   : > { %9768 = vst [vmem:[#allocation84_spill] sm:$0xff] %v7345_v0 }
 0x2ca   : > { %2365 = vrot.lane.b32.xlu0 %v1795_v37, %s9671_s22  ;;  %v7350_v23 = vpop.permute.xlu1 %2164 }
 0x2cb   : > { %9769 = vst [vmem:[#allocation85_spill] sm:$0xff] %v7350_v23 }
 0x2cc   : > { %v7352_v57 = vpop.permute.xlu0 %1818  ;;  %2311 = vrot.lane.b32.xlu1 %v6821_v22, %s9706_s26 }
 0x2cd   : > { %9770 = vst [vmem:[#allocation86_spill] sm:$0xff] %v7352_v57 }
 0x2ce   : > { %1828 = vrot.lane.b32.xlu0 %v1795_v37, %s9678_s15  ;;  %v7361_v21 = vpop.permute.xlu1 %2250  ;;  %v7379_v37 = vsel %vm9631_vm9, %v2527_v5, %v2529_v41  ;;  %v2226_v5 = vrot.slane %v6821_v22, 7 }
 0x2cf   : > { %9771 = vst [vmem:[#allocation87_spill] sm:$0xff] %v7361_v21  ;;  %9776 = vst [vmem:[#allocation92_spill] sm:$0xff] %v7379_v37 }
 0x2d0   : > { %v7363_v51 = vpop.permute.xlu0 %1905  ;;  %2313 = vrot.lane.b32.xlu1 %v7359_v47, %s9706_s26 }
 0x2d1   : > { %9772 = vst [vmem:[#allocation88_spill] sm:$0xff] %v7363_v51  ;;  %v1796_v51 = vrot.slane %v7359_v47, 1 }
 0x2d2   : > { %1915 = vrot.lane.b32.xlu0 %v7369_v56, %s9681_s16  ;;  %v7374_v6 = vpop.permute.xlu1 %5482 }
 0x2d3   : > { %9774 = vst [vmem:[#allocation90_spill] sm:$0xff] %v7374_v6  ;;  %v7392_v6 = vsel %vm9637_vm8, %v2138_v20, %v2140_v1  ;;  %v1883_v20 = vrot.slane %v7359_v47, 2 }
 0x2d4   : > { %v7376_v31 = vpop.permute.xlu0 %1992  ;;  %3175 = vrot.lane.b32.xlu1 %v7379_v37, %s9687_s24  ;;  %9779 = vst [vmem:[#allocation95_spill] sm:$0xff] %v7392_v6  ;;  %v1797_v37 = vsel %vm9644_vm5, %v1794_v45, %v1796_v51 }
 0x2d5   : > { %9775 = vst [vmem:[#allocation91_spill] sm:$0xff] %v7376_v31 }
 0x2d6   : > { %2002 = vrot.lane.b32.xlu0 %v1969_v59, %s9693_s13  ;;  %v7387_v8 = vpop.permute.xlu1 %5507  ;;  %v7404_v59 = vsel %vm9632_vm0, %v2224_v18, %v2226_v5  ;;  %v7422_v18 = vsel %vm9629_vm6, %v1881_v50, %v1883_v20 }
 0x2d7   : > { %9777 = vst [vmem:[#allocation93_spill] sm:$0xff] %v7387_v8  ;;  %9782 = vst [vmem:[#allocation98_spill] sm:$0xff] %v7404_v59  ;;  %v2531_v8 = vrot.slane %v7359_v47, 5 }
 0x2d8   : > { %v7389_v56 = vpop.permute.xlu0 %5487  ;;  %2174 = vrot.lane.b32.xlu1 %v7392_v6, %s9713_s19  ;;  %9786 = vst [vmem:[#allocation102_spill] sm:$0xff] %v7422_v18  ;;  %v7436_v6 = vmul.f32 0.25, %v6596_v54 }
 0x2d9   : > { %9778 = vst [vmem:[#allocation94_spill] sm:$0xff] %v7389_v56 }
 0x2da   : > { %2367 = vrot.lane.b32.xlu0 %v1797_v37, %s9671_s22  ;;  %v7399_v38 = vpop.permute.xlu1 %5512  ;;  %9790 = vst [vmem:[#allocation106_spill] sm:$0xff] %v7436_v6  ;;  %v2335_v54 = vrot.slane %v7436_v6, 1 }
 0x2db   : > { %9780 = vst [vmem:[#allocation96_spill] sm:$0xff] %v7399_v38  ;;  %v7416_v38 = vsel %vm9631_vm9, %v2529_v41, %v2531_v8 }
 0x2dc   : > { %v7401_v31 = vpop.permute.xlu0 %5492  ;;  %2260 = vrot.lane.b32.xlu1 %v7404_v59, %s9691_s30  ;;  %9785 = vst [vmem:[#allocation101_spill] sm:$0xff] %v7416_v38  ;;  %v1970_v59 = vrot.slane %v7359_v47, 3 }
 0x2dd   : > { %9781 = vst [vmem:[#allocation97_spill] sm:$0xff] %v7401_v31  ;;  %v2142_v31 = vrot.slane %v7359_v47, 6 }
 0x2de   : > { %1830 = vrot.lane.b32.xlu0 %v1797_v37, %s9678_s15  ;;  %v7411_v56 = vpop.permute.xlu1 %2303  ;;  %v1971_v50 = vsel %vm9647_vm7, %v1968_v7, %v1970_v59 }
 0x2df   : > { %9783 = vst [vmem:[#allocation99_spill] sm:$0xff] %v7411_v56  ;;  %v7432_v41 = vsel %vm9637_vm8, %v2140_v1, %v2142_v31  ;;  %v7455_v1 = vmul.f32 0.25, %v6599_v63 }
 0x2e0   : > { %v7413_v45 = vpop.permute.xlu0 %5497  ;;  %3177 = vrot.lane.b32.xlu1 %v7416_v38, %s9687_s24  ;;  %9789 = vst [vmem:[#allocation105_spill] sm:$0xff] %v7432_v41 }
 0x2e1   : > { %9784 = vst [vmem:[#allocation100_spill] sm:$0xff] %v7413_v45  ;;  %v2228_v45 = vrot.slane %v7359_v47, 7  ;;  %9794 = vst [vmem:[#allocation110_spill] sm:$0xff] %v7455_v1 }
 0x2e2   : > { %1917 = vrot.lane.b32.xlu0 %v7422_v18, %s9681_s16  ;;  %v7427_v37 = vpop.permute.xlu1 %2305 }
 0x2e3   : > { %9787 = vst [vmem:[#allocation103_spill] sm:$0xff] %v7427_v37  ;;  %v2144_v37 = vrot.slane %v7436_v6, 6 }
 0x2e4   : > { %v7429_v56 = vpop.permute.xlu0 %5502  ;;  %2176 = vrot.lane.b32.xlu1 %v7432_v41, %s9713_s19 }
 0x2e5   : > { %9788 = vst [vmem:[#allocation104_spill] sm:$0xff] %v7429_v56  ;;  %v7447_v56 = vsel %vm9632_vm0, %v2226_v5, %v2228_v45  ;;  %v2336_v5 = vsel %vm9644_vm5, %v1796_v51, %v2335_v54 }
 0x2e6   : > { %2004 = vrot.lane.b32.xlu0 %v1971_v50, %s9693_s13  ;;  %v7442_v38 = vpop.permute.xlu1 %3167  ;;  %9793 = vst [vmem:[#allocation109_spill] sm:$0xff] %v7447_v56 }
 0x2e7   : > { %9791 = vst [vmem:[#allocation107_spill] sm:$0xff] %v7442_v38  ;;  %v2230_v38 = vrot.slane %v7436_v6, 7 }
 0x2e8   : > { %v7444_v18 = vpop.permute.xlu0 %5517  ;;  %2262 = vrot.lane.b32.xlu1 %v7447_v56, %s9691_s30 }
 0x2e9   : > { %9792 = vst [vmem:[#allocation108_spill] sm:$0xff] %v7444_v18  ;;  %v2533_v18 = vrot.slane %v7436_v6, 5 }
 0x2ea   : > { %2315 = vrot.lane.b32.xlu0 %v7436_v6, %s9706_s26  ;;  %v7457_v7 = vpop.permute.xlu1 %2166 }
 0x2eb   : > { %9795 = vst [vmem:[#allocation111_spill] sm:$0xff] %v7457_v7  ;;  %v7472_v63 = vsel %vm9631_vm9, %v2531_v8, %v2533_v18  ;;  %v7477_v7 = vsel %vm9637_vm8, %v2142_v31, %v2144_v37  ;;  %v7489_v8 = vsel %vm9632_vm0, %v2228_v45, %v2230_v38 }
 0x2ec   : > { %v7459_v50 = vpop.permute.xlu0 %2357  ;;  %3270 = vrot.lane.b32.xlu1 %v7455_v1, %s9706_s26  ;;  %9798 = vst [vmem:[#allocation114_spill] sm:$0xff] %v7472_v63  ;;  %9799 = vst [vmem:[#allocation115_spill] sm:$0xff] %v7477_v7 }
 0x2ed   : > { %9796 = vst [vmem:[#allocation112_spill] sm:$0xff] %v7459_v50  ;;  %9802 = vst [vmem:[#allocation118_spill] sm:$0xff] %v7489_v8 }
 0x2ee   : > { %2369 = vrot.lane.b32.xlu0 %v2336_v5, %s9671_s22  ;;  %v7467_v56 = vpop.permute.xlu1 %2252 }
 0x2ef   : > { %9797 = vst [vmem:[#allocation113_spill] sm:$0xff] %v7467_v56  ;;  %v2390_v56 = vrot.slane %v7436_v6, 2 }
 0x2f0   : > { %v7469_v41 = vpop.permute.xlu0 %1820  ;;  %3179 = vrot.lane.b32.xlu1 %v7472_v63, %s9687_s24  ;;  %v2337_v63 = vrot.slane %v7455_v1, 1 }
 0x2f2   : > { %2178 = vrot.lane.b32.xlu0 %v7477_v7, %s9713_s19  ;;  %v7482_v51 = vpop.permute.xlu1 %3169  ;;  %v7499_v7 = vsel %vm9629_vm6, %v1883_v20, %v2390_v56  ;;  %v2338_v45 = vsel %vm9644_vm5, %v2335_v54, %v2337_v63  ;;  %v9562_v20 = vrot.slane %v7455_v1, 2 }
 0x2f3   : > { %9800 = vst [vmem:[#allocation116_spill] sm:$0xff] %v7482_v51  ;;  %9804 = vst [vmem:[#allocation120_spill] sm:$0xff] %v7499_v7  ;;  %v3122_v51 = vrot.slane %v7436_v6, 3 }
 0x2f4   : > { %v7484_v22 = vpop.permute.xlu0 %1907  ;;  %3086 = vrot.lane.b32.xlu1 %v2336_v5, %s9678_s15 }
 0x2f5   : > { %9801 = vst [vmem:[#allocation117_spill] sm:$0xff] %v7484_v22 }
 0x2f6   : > { %2264 = vrot.lane.b32.xlu0 %v7489_v8, %s9691_s30  ;;  %v7494_v31 = vpop.permute.xlu1 %2168  ;;  %v3123_v8 = vsel %vm9647_vm7, %v1970_v59, %v3122_v51  ;;  %v7528_v59 = vsel %vm9629_vm6, %v2390_v56, %v9562_v20 }
 0x2f7   : > { %9803 = vst [vmem:[#allocation119_spill] sm:$0xff] %v7494_v31  ;;  %v2535_v31 = vrot.slane %v7455_v1, 5  ;;  %9809 = vst [vmem:[#allocation125_spill] sm:$0xff] %v7528_v59 }
 0x2f8   : > { %v7496_v57 = vpop.permute.xlu0 %1994  ;;  %3104 = vrot.lane.b32.xlu1 %v7499_v7, %s9681_s16 }
 0x2f9   : > { %v7520_v54 = vsel %vm9631_vm9, %v2533_v18, %v2535_v31 }
 0x2fa   : > { %2371 = vrot.lane.b32.xlu0 %v2338_v45, %s9671_s22  ;;  %v7506_v5 = vpop.permute.xlu1 %2254  ;;  %9808 = vst [vmem:[#allocation124_spill] sm:$0xff] %v7520_v54 }
 0x2fb   : > { %9805 = vst [vmem:[#allocation121_spill] sm:$0xff] %v7506_v5  ;;  %v2590_v5 = vrot.slane %v7455_v1, 6 }
 0x2fc   : > { %v7508_v22 = vpop.permute.xlu0 %2359  ;;  %3132 = vrot.lane.b32.xlu1 %v3123_v8, %s9693_s13  ;;  %v3124_v8 = vrot.slane %v7455_v1, 3 }
 0x2fd   : > { %9806 = vst [vmem:[#allocation122_spill] sm:$0xff] %v7508_v22  ;;  %v7538_v18 = vsel %vm9637_vm8, %v2144_v37, %v2590_v5  ;;  %v2645_v22 = vrot.slane %v7455_v1, 7 }
 0x2fe   : > { %3088 = vrot.lane.b32.xlu0 %v2338_v45, %s9678_s15  ;;  %v7515_v6 = vpop.permute.xlu1 %5522  ;;  %9811 = vst [vmem:[#allocation127_spill] sm:$0xff] %v7538_v18  ;;  %v3125_v56 = vsel %vm9647_vm7, %v3122_v51, %v3124_v8 }
 0x2ff   : > { %9807 = vst [vmem:[#allocation123_spill] sm:$0xff] %v7515_v6  ;;  %v7556_v37 = vsel %vm9632_vm0, %v2230_v38, %v2645_v22 }
 0x300   : > { %v7517_v7 = vpop.permute.xlu0 %1822  ;;  %3181 = vrot.lane.b32.xlu1 %v7520_v54, %s9687_s24  ;;  %v7542_v54 = vmul.f32 0.25, %v6622_v10  ;;  %9813 = vst [vmem:[#allocation129_spill] sm:$0xff] %v7556_v37 }
 0x302   : > { %3106 = vrot.lane.b32.xlu0 %v7528_v59, %s9681_s16  ;;  %v7533_v45 = vpop.permute.xlu1 %5527  ;;  %v9570_v10 = vrot.slane %v7542_v54, 5  ;;  %v9574_v38 = vrot.slane %v7542_v54, 6 }
 0x303   : > { %9810 = vst [vmem:[#allocation126_spill] sm:$0xff] %v7533_v45  ;;  %v7551_v45 = vmul.f32 0.25, %v6625_v4 }
 0x304   : > { %v7535_v6 = vpop.permute.xlu0 %1909  ;;  %3222 = vrot.lane.b32.xlu1 %v7538_v18, %s9713_s19  ;;  %v7572_v4 = vsel %vm9631_vm9, %v2535_v31, %v9570_v10  ;;  %v7590_v31 = vsel %vm9637_vm8, %v2590_v5, %v9574_v38  ;;  %v9584_v10 = vrot.slane %v7542_v54, 3 }
 0x305   : > { %9816 = vst [vmem:[#allocation132_spill] sm:$0xff] %v7572_v4  ;;  %9819 = vst [vmem:[#allocation135_spill] sm:$0xff] %v7590_v31  ;;  %v9586_v38 = vrot.slane %v7551_v45, 1 }
 0x306   : > { %3134 = vrot.lane.b32.xlu0 %v3125_v56, %s9693_s13  ;;  %v7548_v20 = vpop.permute.xlu1 %5537  ;;  %v3127_v5 = vsel %vm9647_vm7, %v3124_v8, %v9584_v10  ;;  %v9587_v10 = vmov 0.0|0.0  }
 0x307   : > { %9812 = vst [vmem:[#allocation128_spill] sm:$0xff] %v7548_v20  ;;  %v7578_v20 = vmul.f32 0.25, %v6636_v11  ;;  %5077 = vmatprep.subr.bf16.mxu1 %v9587_v10  ;;  %5187 = vmatprep.subr.bf16.mxu0 %v9587_v10 }
 0x308   : > { %v7553_v59 = vpop.permute.xlu0 %1996  ;;  %3251 = vrot.lane.b32.xlu1 %v7556_v37, %s9691_s30 }
 0x30a   : > { %3274 = vrot.lane.b32.xlu0 %v7551_v45, %s9706_s26  ;;  %v7563_v51 = vpop.permute.xlu1 %5547 }
 0x30b   : > { %9814 = vst [vmem:[#allocation130_spill] sm:$0xff] %v7563_v51 }
 0x30c   : > { %v7565_v56 = vpop.permute.xlu0 %5532  ;;  %3272 = vrot.lane.b32.xlu1 %v7542_v54, %s9706_s26 }
 0x30d   : > { %9815 = vst [vmem:[#allocation131_spill] sm:$0xff] %v7565_v56  ;;  %v3080_v56 = vrot.slane %v7542_v54, 1 }
 0x30e   : > { %3183 = vrot.lane.b32.xlu0 %v7572_v4, %s9687_s24  ;;  %v7580_v37 = vpop.permute.xlu1 %5552  ;;  %v2647_v4 = vrot.slane %v7542_v54, 7 }
 0x30f   : > { %9817 = vst [vmem:[#allocation133_spill] sm:$0xff] %v7580_v37  ;;  %v3083_v8 = vsel %vm9644_vm5, %v3080_v56, %v9586_v38 }
 0x310   : > { %v7582_v51 = vpop.permute.xlu0 %5542  ;;  %3280 = vrot.lane.b32.xlu1 %v7578_v20, %s9706_s26 }
 0x311   : > { %9818 = vst [vmem:[#allocation134_spill] sm:$0xff] %v7582_v51  ;;  %v3081_v51 = vsel %vm9644_vm5, %v2337_v63, %v3080_v56  ;;  %v3540_v63 = vld [vmem:[%s9403_s3] sm:$0xff] }
 0x312   : > { %3224 = vrot.lane.b32.xlu0 %v7590_v31, %s9713_s19  ;;  %v7595_v11 = vpop.permute.xlu1 %2307 }
 0x313   : > { %9820 = vst [vmem:[#allocation136_spill] sm:$0xff] %v7595_v11  ;;  %v7612_v11 = vsel %vm9632_vm0, %v2645_v22, %v2647_v4 }
 0x314   : > { %v7597_v37 = vpop.permute.xlu0 %2361  ;;  %3292 = vrot.lane.b32.xlu1 %v3081_v51, %s9671_s22  ;;  %9824 = vst [vmem:[#allocation140_spill] sm:$0xff] %v7612_v11 }
 0x315   : > { %9821 = vst [vmem:[#allocation137_spill] sm:$0xff] %v7597_v37  ;;  %v3541_v37 = vld [vmem:[%s9403_s3 + $0x8] sm:$0xff] }
 0x316   : > { %3136 = vrot.lane.b32.xlu0 %v3127_v5, %s9693_s13  ;;  %v7607_v18 = vpop.permute.xlu1 %2309  ;;  %v9589_v5 = vrot.slane %v7551_v45, 7  ;;  %v5078_v22 = vpack.c.bf16 %v3541_v37, %v3540_v63  ;;  %v3542_v37 = vld [vmem:[%s9403_s3 + $0x10] sm:$0xff]  ;;  %v3543_v63 = vld [vmem:[%s9403_s3 + $0x18] sm:$0xff] }
 0x317   : > { %9822 = vst [vmem:[#allocation138_spill] sm:$0xff] %v7607_v18 }
 0x318   : > { %v7609_v31 = vpop.permute.xlu0 %1824  ;;  %3253 = vrot.lane.b32.xlu1 %v7612_v11, %s9691_s30  ;;  %5079 = vmatpush1.bf16.msra.mxu1 %v5078_v22  ;;  %v3242_v56 = vsel %vm9632_vm0, %v2647_v4, %v9589_v5  ;;  %v5081_v22 = vpack.c.bf16 %v3543_v63, %v3542_v37  ;;  %v2753_v4 = vrot.slane %v7542_v54, 2  ;;  %v9829_v5 = vmov 0.0|0.0   ;;  %v3544_v11 = vld [vmem:[%s9403_s3 + $0x20] sm:$0xff] }
 0x319   : > { %9823 = vst [vmem:[#allocation139_spill] sm:$0xff] %v7609_v31  ;;  %5080 = vmatprep.subr.bf16.mxu1 %v9587_v10  ;;  %v7648_v10 = vmul.f32 0.25, %v6641_v12  ;;  %v7666_v63 = vmul.f32 0.25, %v6644_v48 }
 0x31a   : > { %3092 = vrot.lane.b32.xlu0 %v3083_v8, %s9678_s15  ;;  %v7629_v18 = vpop.permute.xlu1 %3171 }
 0x31b   : > { %9825 = vst [vmem:[#allocation141_spill] sm:$0xff] %v7629_v18  ;;  %v3552_v18 = vld [vmem:[%s9403_s3 + $0x60] sm:$0xff] }
 0x31c   : > { %v7631_v31 = vpop.permute.xlu0 %1911  ;;  %3294 = vrot.lane.b32.xlu1 %v3083_v8, %s9671_s22  ;;  %5082 = vmatpush1.bf16.msra.mxu1 %v5081_v22  ;;  %v9832_v22 = vrot.slane %v7455_v1, 2 }
 0x31d   : > { %9826 = vst [vmem:[#allocation142_spill] sm:$0xff] %v7631_v31  ;;  %5083 = vmatprep.subr.bf16.mxu1 %v9829_v5  ;;  %v9596_v31 = vrot.slane %v7551_v45, 5 }
 0x31e   : > { %3255 = vrot.lane.b32.xlu0 %v3242_v56, %s9691_s30  ;;  %v7645_v38 = vpop.permute.xlu1 %2170  ;;  %v3545_v56 = vld [vmem:[%s9403_s3 + $0x28] sm:$0xff] }
 0x31f   : > { %9827 = vst [vmem:[#allocation143_spill] sm:$0xff] %v7645_v38  ;;  %v5084_v12 = vpack.c.bf16 %v3545_v56, %v3544_v11  ;;  %v3546_v38 = vld [vmem:[%s9403_s3 + $0x30] sm:$0xff]  ;;  %v3547_v11 = vld [vmem:[%s9403_s3 + $0x38] sm:$0xff] }
 0x320   : > { %v7650_v8 = vpop.permute.xlu0 %1998  ;;  %3090 = vrot.lane.b32.xlu1 %v3081_v51, %s9678_s15  ;;  %v5087_v48 = vpack.c.bf16 %v3547_v11, %v3546_v38  ;;  %v3548_v38 = vld [vmem:[%s9403_s3 + $0x40] sm:$0xff]  ;;  %v3549_v11 = vld [vmem:[%s9403_s3 + $0x48] sm:$0xff] }
 0x321   : > { %9828 = vst [vmem:[#allocation144_spill] sm:$0xff] %v7650_v8  ;;  %v7673_v8 = vsel %vm9629_vm6, %v9832_v22, %v2753_v4  ;;  %5085 = vmatpush1.bf16.msra.mxu1 %v5084_v12  ;;  %v9836_v22 = vrot.slane %v7542_v54, 5 }
 0x322   : > { %3276 = vrot.lane.b32.xlu0 %v7648_v10, %s9706_s26  ;;  %v7663_v37 = vpop.permute.xlu1 %2256  ;;  %9833 = vst [vmem:[#allocation147_spill] sm:$0xff] %v7673_v8  ;;  %5086 = vmatprep.subr.bf16.mxu1 %v9829_v5 }
 0x323   : > { %9830 = vst [vmem:[#allocation145_spill] sm:$0xff] %v7663_v37  ;;  %v3152_v1 = vsel %vm9631_vm9, %v9836_v22, %v9596_v31  ;;  %v5090_v31 = vpack.c.bf16 %v3549_v11, %v3548_v38  ;;  %v2755_v37 = vrot.slane %v7551_v45, 2  ;;  %v3551_v38 = vld [vmem:[%s9403_s3 + $0x58] sm:$0xff] }
 0x324   : > { %v7668_v51 = vpop.permute.xlu0 %2363  ;;  %3108 = vrot.lane.b32.xlu1 %v7673_v8, %s9681_s16 }
 0x325   : > { %9831 = vst [vmem:[#allocation146_spill] sm:$0xff] %v7668_v51  ;;  %v7697_v51 = vrot.slane %v7648_v10, 1  ;;  %5088 = vmatpush1.bf16.msra.mxu1 %v5087_v48  ;;  %v9840_v48 = vrot.slane %v7542_v54, 6 }
 0x326   : > { %3278 = vrot.lane.b32.xlu0 %v7666_v63, %s9706_s26  ;;  %v7687_v56 = vpop.permute.xlu1 %3173  ;;  %5089 = vmatprep.subr.bf16.mxu1 %v9829_v5 }
 0x327   : > { %9834 = vst [vmem:[#allocation148_spill] sm:$0xff] %v7687_v56 }
 0x328   : > { %v7689_v12 = vpop.permute.xlu0 %1826  ;;  %3185 = vrot.lane.b32.xlu1 %v3152_v1, %s9687_s24  ;;  %v9839_v1 = vrot.slane %v7551_v45, 6 }
 0x329   : > { %9835 = vst [vmem:[#allocation149_spill] sm:$0xff] %v7689_v12  ;;  %v2757_v12 = vrot.slane %v7648_v10, 2  ;;  %5091 = vmatpush1.bf16.msra.mxu1 %v5090_v31  ;;  %v9601_v31 = vrot.slane %v7666_v63, 5 }
 0x32a   : > { %3096 = vrot.lane.b32.xlu0 %v7697_v51, %s9678_s15  ;;  %v7710_v22 = vpop.permute.xlu1 %2172  ;;  %v3213_v56 = vsel %vm9637_vm8, %v9840_v48, %v9839_v1  ;;  %5092 = vmatprep.subr.bf16.mxu1 %v9829_v5 }
 0x32b   : > { %9837 = vst [vmem:[#allocation150_spill] sm:$0xff] %v7710_v22  ;;  %v3550_v22 = vld [vmem:[%s9403_s3 + $0x50] sm:$0xff] }
 0x32c   : > { %v7712_v8 = vpop.permute.xlu0 %1913  ;;  %3226 = vrot.lane.b32.xlu1 %v3213_v56, %s9713_s19  ;;  %v5093_v11 = vpack.c.bf16 %v3551_v38, %v3550_v22  ;;  %v7735_v56 = vsel %vm9629_vm6, %v2753_v4, %v2755_v37  ;;  %v3553_v22 = vld [vmem:[%s9403_s3 + $0x68] sm:$0xff]  ;;  %v2816_v38 = vsel %vm2810_vm10, %v6488_v36, %v7053_v33  ;;  %v2817_v36 = vsel %vm2810_vm10, %v6692_v30, %v7068_v15 }
 0x32d   : > { %9838 = vst [vmem:[#allocation151_spill] sm:$0xff] %v7712_v8  ;;  %9843 = vst [vmem:[#allocation154_spill] sm:$0xff] %v7735_v56  ;;  %v5096_v4 = vpack.c.bf16 %v3553_v22, %v3552_v18  ;;  %v3555_v18 = vld [vmem:[%s9403_s3 + $0x78] sm:$0xff]  ;;  %v9848_v33 = vrot.slane %v7551_v45, 1  ;;  %v2834_v22 = vsel %vm2828_vm11, %v2816_v38, %v7039_v35  ;;  %v3556_v35 = vld [vmem:[%s9403_s3 + $0x80] sm:$0xff] }
 0x32e   : > { %3114 = vrot.lane.b32.xlu0 %v2757_v12, %s9681_s16  ;;  %v7730_v1 = vpop.permute.xlu1 %2258  ;;  %5094 = vmatpush1.bf16.msra.mxu1 %v5093_v11  ;;  %v7783_v30 = vsel %vm2846_vm12, %v2834_v22, %v7079_v53  ;;  %v3557_v53 = vld [vmem:[%s9403_s3 + $0x88] sm:$0xff]  ;;  %v3153_v22 = vrot.slane %v7648_v10, 5 }
 0x32f   : > { %9841 = vst [vmem:[#allocation152_spill] sm:$0xff] %v7730_v1  ;;  %5095 = vmatprep.subr.bf16.mxu1 %v9829_v5  ;;  %v9847_v1 = vrot.slane %v7542_v54, 3  ;;  %v5102_v38 = vpack.c.bf16 %v3557_v53, %v3556_v35  ;;  %v2818_v35 = vsel %vm2810_vm10, %v6689_v44, %v7180_v32  ;;  %v3558_v44 = vld [vmem:[%s9403_s3 + $0x90] sm:$0x3f]  ;;  %v9607_v53 = vrot.slane %v7666_v63, 6 }
 0x330   : > { %v7732_v48 = vpop.permute.xlu0 %2000  ;;  %3110 = vrot.lane.b32.xlu1 %v7735_v56, %s9681_s16  ;;  %v9846_v56 = vrot.slane %v7551_v45, 3 }
 0x331   : > { %9842 = vst [vmem:[#allocation153_spill] sm:$0xff] %v7732_v48 }
 0x332   : > { %3191 = vrot.lane.b32.xlu0 %v9601_v31, %s9687_s24  ;;  %v7754_v11 = vpop.permute.xlu1 %5557  ;;  %v3129_v48 = vsel %vm9647_vm7, %v9847_v1, %v9846_v56  ;;  %v3554_v31 = vld [vmem:[%s9403_s3 + $0x70] sm:$0xff]  ;;  %v3085_v1 = vsel %vm9644_vm5, %v9848_v33, %v7697_v51  ;;  %5097 = vmatpush1.bf16.msra.mxu1 %v5096_v4  ;;  %v2835_v4 = vsel %vm2828_vm11, %v2817_v36, %v7051_v42  ;;  %v9605_v33 = vrot.slane %v7648_v10, 3 }
 0x333   : > { %9844 = vst [vmem:[#allocation155_spill] sm:$0xff] %v7754_v11  ;;  %v5099_v56 = vpack.c.bf16 %v3555_v18, %v3554_v31  ;;  %5098 = vmatprep.subr.bf16.mxu1 %v9829_v5  ;;  %v3328_v42 = vsel %vm2864_vm13, %v7783_v30, %v7025_v55  ;;  %v7808_v18 = vsel %vm2846_vm12, %v2835_v4, %v7066_v49 }
 0x334   : > { %v7756_v8 = vpop.permute.xlu0 %5567  ;;  %3138 = vrot.lane.b32.xlu1 %v3129_v48, %s9693_s13  ;;  %v9604_v48 = vrot.slane %v7578_v20, 1  ;;  %v3346_v49 = vsel %vm2882_vm14, %v3328_v42, %v7042_v39  ;;  %v9602_v39 = vmov 0.0  }
 0x335   : > { %9845 = vst [vmem:[#allocation156_spill] sm:$0xff] %v7756_v8  ;;  %v3364_v42 = vsel %vm9649_vm15, %v3346_v49, %v7023_v13 }
 0x336   : > { %3296 = vrot.lane.b32.xlu0 %v3085_v1, %s9671_s22  ;;  %v7785_v15 = vpop.permute.xlu1 %5562  ;;  %5100 = vmatpush1.bf16.msra.mxu1 %v5099_v56  ;;  %v3329_v56 = vsel %vm2864_vm13, %v7808_v18, %v7162_v46  ;;  %v2836_v46 = vsel %vm2828_vm11, %v2818_v35, %v7185_v26  ;;  %v9606_v26 = vrot.slane %v7648_v10, 6  ;;  %v9854_v35 = vrot.slane %v7666_v63, 5 }
 0x337   : > { %9849 = vst [vmem:[#allocation157_spill] sm:$0xff] %v7785_v15  ;;  %5101 = vmatprep.subr.bf16.mxu1 %v9829_v5  ;;  %v3347_v4 = vsel %vm2882_vm14, %v3329_v56, %v7178_v52  ;;  %v7844_v32 = vsel %vm2846_vm12, %v2836_v46, %v7197_v24  ;;  %v9874_v15 = vld [vmem:[#allocation86_spill] sm:$0xff] }
 0x338   : > { %v7790_v31 = vpop.permute.xlu0 %5577  ;;  %3302 = vrot.lane.b32.xlu1 %v9604_v48, %s9671_s22  ;;  %v3156_v46 = vsel %vm9631_vm9, %v3153_v22, %v9854_v35 }
 0x339   : > { %9850 = vst [vmem:[#allocation158_spill] sm:$0xff] %v7790_v31 }
 0x33a   : > { %3094 = vrot.lane.b32.xlu0 %v3085_v1, %s9678_s15  ;;  %v7810_v36 = vpop.permute.xlu1 %5572  ;;  %v7819_v1 = vsel %vm9629_vm6, %v2755_v37, %v2757_v12  ;;  %5103 = vmatpush1.bf16.msra.mxu1 %v5102_v38  ;;  %v3365_v37 = vsel %vm9649_vm15, %v3347_v4, %v7187_v28  ;;  %v3330_v38 = vsel %vm2864_vm13, %v7844_v32, %v7210_v40  ;;  %v9853_v4 = vrot.slane %v7551_v45, 5 }
 0x33b   : > { %9851 = vst [vmem:[#allocation159_spill] sm:$0xff] %v7810_v36  ;;  %3640 = vmatprep.subr.mxu1 %v9602_v39  ;;  %v3383_v39 = vsel %vm2918_vm1, %v3365_v37, %v7150_v25  ;;  %v3348_v13 = vsel %vm2882_vm14, %v3330_v38, %v7217_v27  ;;  %v2819_v40 = vsel %vm2810_vm10, %v6782_v16, %v7220_v3  ;;  %v3218_v38 = vrot.slane %v7578_v20, 6 }
 0x33c   : > { %v7816_v55 = vpop.permute.xlu0 %2365  ;;  %3142 = vrot.lane.b32.xlu1 %v9605_v33, %s9693_s13  ;;  %v3154_v24 = vsel %vm9631_vm9, %v9853_v4, %v3153_v22  ;;  %v3401_v49 = vsel %vm2936_vm2, %v3383_v39, %v7212_v14  ;;  %v3366_v22 = vsel %vm9649_vm15, %v3348_v13, %v7225_v2  ;;  %v2837_v37 = vsel %vm2828_vm11, %v2819_v40, %v7227_v9  ;;  %v9857_v13 = vld [vmem:[#allocation63_spill] sm:$0xff]  ;;  %v9860_v33 = vld [vmem:[#allocation78_spill] sm:$0xff]  ;;  %v9927_v14 = vld [vmem:[#allocation153_spill] sm:$0xff] }
 0x33d   : > { %v3382_v16 = vsel %vm2918_vm1, %v3364_v42, %v6999_v34  ;;  %v7884_v3 = vsel %vm2846_vm12, %v2837_v37, %v7235_v19  ;;  %v3243_v39 = vrot.slane %v7648_v10, 7  ;;  %v9856_v42 = vrot.slane %v7551_v45, 6  ;;  %v9858_v37 = vld [vmem:[#allocation81_spill] sm:$0xff] }
 0x33e   : > { %3112 = vrot.lane.b32.xlu0 %v7819_v1, %s9681_s16  ;;  %v7846_v12 = vpop.permute.xlu1 %2311  ;;  %4649 = vmatpush1.msk.msra.mxu1 %vm9629_vm6, %v3558_v44  ;;  %v3400_v4 = vsel %vm2936_vm2, %v3382_v16, %v7195_v17  ;;  %v3331_v9 = vsel %vm2864_vm13, %v7884_v3, %v7310_v60  ;;  %v3219_v35 = vsel %vm9637_vm8, %v9607_v53, %v3218_v38  ;;  %v9859_v16 = vld [vmem:[#allocation16_spill] sm:$0xff]  ;;  %s5794_s16 = smov 96   ;;  %vm9650_vm6 = vcmask 490496  }
 0x33f   : > { %9852 = vst [vmem:[#allocation160_spill] sm:$0xff] %v7846_v12  ;;  %v3215_v19 = vsel %vm9637_vm8, %v9856_v42, %v9606_v26  ;;  %v3384_v40 = vsel %vm2918_vm1, %v3366_v22, %v9857_v13  ;;  %v2820_v60 = vsel %vm2810_vm10, %v9859_v16, %v9858_v37  ;;  %v3349_v48 = vsel %vm2882_vm14, %v3331_v9, %v7327_v43  ;;  %v9863_v16 = vld [vmem:[#allocation75_spill] sm:$0xff] }
 0x340   : > { %v7855_v56 = vpop.permute.xlu0 %1828  ;;  %3187 = vrot.lane.b32.xlu1 %v3154_v24, %s9687_s24  ;;  %v3402_v42 = vsel %vm2936_vm2, %v3384_v40, %v9860_v33  ;;  %v2838_v26 = vsel %vm2828_vm11, %v2820_v60, %v7329_v62  ;;  %v3436_v22 = vrot.slane %v3400_v4, 3  ;;  %v9862_v62 = vrot.slane %v7551_v45, 7  ;;  %v9911_v33 = vld [vmem:[#allocation103_spill] sm:$0xff] }
 0x341   : > { %v7921_v38 = vsel %vm2846_vm12, %v2838_v26, %v7337_v29  ;;  %vm3008_vm9 = vcmask 588800  }
 0x342   : > { %3189 = vrot.lane.b32.xlu0 %v3156_v46, %s9687_s24  ;;  %v7886_v44 = vpop.permute.xlu1 %2313  ;;  %v3437_v46 = vrot.slane %v3401_v49, 3  ;;  %v3367_v49 = vsel %vm9649_vm15, %v3349_v48, %v7335_v61  ;;  %9861 = vst [vmem:[#allocation81_spill] sm:$0xff] %v7921_v38  ;;  %v3332_v9 = vsel %vm2864_vm13, %v7921_v38, %v7343_v58  ;;  %v3244_v40 = vsel %vm9632_vm0, %v9862_v62, %v3243_v39  ;;  %v9898_v38 = vld [vmem:[#allocation99_spill] sm:$0xff] }
 0x343   : > { %9855 = vst [vmem:[#allocation161_spill] sm:$0xff] %v7886_v44  ;;  %v3439_v48 = vrot.slane %v3402_v42, 3  ;;  %v3385_v4 = vsel %vm2918_vm1, %v3367_v49, %v9863_v16  ;;  %v3350_v29 = vsel %vm2882_vm14, %v3332_v9, %v7350_v23  ;;  %v9866_v49 = vrot.slane %v7648_v10, 3  ;;  %v9893_v16 = vld [vmem:[#allocation113_spill] sm:$0xff] }
 0x344   : > { %v7894_v24 = vpop.permute.xlu0 %1915  ;;  %3228 = vrot.lane.b32.xlu1 %v3215_v19, %s9713_s19  ;;  %v3438_v26 = vsel %vm9647_vm7, %v3436_v22, %v3437_v46  ;;  %v3403_v58 = vsel %vm2936_vm2, %v3385_v4, %v7345_v0  ;;  %v9867_v9 = vrot.slane %v7551_v45, 3  ;;  %v3288_v22 = vrot.slane %v7666_v63, 1  ;;  %v9868_v4 = vld [vmem:[#allocation77_spill] sm:$0xff]  ;;  %v9889_v0 = vld [vmem:[#allocation116_spill] sm:$0xff] }
 0x345   : > { %v9897_v23 = vld [vmem:[#allocation105_spill] sm:$0xff] }
 0x346   : > { %3232 = vrot.lane.b32.xlu0 %v3219_v35, %s9713_s19  ;;  %v7923_v37 = vpop.permute.xlu1 %3175  ;;  %v3368_v35 = vsel %vm9649_vm15, %v3350_v29, %v7361_v21  ;;  %v3131_v62 = vsel %vm9647_vm7, %v9867_v9, %v9866_v49  ;;  %v3440_v29 = vsel %vm9647_vm7, %v3437_v46, %v3439_v48  ;;  %v9870_v9 = vrot.slane %v7666_v63, 6 }
 0x347   : > { %v3386_v53 = vsel %vm2918_vm1, %v3368_v35, %v9868_v4  ;;  %v9879_v4 = vld [vmem:[#allocation88_spill] sm:$0xff] }
 0x348   : > { %v7928_v19 = vpop.permute.xlu0 %2002  ;;  %3257 = vrot.lane.b32.xlu1 %v3244_v40, %s9691_s30  ;;  %v3441_v40 = vrot.slane %v3403_v58, 3  ;;  %v3289_v58 = vsel %vm9644_vm5, %v7697_v51, %v3288_v22  ;;  %v3245_v51 = vrot.slane %v7666_v63, 7 }
 0x34a   : > { %3471 = vrot.lane.b32.xlu0 %v3438_v26, %s5794_s16  ;;  %v7944_v60 = vpop.permute.xlu1 %2174  ;;  %v7960_v26 = vsel %vm2936_vm2, %v3386_v53, %v7459_v50  ;;  %v3442_v35 = vsel %vm9647_vm7, %v3439_v48, %v3441_v40 }
 0x34b   : > { %9864 = vst [vmem:[#allocation16_spill] sm:$0xff] %v7944_v60  ;;  %v9614_v49 = vrot.slane %v7960_v26, 3 }
 0x34c   : > { %v7946_v42 = vpop.permute.xlu0 %2367  ;;  %3140 = vrot.lane.b32.xlu1 %v3131_v62, %s9693_s13  ;;  %v9871_v62 = vrot.slane %v7648_v10, 6 }
 0x34d   : > { %9865 = vst [vmem:[#allocation162_spill] sm:$0xff] %v7946_v42  ;;  %v3444_v48 = vsel %vm9647_vm7, %v3441_v40, %v9614_v49  ;;  %v3246_v40 = vsel %vm9632_vm0, %v3243_v39, %v3245_v51  ;;  %v9877_v49 = vld [vmem:[#allocation17_spill] sm:$0xff]  ;;  %v9884_v39 = vld [vmem:[#allocation91_spill] sm:$0xff] }
 0x34e   : > { %3473 = vrot.lane.b32.xlu0 %v3440_v29, %s5794_s16  ;;  %v7963_v5 = vpop.permute.xlu1 %2260  ;;  %v3217_v29 = vsel %vm9637_vm8, %v9871_v62, %v9870_v9  ;;  %v9875_v9 = vld [vmem:[#allocation35_spill] sm:$0xff]  ;;  %v9876_v62 = vld [vmem:[#allocation117_spill] sm:$0xff]  ;;  %vm9648_vm8 = vcmask 687104  }
 0x34f   : > { %9869 = vst [vmem:[#allocation163_spill] sm:$0xff] %v7963_v5  ;;  %v2821_v63 = vsel %vm2810_vm10, %v9875_v9, %v9874_v15  ;;  %v9881_v15 = vrot.slane %v7359_v47, 4 }
 0x350   : > { %v7965_v8 = vpop.permute.xlu0 %1830  ;;  %3298 = vrot.lane.b32.xlu1 %v3289_v58, %s9671_s22  ;;  %v9878_v58 = vld [vmem:[#allocation18_spill] sm:$0xff]  ;;  %v2839_v31 = vsel %vm2828_vm11, %v2821_v63, %v9879_v4  ;;  %v9886_v4 = vld [vmem:[#allocation107_spill] sm:$0xff] }
 0x352   : > { %3475 = vrot.lane.b32.xlu0 %v3442_v35, %s5794_s16  ;;  %v7973_v46 = vpop.permute.xlu1 %3177  ;;  %v9872_v35 = vld [vmem:[#allocation36_spill] sm:$0xff] }
 0x353   : > { %v2822_v36 = vsel %vm2810_vm10, %v9872_v35, %v7469_v41  ;;  %v9882_v35 = vld [vmem:[#allocation19_spill] sm:$0xff] }
 0x354   : > { %v7975_v53 = vpop.permute.xlu0 %1917  ;;  %3230 = vrot.lane.b32.xlu1 %v3217_v29, %s9713_s19  ;;  %v2840_v29 = vsel %vm2828_vm11, %v2822_v36, %v9876_v62  ;;  %v9883_v36 = vrot.slane %v9882_v35, 4  ;;  %v8020_v62 = vsel %vm2846_vm12, %v2839_v31, %v9884_v39  ;;  %v9891_v31 = vrot.slane %v7578_v20, 1 }
 0x355   : > { %v8008_v41 = vsel %vm2846_vm12, %v2840_v29, %v7496_v57  ;;  %9885 = vst [vmem:[#allocation35_spill] sm:$0xff] %v8020_v62  ;;  %v3333_v57 = vsel %vm2864_vm13, %v8020_v62, %v9886_v4  ;;  %v9888_v29 = vld [vmem:[#allocation111_spill] sm:$0xff] }
 0x356   : > { %3477 = vrot.lane.b32.xlu0 %v3444_v48, %s5794_s16  ;;  %v7992_v11 = vpop.permute.xlu1 %2176  ;;  %v5591_v48 = vpack.i.bf16 %v9878_v58, %v9877_v49  ;;  %9880 = vst [vmem:[#allocation86_spill] sm:$0xff] %v8008_v41  ;;  %v8016_v9 = vsel %vm9630_vm4, %v9883_v36, %v9881_v15  ;;  %v3334_v15 = vsel %vm2864_vm13, %v8008_v41, %v9889_v0  ;;  %v9895_v41 = vld [vmem:[#allocation50_spill] sm:$0xff] }
 0x357   : > { %9873 = vst [vmem:[#allocation36_spill] sm:$0xff] %v7992_v11  ;;  %v3291_v39 = vsel %vm9644_vm5, %v3288_v22, %v9891_v31  ;;  %v2823_v62 = vsel %vm2810_vm10, %v9895_v41, %v7517_v7  ;;  %v9896_v31 = vld [vmem:[#allocation95_spill] sm:$0xff]  ;;  %vm3062_vm5 = vcmask 736256  }
 0x358   : > { %v7999_v50 = vpop.permute.xlu0 %2004  ;;  %3259 = vrot.lane.b32.xlu1 %v3246_v40, %s9691_s30  ;;  %v3351_v40 = vsel %vm2882_vm14, %v3333_v57, %v9888_v29  ;;  %v3247_v57 = vrot.slane %v7578_v20, 7  ;;  %v9894_v29 = vld [vmem:[#allocation119_spill] sm:$0xff]  ;;  %v5616_v61 = vpack.i.bf16 %v9897_v23, %v9896_v31  ;;  %v9902_v23 = vld [vmem:[#allocation121_spill] sm:$0xff] }
 0x359   : > { %v3369_v4 = vsel %vm9649_vm15, %v3351_v40, %v9893_v16  ;;  %v3352_v0 = vsel %vm2882_vm14, %v3334_v15, %v9894_v29  ;;  %v9900_v15 = vld [vmem:[#allocation122_spill] sm:$0xff]  ;;  %v9906_v31 = vld [vmem:[#allocation143_spill] sm:$0xff]  ;;  %v9909_v16 = vld [vmem:[#allocation145_spill] sm:$0xff] }
 0x35a   : > { %5592 = vrot.lane.b32.xlu0 %v5591_v48, %s9670_s12  ;;  %v8026_v63 = vpop.permute.xlu1 %2262  ;;  %v9892_v48 = vld [vmem:[#allocation24_spill] sm:$0xff]  ;;  %v3387_v40 = vsel %vm2918_vm1, %v3369_v4, %v9898_v38  ;;  %v3248_v20 = vsel %vm9632_vm0, %v3245_v51, %v3247_v57  ;;  %v3370_v41 = vsel %vm9649_vm15, %v3352_v0, %v9902_v23  ;;  %v9903_v4 = vld [vmem:[#allocation141_spill] sm:$0xff]  ;;  %v9905_v51 = vld [vmem:[#allocation79_spill] sm:$0xff]  ;;  %vm3026_vm0 = vcmask 637952  }
 0x35b   : > { %9887 = vst [vmem:[#allocation117_spill] sm:$0xff] %v8026_v63  ;;  %v5606_v21 = vpack.i.bf16 %v8016_v9, %v9892_v48  ;;  %v3405_v29 = vsel %vm2936_vm2, %v3387_v40, %v9900_v15 }
 0x35c   : > { %v8033_v36 = vpop.permute.xlu0 %2315  ;;  %3300 = vrot.lane.b32.xlu1 %v3291_v39, %s9671_s22 }
 0x35d   : > { %9890 = vst [vmem:[#allocation17_spill] sm:$0xff] %v8033_v36 }
 0x35e   : > { %5607 = vrot.lane.b32.xlu0 %v5606_v21, %s9700_s2  ;;  %v8050_v22 = vpop.permute.xlu1 %3270  ;;  %v2841_v21 = vsel %vm2828_vm11, %v2823_v62, %v7535_v6  ;;  %v9904_v62 = vld [vmem:[#allocation71_spill] sm:$0xff] }
 0x35f   : > { %v8065_v7 = vsel %vm2846_vm12, %v2841_v21, %v7553_v59  ;;  %v5581_v57 = vpack.i.bf16 %v9905_v51, %v9904_v62  ;;  %v9907_v59 = vld [vmem:[#allocation98_spill] sm:$0xff]  ;;  %v9908_v21 = vld [vmem:[#allocation109_spill] sm:$0xff] }
 0x360   : > { %v8058_v39 = vpop.permute.xlu0 %2369  ;;  %9901 = vst [vmem:[#allocation88_spill] sm:$0xff] %v8065_v7  ;;  %3261 = vrot.lane.b32.xlu1 %v3248_v20, %s9691_s30  ;;  %v3335_v6 = vsel %vm2864_vm13, %v8065_v7, %v9903_v4  ;;  %v5621_v38 = vpack.i.bf16 %v9908_v21, %v9907_v59  ;;  %v3445_v20 = vrot.slane %v3405_v29, 3  ;;  %v3388_v4 = vsel %vm2918_vm1, %v3370_v41, %v9911_v33  ;;  %v9913_v7 = vld [vmem:[#allocation52_spill] sm:$0xff] }
 0x361   : > { %9899 = vst [vmem:[#allocation18_spill] sm:$0xff] %v8058_v39  ;;  %v3353_v40 = vsel %vm2882_vm14, %v3335_v6, %v9906_v31  ;;  %v9914_v6 = vld [vmem:[#allocation137_spill] sm:$0xff]  ;;  %v9915_v31 = vld [vmem:[#allocation142_spill] sm:$0xff]  ;;  %v9918_v21 = vld [vmem:[#allocation136_spill] sm:$0xff] }
 0x362   : > { %5617 = vrot.lane.b32.xlu0 %v5616_v61, %s9698_s1  ;;  %v3180_v15 = vpop.permute.xlu1 %3179  ;;  %v3371_v0 = vsel %vm9649_vm15, %v3353_v40, %v9909_v16  ;;  %v9912_v61 = vld [vmem:[#allocation139_spill] sm:$0xff]  ;;  %v3406_v51 = vsel %vm2936_vm2, %v3388_v4, %v9914_v6  ;;  %v9916_v40 = vld [vmem:[#allocation144_spill] sm:$0xff]  ;;  %v9919_v16 = vld [vmem:[#allocation149_spill] sm:$0xff] }
 0x363   : > { %v2824_v62 = vsel %vm2810_vm10, %v9913_v7, %v9912_v61  ;;  %v3389_v41 = vsel %vm2918_vm1, %v3371_v0, %v9918_v21  ;;  %v2825_v7 = vsel %vm2810_vm10, %v9877_v49, %v9919_v16  ;;  %v9920_v61 = vld [vmem:[#allocation120_spill] sm:$0xff]  ;;  %v9921_v4 = vld [vmem:[#allocation125_spill] sm:$0xff]  ;;  %v9925_v0 = vrot.slane %v7960_v26, 3  ;;  %v9926_v16 = vld [vmem:[#allocation150_spill] sm:$0xff] }
 0x364   : > { %v8082_v23 = vpop.permute.xlu0 %2178  ;;  %5582 = vrot.lane.b32.xlu1 %v5581_v57, %s9698_s1  ;;  %v2842_v29 = vsel %vm2828_vm11, %v2824_v62, %v9915_v31  ;;  %v5631_v6 = vpack.i.bf16 %v9921_v4, %v9920_v61  ;;  %v9922_v33 = vld [vmem:[#allocation148_spill] sm:$0xff]  ;;  %v9923_v31 = vld [vmem:[#allocation151_spill] sm:$0xff]  ;;  %v3447_v21 = vrot.slane %v3406_v51, 3  ;;  %v9930_v51 = vld [vmem:[#allocation74_spill] sm:$0xff] }
 0x365   : > { %9910 = vst [vmem:[#allocation19_spill] sm:$0xff] %v8082_v23  ;;  %v8097_v59 = vsel %vm2846_vm12, %v2842_v29, %v9916_v40  ;;  %v2843_v62 = vsel %vm2828_vm11, %v2825_v7, %v9923_v31  ;;  %v3446_v40 = vsel %vm9647_vm7, %v9925_v0, %v3445_v20  ;;  %v9929_v7 = vld [vmem:[#allocation152_spill] sm:$0xff] }
 0x366   : > { %5622 = vrot.lane.b32.xlu0 %v5621_v38, %s9674_s14  ;;  %9917 = vst [vmem:[#allocation91_spill] sm:$0xff] %v8097_v59  ;;  %v8104_v57 = vpop.permute.xlu1 %3086  ;;  %v3336_v38 = vsel %vm2864_vm13, %v8097_v59, %v9922_v33  ;;  %v8122_v13 = vsel %vm2846_vm12, %v2843_v62, %v9927_v14  ;;  %v9928_v33 = vld [vmem:[#allocation146_spill] sm:$0xff] }
 0x367   : > { %v3354_v49 = vsel %vm2882_vm14, %v3336_v38, %v9926_v16  ;;  %v3407_v59 = vsel %vm2936_vm2, %v3389_v41, %v9928_v33  ;;  %v3337_v26 = vsel %vm2864_vm13, %v8122_v13, %v7923_v37  ;;  %v9931_v38 = vld [vmem:[#allocation82_spill] sm:$0xff]  ;;  %v2826_v37 = vsel %vm2810_vm10, %v9878_v58, %v7855_v56 }
 0x368   : > { %v8113_v29 = vpop.permute.xlu0 %2264  ;;  %3479 = vrot.lane.b32.xlu1 %v3446_v40, %s5794_s16  ;;  %v3372_v31 = vsel %vm9649_vm15, %v3354_v49, %v9929_v7  ;;  %v5586_v0 = vpack.i.bf16 %v9931_v38, %v9930_v51  ;;  %v3355_v14 = vsel %vm2882_vm14, %v3337_v26, %v7944_v60  ;;  %v3449_v33 = vrot.slane %v3407_v59, 3  ;;  %v9933_v49 = vld [vmem:[#allocation138_spill] sm:$0xff]  ;;  %v9934_v59 = vld [vmem:[#allocation89_spill] sm:$0xff] }
 0x369   : > { %9924 = vst [vmem:[#allocation107_spill] sm:$0xff] %v8113_v29  ;;  %v3373_v40 = vsel %vm9649_vm15, %v3355_v14, %v7963_v5  ;;  %v3390_v7 = vsel %vm2918_vm1, %v3372_v31, %v9933_v49  ;;  %v2844_v51 = vsel %vm2828_vm11, %v2826_v37, %v7894_v24  ;;  %v9935_v38 = vld [vmem:[#allocation102_spill] sm:$0xff]  ;;  %v2827_v58 = vsel %vm2810_vm10, %v9882_v35, %v7965_v8 }
 0x36a   : > { %5632 = vrot.lane.b32.xlu0 %v5631_v6, %s9696_s0  ;;  %v3105_v62 = vpop.permute.xlu1 %3104  ;;  %v3448_v6 = vsel %vm9647_vm7, %v3445_v20, %v3447_v21  ;;  %v3408_v26 = vsel %vm2936_vm2, %v3390_v7, %v7816_v55  ;;  %v5596_v14 = vpack.i.bf16 %v9935_v38, %v9934_v59  ;;  %v8157_v31 = vsel %vm2846_vm12, %v2844_v51, %v7928_v19 }
 0x36b   : > { %9936 = vst [vmem:[#allocation24_spill] sm:$0xff] %v8157_v31  ;;  %v3391_v56 = vsel %vm2918_vm1, %v3373_v40, %v7846_v12  ;;  %v3338_v24 = vsel %vm2864_vm13, %v8157_v31, %v7973_v46  ;;  %v2845_v7 = vsel %vm2828_vm11, %v2827_v58, %v7975_v53  ;;  %v3451_v37 = vrot.slane %v3408_v26, 3  ;;  %v9938_v26 = vld [vmem:[#allocation80_spill] sm:$0xff] }
 0x36c   : > { %v8139_v41 = vpop.permute.xlu0 %2371  ;;  %5587 = vrot.lane.b32.xlu1 %v5586_v0, %s9674_s14  ;;  %v3356_v19 = vsel %vm2882_vm14, %v3338_v24, %v7992_v11  ;;  %v8173_v40 = vsel %vm2846_vm12, %v2845_v7, %v7999_v50  ;;  %v3450_v8 = vsel %vm9647_vm7, %v3447_v21, %v3449_v33  ;;  %v5601_v51 = vpack.i.bf16 %v9934_v59, %v9938_v26  ;;  %v9939_v59 = vld [vmem:[#allocation92_spill] sm:$0xff] }
 0x36d   : > { %9932 = vst [vmem:[#allocation116_spill] sm:$0xff] %v8139_v41  ;;  %9937 = vst [vmem:[#allocation50_spill] sm:$0xff] %v8173_v40  ;;  %v3374_v46 = vsel %vm9649_vm15, %v3356_v19, %v8026_v63  ;;  %v3339_v53 = vsel %vm2864_vm13, %v8173_v40, %v3180_v15  ;;  %v9940_v19 = vld [vmem:[#allocation101_spill] sm:$0xff]  ;;  %v9977_v40 = vld [vmem:[#allocation44_spill] sm:$0xff] }
 0x36e   : > { %3481 = vrot.lane.b32.xlu0 %v3448_v6, %s5794_s16  ;;  %v3133_v20 = vpop.permute.xlu1 %3132  ;;  %v3409_v6 = vsel %vm2936_vm2, %v3391_v56, %v7946_v42  ;;  %v3357_v21 = vsel %vm2882_vm14, %v3339_v53, %v8082_v23  ;;  %v3452_v56 = vsel %vm9647_vm7, %v3449_v33, %v3451_v37  ;;  %v5369_v63 = vunpack.i.l.bf16 %v9977_v40  ;;  %v9979_v31 = vld [vmem:[#allocation132_spill] sm:$0xff] }
 0x36f   : > { %v3453_v24 = vrot.slane %v3409_v6, 3  ;;  %v3375_v7 = vsel %vm9649_vm15, %v3357_v21, %v8113_v29  ;;  %v9971_v29 = vld [vmem:[#allocation13_spill] sm:$0xff] }
 0x370   : > { %v3089_v0 = vpop.permute.xlu0 %3088  ;;  %5597 = vrot.lane.b32.xlu1 %v5596_v14, %s9696_s0  ;;  %v3392_v14 = vsel %vm2918_vm1, %v3374_v46, %v7886_v44  ;;  %v3393_v53 = vsel %vm2918_vm1, %v3375_v7, %v8033_v36  ;;  %v3310_v7 = vsel %vm2810_vm10, %v7359_v47, %v8104_v57  ;;  %v9970_v36 = vld [vmem:[#allocation14_spill] sm:$0xff] }
 0x371   : > { %v3410_v15 = vsel %vm2936_vm2, %v3392_v14, %v8058_v39  ;;  %v3454_v33 = vsel %vm9647_vm7, %v3451_v37, %v3453_v24  ;;  %v3411_v6 = vsel %vm2936_vm2, %v3393_v53, %v8139_v41  ;;  %v5626_v14 = vpack.i.bf16 %v7359_v47, %v9882_v35 }
 0x372   : > { %3483 = vrot.lane.b32.xlu0 %v3450_v8, %s5794_s16  ;;  %v3182_v50 = vpop.permute.xlu1 %3181  ;;  %v5611_v8 = vpack.i.bf16 %v9940_v19, %v9939_v59  ;;  %v3455_v44 = vrot.slane %v3410_v15, 3  ;;  %v5641_v37 = vpack.i.bf16 %v9920_v61, %v9935_v38  ;;  %v3316_v19 = vsel %vm2828_vm11, %v3310_v7, %v3105_v62  ;;  %v9944_v7 = vld [vmem:[#allocation23_spill] sm:$0xff] }
 0x374   : > { %v3107_v58 = vpop.permute.xlu0 %3106  ;;  %5602 = vrot.lane.b32.xlu1 %v5601_v51, %s9672_s25  ;;  %v3456_v15 = vsel %vm9647_vm7, %v3453_v24, %v3455_v44  ;;  %v9941_v24 = vld [vmem:[#allocation106_spill] sm:$0xff] }
 0x376   : > { %3485 = vrot.lane.b32.xlu0 %v3452_v56, %s5794_s16  ;;  %v3223_v46 = vpop.permute.xlu1 %3222  ;;  %v3457_v56 = vrot.slane %v3411_v6, 3  ;;  %v9942_v6 = vld [vmem:[#allocation110_spill] sm:$0xff] }
 0x378   : > { %v3135_v26 = vpop.permute.xlu0 %3134  ;;  %5612 = vrot.lane.b32.xlu1 %v5611_v8, %s9673_s29  ;;  %v3322_v8 = vsel %vm2846_vm12, %v3316_v19, %v3133_v20  ;;  %v3458_v53 = vsel %vm9647_vm7, %v3455_v44, %v3457_v56  ;;  %v9943_v20 = vrot.slane %v7359_v47, 4  ;;  %v9945_v19 = vpack.i.bf16 %v9892_v48, %v9944_v7  ;;  %v9946_v7 = vld [vmem:[#allocation22_spill] sm:$0xff] }
 0x379   : > { %v3340_v61 = vsel %vm2864_vm13, %v3322_v8, %v3182_v50  ;;  %v3311_v50 = vsel %vm2810_vm10, %v9941_v24, %v3089_v0 }
 0x37a   : > { %3487 = vrot.lane.b32.xlu0 %v3454_v33, %s5794_s16  ;;  %v3252_v51 = vpop.permute.xlu1 %3251  ;;  %v2446_v33 = vrot.slane %v9941_v24, 4  ;;  %v3358_v57 = vsel %vm2882_vm14, %v3340_v61, %v3223_v46 }
 0x37b   : > { %v3376_v62 = vsel %vm9649_vm15, %v3358_v57, %v3252_v51  ;;  %v3317_v51 = vsel %vm2828_vm11, %v3311_v50, %v3107_v58  ;;  %v9948_v50 = vld [vmem:[#allocation28_spill] sm:$0xff] }
 0x37c   : > { %v8208_v21 = vpop.permute.xlu0 %3274  ;;  %5627 = vrot.lane.b32.xlu1 %v5626_v14, %s9670_s12  ;;  %v2448_v14 = vrot.slane %v9942_v6, 4  ;;  %v3394_v46 = vsel %vm2918_vm1, %v3376_v62, %v8050_v22 }
 0x37e   : > { %3489 = vrot.lane.b32.xlu0 %v3456_v15, %s5794_s16  ;;  %v3273_v59 = vpop.permute.xlu1 %3272  ;;  %v2449_v44 = vsel %vm9630_vm4, %v2446_v33, %v2448_v14 }
 0x380   : > { %v3184_v35 = vpop.permute.xlu0 %3183  ;;  %5642 = vrot.lane.b32.xlu1 %v5641_v37, %s9672_s25  ;;  %v2447_v37 = vsel %vm9630_vm4, %v9943_v20, %v2446_v33  ;;  %v3323_v33 = vsel %vm2846_vm12, %v3317_v51, %v3135_v26  ;;  %v5284_v26 = vunpack.i.l.bf16 %v9946_v7 }
 0x381   : > { %v5646_v61 = vpack.i.bf16 %v2449_v44, %v2447_v37  ;;  %v3341_v48 = vsel %vm2864_vm13, %v3323_v33, %v3184_v35  ;;  %v5285_v37 = vunpack.i.h.bf16 %v9946_v7  ;;  %v9947_v35 = vld [vmem:[#allocation26_spill] sm:$0xff]  ;;  %v2450_v33 = vrot.slane %v7542_v54, 4 }
 0x382   : > { %3491 = vrot.lane.b32.xlu0 %v3458_v53, %s5794_s16  ;;  %v8227_v38 = vpop.permute.xlu1 %3280  ;;  %v5290_v44 = vunpack.i.h.bf16 %v9947_v35 }
 0x384   : > { %v3225_v15 = vpop.permute.xlu0 %3224 }
 0x385   : > { %v3359_v0 = vsel %vm2882_vm14, %v3341_v48, %v3225_v15  ;;  %v5289_v15 = vunpack.i.l.bf16 %v9947_v35  ;;  %v9949_v48 = vld [vmem:[#allocation12_spill] sm:$0xff] }
 0x386   : > { %5637 = vrot.lane.b32.xlu0 %v9945_v19, %s9687_s24  ;;  %v3293_v8 = vpop.permute.xlu1 %3292 }
 0x387   : > { %v3412_v47 = vsel %vm2936_vm2, %v3394_v46, %v3293_v8  ;;  %v5295_v46 = vunpack.i.h.bf16 %v9948_v50  ;;  %v5294_v8 = vunpack.i.l.bf16 %v9948_v50 }
 0x388   : > { %v8244_v53 = vpop.permute.xlu0 %3136  ;;  %v3459_v57 = vrot.slane %v3412_v47, 3 }
 0x38a   : > { %5647 = vrot.lane.b32.xlu0 %v5646_v61, %s9700_s2  ;;  %v3254_v20 = vpop.permute.xlu1 %3253  ;;  %v3460_v22 = vsel %vm9647_vm7, %v3457_v56, %v3459_v57  ;;  %v5666_v61 = vpack.i.bf16 %v9942_v6, %v9941_v24 }
 0x38b   : > { %v3377_v62 = vsel %vm9649_vm15, %v3359_v0, %v3254_v20  ;;  %3493 = vrot.lane.b32.xlu1 %v3460_v22, %s5794_s16  ;;  %v2812_v0 = vsel %vm2810_vm10, %v9949_v48, %v5285_v37  ;;  %v2451_v48 = vsel %vm9630_vm4, %v2448_v14, %v2450_v33  ;;  %vm2990_vm4 = vcmask 539648  }
 0x38c   : > { %v8253_v58 = vpop.permute.xlu0 %3092  ;;  %v3395_v56 = vsel %vm2918_vm1, %v3377_v62, %v3273_v59  ;;  %v9950_v59 = vld [vmem:[#allocation11_spill] sm:$0xff]  ;;  %v2830_v62 = vsel %vm2828_vm11, %v2812_v0, %v5290_v44  ;;  %v9953_v0 = vld [vmem:[#allocation114_spill] sm:$0xff] }
 0x38d   : > { %v2811_v20 = vsel %vm2810_vm10, %v9950_v59, %v5284_v26 }
 0x38e   : > { %2090 = vrot.lane.b32.xlu0 %v8016_v9, %s9687_s24  ;;  %v3295_v19 = vpop.permute.xlu1 %3294  ;;  %v2829_v22 = vsel %vm2828_vm11, %v2811_v20, %v5289_v15  ;;  %v9952_v15 = vld [vmem:[#allocation21_spill] sm:$0xff] }
 0x38f   : > { %v8265_v51 = vsel %vm2936_vm2, %v3395_v56, %v3295_v19  ;;  %v2847_v35 = vsel %vm2846_vm12, %v2829_v22, %v5294_v8  ;;  %v2848_v19 = vsel %vm2846_vm12, %v2830_v62, %v5295_v46  ;;  %v9951_v56 = vld [vmem:[#allocation30_spill] sm:$0xff]  ;;  %v5299_v44 = vunpack.i.l.bf16 %v9952_v15 }
 0x390   : > { %v8267_v47 = vpop.permute.xlu0 %3255  ;;  %v9627_v9 = vrot.slane %v8265_v51, 3  ;;  %v5305_v37 = vunpack.i.h.bf16 %v9951_v56  ;;  %v5304_v50 = vunpack.i.l.bf16 %v9951_v56  ;;  %v9955_v56 = vld [vmem:[#allocation25_spill] sm:$0xff] }
 0x391   : > { %v2865_v46 = vsel %vm2864_vm13, %v2847_v35, %v5299_v44  ;;  %v5310_v14 = vunpack.i.h.bf16 %v9955_v56  ;;  %v5309_v33 = vunpack.i.l.bf16 %v9955_v56  ;;  %v9958_v35 = vld [vmem:[#allocation135_spill] sm:$0xff] }
 0x392   : > { %5667 = vrot.lane.b32.xlu0 %v5666_v61, %s9670_s12  ;;  %v3091_v7 = vpop.permute.xlu1 %3090  ;;  %v3462_v24 = vsel %vm9647_vm7, %v3459_v57, %v9627_v9  ;;  %v5300_v61 = vunpack.i.h.bf16 %v9952_v15  ;;  %v9954_v57 = vld [vmem:[#allocation124_spill] sm:$0xff]  ;;  %v2883_v22 = vsel %vm2882_vm14, %v2865_v46, %v5304_v50  ;;  %v9956_v15 = vld [vmem:[#allocation115_spill] sm:$0xff]  ;;  %v9965_v9 = vld [vmem:[#allocation154_spill] sm:$0xff] }
 0x393   : > { %3495 = vrot.lane.b32.xlu1 %v3462_v24, %s5794_s16  ;;  %v5651_v59 = vpack.i.bf16 %v9954_v57, %v9953_v0  ;;  %v9957_v0 = vld [vmem:[#allocation127_spill] sm:$0xff] }
 0x394   : > { %v8288_v26 = vpop.permute.xlu0 %3276  ;;  %v2866_v8 = vsel %vm2864_vm13, %v2848_v19, %v5300_v61  ;;  %v2901_v19 = vsel %vm9649_vm15, %v2883_v22, %v5309_v33  ;;  %v9960_v33 = vld [vmem:[#allocation118_spill] sm:$0xff] }
 0x395   : > { %v2884_v62 = vsel %vm2882_vm14, %v2866_v8, %v5305_v37  ;;  %v9959_v37 = vld [vmem:[#allocation20_spill] sm:$0xff] }
 0x396   : > { %2484 = vrot.lane.b32.xlu0 %v2451_v48, %s9700_s2  ;;  %v3109_v20 = vpop.permute.xlu1 %3108  ;;  %v5656_v48 = vpack.i.bf16 %v9957_v0, %v9956_v15  ;;  %v2902_v50 = vsel %vm9649_vm15, %v2884_v62, %v5310_v14  ;;  %v5280_v44 = vunpack.i.h.bf16 %v9959_v37  ;;  %v5279_v57 = vunpack.i.l.bf16 %v9959_v37  ;;  %v9961_v62 = vld [vmem:[#allocation129_spill] sm:$0xff]  ;;  %s5799_s2 = smov 112  }
 0x397   : > { %5652 = vrot.lane.b32.xlu1 %v5651_v59, %s9673_s29  ;;  %v3312_v59 = vsel %vm2810_vm10, %v9942_v6, %v3091_v7  ;;  %v5661_v14 = vpack.i.bf16 %v9961_v62, %v9960_v33  ;;  %v9962_v15 = vld [vmem:[#allocation29_spill] sm:$0xff]  ;;  %v9963_v6 = vld [vmem:[#allocation31_spill] sm:$0xff] }
 0x398   : > { %v8301_v24 = vpop.permute.xlu0 %3278  ;;  %v3318_v8 = vsel %vm2828_vm11, %v3312_v59, %v3109_v20  ;;  %v2919_v56 = vsel %vm2918_vm1, %v2901_v19, %v5279_v57  ;;  %v2920_v22 = vsel %vm2918_vm1, %v2902_v50, %v5280_v44  ;;  %v5325_v0 = vunpack.i.h.bf16 %v9962_v15  ;;  %v9966_v33 = vld [vmem:[#allocation33_spill] sm:$0xff] }
 0x399   : > { %v5335_v7 = vunpack.i.h.bf16 %v9963_v6  ;;  %v3324_v20 = vsel %vm2846_vm12, %v3318_v8, %v8244_v53  ;;  %v5334_v50 = vunpack.i.l.bf16 %v9963_v6  ;;  %v5345_v62 = vunpack.i.h.bf16 %v9966_v33  ;;  %v9968_v6 = vld [vmem:[#allocation37_spill] sm:$0xff] }
 0x39a   : > { %2626 = vrot.lane.b32.xlu0 %v9958_v35, %s9698_s1  ;;  %v3186_v61 = vpop.permute.xlu1 %3185  ;;  %v5324_v35 = vunpack.i.l.bf16 %v9962_v15  ;;  %v2938_v57 = vsel %vm2936_vm2, %v2920_v22, %v5325_v0  ;;  %v5344_v15 = vunpack.i.l.bf16 %v9966_v33  ;;  %v9969_v22 = vld [vmem:[#allocation27_spill] sm:$0xff]  ;;  %v9972_v0 = vld [vmem:[#allocation38_spill] sm:$0xff] }
 0x39b   : > { %5657 = vrot.lane.b32.xlu1 %v5656_v48, %s9698_s1  ;;  %v9964_v48 = vld [vmem:[#allocation147_spill] sm:$0xff]  ;;  %v3342_v59 = vsel %vm2864_vm13, %v3324_v20, %v3186_v61  ;;  %v5355_v23 = vunpack.i.h.bf16 %v9972_v0  ;;  %s5798_s1 = smov 80  }
 0x39c   : > { %v8316_v46 = vpop.permute.xlu0 %3096  ;;  %v5671_v41 = vpack.i.bf16 %v9965_v9, %v9964_v48  ;;  %v2937_v44 = vsel %vm2936_vm2, %v2919_v56, %v5324_v35  ;;  %v9967_v9 = vld [vmem:[#allocation34_spill] sm:$0xff]  ;;  %v5339_v56 = vunpack.i.l.bf16 %v9968_v6 }
 0x39d   : > { %v5330_v48 = vunpack.i.h.bf16 %v9967_v9  ;;  %v5329_v8 = vunpack.i.l.bf16 %v9967_v9  ;;  %v2955_v35 = vsel %vm2954_vm3, %v2937_v44, %v5334_v50  ;;  %v5354_v50 = vunpack.i.l.bf16 %v9972_v0 }
 0x39e   : > { %v3227_v37 = vpop.permute.xlu1 %3226  ;;  %v2973_v33 = vsel %vm9650_vm6, %v2955_v35, %v5344_v15 }
 0x39f   : > { %5662 = vrot.lane.b32.xlu1 %v5661_v14, %s9674_s14  ;;  %v3360_v53 = vsel %vm2882_vm14, %v3342_v59, %v3227_v37  ;;  %v2956_v37 = vsel %vm2954_vm3, %v2938_v57, %v5335_v7  ;;  %v5314_v59 = vunpack.i.l.bf16 %v9969_v22  ;;  %v2813_v39 = vsel %vm2810_vm10, %v9971_v29, %v5329_v8  ;;  %v9973_v57 = vld [vmem:[#allocation39_spill] sm:$0xff] }
 0x3a0   : > { %v8331_v19 = vpop.permute.xlu0 %3114  ;;  %v3378_v20 = vsel %vm9649_vm15, %v3360_v53, %v8267_v47  ;;  %v2974_v9 = vsel %vm9650_vm6, %v2956_v37, %v5345_v62  ;;  %v5340_v7 = vunpack.i.h.bf16 %v9968_v6  ;;  %v2831_v47 = vsel %vm2828_vm11, %v2813_v39, %v5339_v56  ;;  %v9974_v62 = vld [vmem:[#allocation40_spill] sm:$0xff]  ;;  %v9975_v6 = vld [vmem:[#allocation42_spill] sm:$0xff]  ;;  %v9976_v39 = vld [vmem:[#allocation41_spill] sm:$0xff] }
 0x3a1   : > { %v5365_v15 = vunpack.i.h.bf16 %v9973_v57  ;;  %v5349_v53 = vunpack.i.l.bf16 %v9974_v62  ;;  %v5350_v8 = vunpack.i.h.bf16 %v9974_v62  ;;  %v5359_v0 = vunpack.i.l.bf16 %v9975_v6  ;;  %v9978_v62 = vld [vmem:[#allocation46_spill] sm:$0xff] }
 0x3a2   : > { %v8342_v14 = vpop.permute.xlu1 %3110  ;;  %v5374_v56 = vunpack.i.l.bf16 %v9976_v39  ;;  %v5360_v37 = vunpack.i.h.bf16 %v9975_v6  ;;  %v5379_v11 = vunpack.i.l.bf16 %v9978_v62  ;;  %v5380_v6 = vunpack.i.h.bf16 %v9978_v62 }
 0x3a3   : > { %5672 = vrot.lane.b32.xlu1 %v5671_v41, %s9696_s0  ;;  %v2814_v41 = vsel %vm2810_vm10, %v9970_v36, %v5330_v48  ;;  %v3396_v36 = vsel %vm2918_vm1, %v3378_v20, %v8208_v21  ;;  %v5364_v48 = vunpack.i.l.bf16 %v9973_v57  ;;  %v5375_v20 = vunpack.i.h.bf16 %v9976_v39 }
 0x3a4   : > { %v8346_v61 = vpop.permute.xlu0 %3191  ;;  %v2832_v21 = vsel %vm2828_vm11, %v2814_v41, %v5340_v7  ;;  %v5370_v57 = vunpack.i.h.bf16 %v9977_v40  ;;  %v9981_v7 = vrot.slane %v8265_v51, 3  ;;  %v2992_v39 = vsel %vm2990_vm4, %v2974_v9, %v5355_v23  ;;  %v9983_v23 = vld [vmem:[#allocation15_spill] sm:$0xff] }
 0x3a6   : > { %v8363_v44 = vpop.permute.xlu1 %3138 }
 0x3a7   : > { %2426 = vrot.lane.b32.xlu1 %v9921_v4, %s9672_s25 }
 0x3a8   : > { %v3297_v29 = vpop.permute.xlu0 %3296 }
 0x3a9   : > { %v8376_v35 = vsel %vm2936_vm2, %v3396_v36, %v3297_v29  ;;  %v2991_v36 = vsel %vm2990_vm4, %v2973_v33, %v5354_v50  ;;  %v2849_v29 = vsel %vm2846_vm12, %v2831_v47, %v5349_v53  ;;  %v2850_v33 = vsel %vm2846_vm12, %v2832_v21, %v5350_v8  ;;  %v9984_v21 = vld [vmem:[#allocation47_spill] sm:$0xff] }
 0x3aa   : > { %v8386_v42 = vpop.permute.xlu1 %3302  ;;  %v9980_v41 = vrot.slane %v8376_v35, 3  ;;  %v3009_v12 = vsel %vm3008_vm9, %v2991_v36, %v5364_v48  ;;  %v2867_v50 = vsel %vm2864_vm13, %v2849_v29, %v5359_v0  ;;  %v2868_v53 = vsel %vm2864_vm13, %v2850_v33, %v5360_v37  ;;  %v9987_v29 = vld [vmem:[#allocation32_spill] sm:$0xff] }
 0x3ab   : > { %2571 = vrot.lane.b32.xlu1 %v9979_v31, %s9673_s29  ;;  %v3010_v31 = vsel %vm3008_vm9, %v2992_v39, %v5365_v15  ;;  %v3027_v47 = vsel %vm3026_vm0, %v3009_v12, %v5374_v56  ;;  %v2885_v51 = vsel %vm2882_vm14, %v2867_v50, %v5369_v63  ;;  %v2886_v48 = vsel %vm2882_vm14, %v2868_v53, %v5370_v57  ;;  %v9985_v56 = vld [vmem:[#allocation54_spill] sm:$0xff]  ;;  %v9986_v63 = vld [vmem:[#allocation60_spill] sm:$0xff] }
 0x3ac   : > { %v8393_v4 = vpop.permute.xlu0 %3094  ;;  %v3464_v40 = vsel %vm9647_vm7, %v9981_v7, %v9980_v41  ;;  %v3028_v62 = vsel %vm3026_vm0, %v3010_v31, %v5375_v20  ;;  %v9982_v41 = vld [vmem:[#allocation43_spill] sm:$0xff]  ;;  %v2903_v8 = vsel %vm9649_vm15, %v2885_v51, %v5379_v11  ;;  %v2904_v15 = vsel %vm9649_vm15, %v2886_v48, %v5380_v6  ;;  %v9989_v31 = vld [vmem:[#allocation45_spill] sm:$0xff] }
 0x3ad   : > { %3497 = vrot.lane.b32.xlu0 %v3464_v40, %s5794_s16  ;;  %v2815_v9 = vsel %vm2810_vm10, %v9983_v23, %v9982_v41  ;;  %v5394_v37 = vunpack.i.l.bf16 %v9985_v56  ;;  %v5414_v36 = vunpack.i.l.bf16 %v9986_v63  ;;  %v5320_v57 = vunpack.i.h.bf16 %v9987_v29  ;;  %v9988_v40 = vld [vmem:[#allocation56_spill] sm:$0xff] }
 0x3ae   : > { %v8415_v0 = vpop.permute.xlu1 %3142  ;;  %v2833_v12 = vsel %vm2828_vm11, %v2815_v9, %v9984_v21  ;;  %v5319_v11 = vunpack.i.l.bf16 %v9987_v29  ;;  %v5395_v7 = vunpack.i.h.bf16 %v9985_v56  ;;  %v5399_v6 = vunpack.i.l.bf16 %v9988_v40  ;;  %v9991_v21 = vld [vmem:[#allocation49_spill] sm:$0xff]  ;;  %v9992_v29 = vld [vmem:[#allocation51_spill] sm:$0xff] }
 0x3af   : > { %2732 = vrot.lane.b32.xlu1 %v7542_v54, %s9670_s12  ;;  %v5400_v39 = vunpack.i.h.bf16 %v9988_v40  ;;  %v5415_v33 = vunpack.i.h.bf16 %v9986_v63  ;;  %v3045_v50 = vsel %vm9648_vm8, %v3027_v47, %v5314_v59  ;;  %v2851_v53 = vsel %vm2846_vm12, %v2833_v12, %v9989_v31  ;;  %v9995_v31 = vld [vmem:[#allocation53_spill] sm:$0xff] }
 0x3b0   : > { %v8424_v20 = vpop.permute.xlu0 %3112  ;;  %v2921_v51 = vsel %vm2918_vm1, %v2903_v8, %v5319_v11  ;;  %v2922_v41 = vsel %vm2918_vm1, %v2904_v15, %v5320_v57  ;;  %v9990_v9 = vunpack.i.h.bf16 %v9969_v22  ;;  %v5389_v40 = vunpack.i.l.bf16 %v9992_v29  ;;  %v9993_v15 = vld [vmem:[#allocation57_spill] sm:$0xff]  ;;  %v9994_v11 = vld [vmem:[#allocation58_spill] sm:$0xff] }
 0x3b1   : > { %v2939_v63 = vsel %vm2936_vm2, %v2921_v51, %v5394_v37  ;;  %v2869_v59 = vsel %vm2864_vm13, %v2851_v53, %v5414_v36  ;;  %v2940_v12 = vsel %vm2936_vm2, %v2922_v41, %v5395_v7  ;;  %v5424_v57 = vunpack.i.l.bf16 %v9993_v15 }
 0x3b2   : > { %v3188_v23 = vpop.permute.xlu1 %3187  ;;  %v3046_v48 = vsel %vm9648_vm8, %v3028_v62, %v9990_v9  ;;  %v2957_v8 = vsel %vm2954_vm3, %v2939_v63, %v5399_v6  ;;  %v5409_v22 = vunpack.i.l.bf16 %v9994_v11  ;;  %v5390_v62 = vunpack.i.h.bf16 %v9992_v29  ;;  %v9996_v63 = vld [vmem:[#allocation59_spill] sm:$0xff] }
 0x3b3   : > { %v5404_v9 = vunpack.i.l.bf16 %v9995_v31  ;;  %v2958_v56 = vsel %vm2954_vm3, %v2940_v12, %v5400_v39  ;;  %v2870_v37 = vsel %vm2864_vm13, %v7783_v30, %v5415_v33  ;;  %v5405_v36 = vunpack.i.h.bf16 %v9995_v31  ;;  %v9997_v30 = vld [vmem:[#allocation55_spill] sm:$0xff]  ;;  %v9998_v31 = vld [vmem:[#allocation62_spill] sm:$0xff] }
 0x3b4   : > { %v8444_v47 = vpop.permute.xlu0 %3189  ;;  %v5425_v53 = vunpack.i.h.bf16 %v9993_v15  ;;  %v5410_v7 = vunpack.i.h.bf16 %v9994_v11  ;;  %v2887_v6 = vsel %vm2882_vm14, %v2869_v59, %v5424_v57  ;;  %v5384_v41 = vunpack.i.l.bf16 %v9991_v21 }
 0x3b5   : > { %v2975_v29 = vsel %vm9650_vm6, %v2957_v8, %v5404_v9  ;;  %v5434_v5 = vunpack.i.l.bf16 %v9996_v63  ;;  %v3063_v39 = vsel %vm3062_vm5, %v3045_v50, %v5389_v40  ;;  %v5419_v33 = vunpack.i.l.bf16 %v9997_v30 }
 0x3b6   : > { %v3229_v51 = vpop.permute.xlu1 %3228  ;;  %v2976_v12 = vsel %vm9650_vm6, %v2958_v56, %v5405_v36  ;;  %v2993_v15 = vsel %vm2990_vm4, %v2975_v29, %v5409_v22  ;;  %v2888_v11 = vsel %vm2882_vm14, %v2870_v37, %v5425_v53  ;;  %v5435_v59 = vunpack.i.h.bf16 %v9996_v63 }
 0x3b7   : > { %v2905_v57 = vsel %vm9649_vm15, %v2887_v6, %v5434_v5  ;;  %vm3566_vm7 = vcmask 179200   ;;  %vm3522_vm8 = vcmask 785408   ;;  %v2994_v8 = vsel %vm2990_vm4, %v2976_v12, %v5410_v7  ;;  %v9999_v7 = vld [vmem:[#allocation48_spill] sm:$0xff] }
 0x3b8   : > { %v8462_v60 = vpop.permute.xlu0 %3232  ;;  %v5429_v9 = vunpack.i.l.bf16 %v9998_v31  ;;  %v3313_v50 = vsel %vm2810_vm10, %v7542_v54, %v8253_v58  ;;  %v3064_v56 = vsel %vm3062_vm5, %v3046_v48, %v5390_v62  ;;  %v5420_v22 = vunpack.i.h.bf16 %v9997_v30  ;;  %v10000_v62 = vld [vmem:[#allocation66_spill] sm:$0xff] }
 0x3b9   : > { %v3011_v37 = vsel %vm3008_vm9, %v2993_v15, %v5419_v33  ;;  %v2906_v36 = vsel %vm9649_vm15, %v2888_v11, %v5435_v59  ;;  %v3319_v5 = vsel %vm2828_vm11, %v3313_v50, %v8342_v14  ;;  %v2923_v6 = vsel %vm2918_vm1, %v2905_v57, %v9999_v7  ;;  %v10001_v15 = vld [vmem:[#allocation70_spill] sm:$0xff]  ;;  %v10005_v7 = vld [vmem:[#allocation67_spill] sm:$0xff] }
 0x3ba   : > { %v3258_v40 = vpop.permute.xlu1 %3257  ;;  %v5430_v29 = vunpack.i.h.bf16 %v9998_v31  ;;  %v3325_v54 = vsel %vm2846_vm12, %v3319_v5, %v8363_v44  ;;  %v3012_v48 = vsel %vm3008_vm9, %v2994_v8, %v5420_v22  ;;  %v5450_v63 = vunpack.i.h.bf16 %v10000_v62  ;;  %v10003_v8 = vld [vmem:[#allocation68_spill] sm:$0xff] }
 0x3bb   : > { %v5449_v30 = vunpack.i.l.bf16 %v10000_v62  ;;  %v3343_v14 = vsel %vm2864_vm13, %v3325_v54, %v3188_v23  ;;  %v3029_v33 = vsel %vm3026_vm0, %v3011_v37, %v5429_v9  ;;  %v2924_v12 = vsel %vm2918_vm1, %v2906_v36, %v6999_v34  ;;  %v10004_v37 = vld [vmem:[#allocation73_spill] sm:$0xff] }
 0x3bc   : > { %v3472_v53 = vpop.permute.xlu0 %3471  ;;  %v5454_v44 = vunpack.i.l.bf16 %v10001_v15  ;;  %v3361_v11 = vsel %vm2882_vm14, %v3343_v14, %v3229_v51  ;;  %v5444_v31 = vunpack.i.l.bf16 %v10003_v8  ;;  %v5455_v50 = vunpack.i.h.bf16 %v10001_v15  ;;  %v10007_v15 = vld [vmem:[#allocation69_spill] sm:$0xff] }
 0x3bd   : > { %4650 = vmatprep.mubr.msk.f32.mxu1 %vm3566_vm7, %v3472_v53  ;;  %v3523_v58 = vsel %vm3522_vm8, %v3063_v39, %v3472_v53  ;;  %v10002_v39 = vld [vmem:[#allocation61_spill] sm:$0xff]  ;;  %v3379_v23 = vsel %vm9649_vm15, %v3361_v11, %v3258_v40  ;;  %v3030_v9 = vsel %vm3026_vm0, %v3012_v48, %v5430_v29  ;;  %v2942_v34 = vsel %vm2936_vm2, %v2924_v12, %v7195_v17 }
 0x3be   : > { %3669 = vmatmul.mubr.f32.vlgmr.msra.gmra.mrb[0].mxu1 %v3523_v58  ;;  %v3141_v59 = vpop.permute.xlu1 %3140  ;;  %v2941_v57 = vsel %vm2936_vm2, %v2923_v6, %v10002_v39  ;;  %v5464_v36 = vunpack.i.l.bf16 %v10004_v37  ;;  %v2960_v53 = vsel %vm2954_vm3, %v2942_v34, %v5450_v63  ;;  %v5460_v6 = vunpack.i.h.bf16 %v10005_v7 }
 0x3bf   : > { %v2959_v5 = vsel %vm2954_vm3, %v2941_v57, %v5449_v30  ;;  %vm10006_vm15 = vcmask 687104   ;;  %v5459_v29 = vunpack.i.l.bf16 %v10005_v7  ;;  %v5465_v17 = vunpack.i.h.bf16 %v10004_v37 }
 0x3c0   : > { %v3474_v22 = vpop.permute.xlu0 %3473  ;;  %v3047_v40 = vsel %vm10006_vm15, %v3029_v33, %v5384_v41  ;;  %v2977_v54 = vsel %vm9650_vm6, %v2959_v5, %v5454_v44  ;;  %v3397_v48 = vsel %vm2918_vm1, %v3379_v23, %v8288_v26  ;;  %v2978_v62 = vsel %vm9650_vm6, %v2960_v53, %v5455_v50 }
 0x3c1   : > { %4651 = vmatprep.mubr.msk.f32.mxu1 %vm3566_vm7, %v3474_v22  ;;  %v3524_v51 = vsel %vm3522_vm8, %v3064_v56, %v3474_v22  ;;  %v5445_v56 = vunpack.i.h.bf16 %v10003_v8  ;;  %v3065_v41 = vsel %vm3062_vm5, %v3047_v40, %v5444_v31  ;;  %v2871_v14 = vsel %vm2864_vm13, %v7808_v18, %v5464_v36  ;;  %v10011_v22 = vld [vmem:[#allocation72_spill] sm:$0xff] }
 0x3c2   : > { %3674 = vmatmul.mubr.f32.gmra.mrb[2].mxu1 %v3524_v51  ;;  %v3299_v58 = vpop.permute.xlu1 %3298  ;;  %v3314_v33 = vsel %vm2810_vm10, %v7551_v45, %v8393_v4  ;;  %v5469_v44 = vunpack.i.l.bf16 %v10007_v15  ;;  %v2995_v11 = vsel %vm2990_vm4, %v2977_v54, %v5459_v29  ;;  %v10008_v18 = vunpack.i.h.bf16 %v9991_v21  ;;  %v10012_v36 = vld [vmem:[#allocation104_spill] sm:$0xff] }
 0x3c3   : > { %v8521_v63 = vsel %vm2936_vm2, %v3397_v48, %v3299_v58  ;;  %v3320_v39 = vsel %vm2828_vm11, %v3314_v33, %v8424_v20  ;;  %v2996_v45 = vsel %vm2990_vm4, %v2978_v62, %v5460_v6  ;;  %v2872_v4 = vsel %vm2864_vm13, %v7844_v32, %v5465_v17  ;;  %v10014_v29 = vld [vmem:[#allocation64_spill] sm:$0xff] }
 0x3c4   : > { %v3476_v30 = vpop.permute.xlu0 %3475  ;;  %v3465_v12 = vrot.slane %v8521_v63, 3  ;;  %v3048_v57 = vsel %vm10006_vm15, %v3030_v9, %v10008_v18  ;;  %v3326_v8 = vsel %vm2846_vm12, %v3320_v39, %v3141_v59  ;;  %v10009_v50 = vrot.slane %v8376_v35, 3  ;;  %v10020_v39 = vld [vmem:[#allocation76_spill] sm:$0xff]  ;;  %v10031_v63 = vld [vmem:[#allocation85_spill] sm:$0xff] }
 0x3c5   : > { %4652 = vmatprep.mubr.msk.f32.mxu1 %vm3566_vm7, %v3476_v30  ;;  %v3525_v26 = vsel %vm3522_vm8, %v3065_v41, %v3476_v30  ;;  %vm10010_vm6 = vcmask 1044480   ;;  %v5470_v20 = vunpack.i.h.bf16 %v10007_v15  ;;  %v5474_v21 = vunpack.i.l.bf16 %v10011_v22  ;;  %v10017_v41 = vld [vmem:[#allocation90_spill] sm:$0xff] }
 0x3c6   : > { %3679 = vmatmul.mubr.f32.gmra.mrb[4].mxu1 %v3525_v26  ;;  %v3231_v31 = vpop.permute.xlu1 %3230  ;;  %v3466_v23 = vsel %vm10010_vm6, %v10009_v50, %v3465_v12  ;;  %v2889_v9 = vsel %vm2882_vm14, %v2871_v14, %v7178_v52  ;;  %v3066_v32 = vsel %vm3062_vm5, %v3048_v57, %v5445_v56  ;;  %v5475_v59 = vunpack.i.h.bf16 %v10011_v22  ;;  %v10021_v57 = vld [vmem:[#allocation63_spill] sm:$0xff]  ;;  %v10024_v50 = vld [vmem:[#allocation81_spill] sm:$0xff]  ;;  %v10025_v22 = vld [vmem:[#allocation94_spill] sm:$0xff] }
 0x3c7   : > { %3499 = vrot.lane.b32.xlu0 %v3466_v23, %s5794_s16  ;;  %v3013_v37 = vsel %vm3008_vm9, %v2995_v11, %v5469_v44  ;;  %v5504_v35 = vunpack.i.l.bf16 %v10012_v36  ;;  %v3014_v5 = vsel %vm3008_vm9, %v2996_v45, %v5470_v20  ;;  %v2890_v52 = vsel %vm2882_vm14, %v2872_v4, %v7217_v27  ;;  %v10016_v27 = vld [vmem:[#allocation140_spill] sm:$0xff]  ;;  %v10022_v45 = vld [vmem:[#allocation65_spill] sm:$0xff] }
 0x3c8   : > { %v3478_v34 = vpop.permute.xlu0 %3477  ;;  %v3344_v53 = vsel %vm2864_vm13, %v3326_v8, %v8444_v47  ;;  %vm10013_vm6 = vcmask 293888   ;;  %v5440_v54 = vunpack.i.h.bf16 %v10014_v29  ;;  %v5439_v17 = vunpack.i.l.bf16 %v10014_v29 }
 0x3c9   : > { %4653 = vmatprep.mubr.msk.f32.mxu1 %vm3566_vm7, %v3478_v34  ;;  %v3526_v51 = vsel %vm3522_vm8, %v3066_v32, %v3478_v34  ;;  %v2907_v7 = vsel %vm10013_vm6, %v2889_v9, %v7187_v28  ;;  %v3362_v6 = vsel %vm2882_vm14, %v3344_v53, %v3231_v31  ;;  %v3031_v58 = vsel %vm3026_vm0, %v3013_v37, %v5474_v21  ;;  %vm10015_vm15 = vmmov %vm10013_vm6  ;;  %v10023_v31 = vld [vmem:[#allocation78_spill] sm:$0xff]  ;;  %v10026_v9 = vld [vmem:[#allocation83_spill] sm:$0xff] }
 0x3ca   : > { %3684 = vmatmul.mubr.f32.gmra.mrb[6].mxu1 %v3526_v51  ;;  %v3260_v40 = vpop.permute.xlu1 %3259  ;;  %v3032_v47 = vsel %vm3026_vm0, %v3014_v5, %v5475_v59  ;;  %v2908_v28 = vsel %vm10013_vm6, %v2890_v52, %v7225_v2  ;;  %v2873_v62 = vsel %vm2864_vm13, %v7884_v3, %v5504_v35  ;;  %v3315_v30 = vsel %vm2810_vm10, %v7648_v10, %v8316_v46  ;;  %v10029_v35 = vld [vmem:[#allocation97_spill] sm:$0xff] }
 0x3cb   : > { %v3380_v48 = vsel %vm10015_vm15, %v3362_v6, %v3260_v40  ;;  %2681 = vrot.lane.b32.xlu0 %v10016_v27, %s9674_s14  ;;  %v5484_v14 = vunpack.i.l.bf16 %v10017_v41  ;;  %v2925_v33 = vsel %vm2918_vm1, %v2907_v7, %v7150_v25  ;;  %v5505_v26 = vunpack.i.h.bf16 %v10012_v36  ;;  %v10030_v53 = vld [vmem:[#allocation93_spill] sm:$0xff]  ;;  %v10032_v40 = vld [vmem:[#allocation100_spill] sm:$0xff]  ;;  %s377_s14 = sand.u32 1, %s5766_s18  }
 0x3cc   : > { %v8573_v56 = vpop.permute.xlu0 %5592  ;;  %v3321_v15 = vsel %vm2828_vm11, %v3315_v30, %v8331_v19  ;;  %v3398_v3 = vsel %vm2918_vm1, %v3380_v48, %v8301_v24  ;;  %vm10018_vm15 = vcmask 687104   ;;  %v5485_v10 = vunpack.i.h.bf16 %v10017_v41  ;;  %vm10027_vm11 = vmmov %vm10013_vm6 }
 0x3cd   : > { %v3327_v2 = vsel %vm2846_vm12, %v3321_v15, %v8415_v0  ;;  %v3049_v11 = vsel %vm10018_vm15, %v3031_v58, %v5439_v17  ;;  %v2891_v46 = vsel %vm2882_vm14, %v2873_v62, %v7327_v43  ;;  %vm10019_vm10 = vmmov %vm10018_vm15  ;;  %v5480_v18 = vunpack.i.h.bf16 %v10020_v39  ;;  %v10034_v58 = vld [vmem:[#allocation75_spill] sm:$0xff] }
 0x3ce   : > { %v3301_v44 = vpop.permute.xlu1 %3300  ;;  %v3050_v0 = vsel %vm10019_vm10, %v3032_v47, %v5440_v54  ;;  %v2926_v24 = vsel %vm2918_vm1, %v2908_v28, %v10021_v57  ;;  %v2943_v4 = vsel %vm2936_vm2, %v2925_v33, %v10022_v45  ;;  %v2874_v23 = vsel %vm2864_vm13, %v10024_v50, %v5505_v26  ;;  %v10033_v54 = vld [vmem:[#allocation126_spill] sm:$0xff]  ;;  %v10035_v62 = vld [vmem:[#allocation131_spill] sm:$0xff]  ;;  %vm10038_vm10 = vmmov %vm10013_vm6 }
 0x3cf   : > { %v3416_v25 = vsel %vm2936_vm2, %v3398_v3, %v3301_v44  ;;  %2791 = vrot.lane.b32.xlu0 %v7819_v1, %s9696_s0  ;;  %v2944_v43 = vsel %vm2936_vm2, %v2926_v24, %v10023_v31  ;;  %v3345_v1 = vsel %vm2864_vm13, %v3327_v2, %v8346_v61  ;;  %v3067_v20 = vsel %vm3062_vm5, %v3049_v11, %v5484_v14  ;;  %v10037_v26 = vld [vmem:[#allocation87_spill] sm:$0xff]  ;;  %v10039_v2 = vld [vmem:[#allocation134_spill] sm:$0xff]  ;;  %v10040_v11 = vld [vmem:[#allocation84_spill] sm:$0xff]  ;;  %s5797_s0 = smov 64  }
 0x3d0   : > { %v8600_v19 = vpop.permute.xlu0 %5607  ;;  %v3467_v8 = vrot.slane %v3416_v25, 3  ;;  %v5489_v21 = vunpack.i.l.bf16 %v10025_v22  ;;  %v2909_v34 = vsel %vm10027_vm11, %v2891_v46, %v10026_v9  ;;  %v3363_v32 = vsel %vm2882_vm14, %v3345_v1, %v8462_v60  ;;  %v10041_v46 = vld [vmem:[#allocation158_spill] sm:$0xff]  ;;  %v10044_v50 = vld [vmem:[#allocation77_spill] sm:$0xff]  ;;  %v10047_v9 = vld [vmem:[#allocation128_spill] sm:$0xff] }
 0x3d1   : > { %vm10028_vm12 = vcmask 1044480   ;;  %v5490_v36 = vunpack.i.h.bf16 %v10025_v22  ;;  %v5494_v51 = vunpack.i.l.bf16 %v10029_v35  ;;  %v8630_v52 = vsel %vm3062_vm5, %v3050_v0, %v5485_v10  ;;  %v10046_v22 = vld [vmem:[#allocation112_spill] sm:$0xff] }
 0x3d2   : > { %v3262_v59 = vpop.permute.xlu1 %3261  ;;  %v3468_v37 = vsel %vm10028_vm12, %v3465_v12, %v3467_v8  ;;  %v5510_v60 = vunpack.i.h.bf16 %v10030_v53  ;;  %v5495_v7 = vunpack.i.h.bf16 %v10029_v35  ;;  %v2892_v12 = vsel %vm2882_vm14, %v2874_v23, %v10031_v63  ;;  %vm10042_vm11 = vmmov %vm10028_vm12  ;;  %v10049_v35 = vld [vmem:[#allocation96_spill] sm:$0xff] }
 0x3d3   : > { %v3381_v61 = vsel %vm10013_vm6, %v3363_v32, %v3262_v59  ;;  %3501 = vrot.lane.b32.xlu1 %v3468_v37, %s5794_s16  ;;  %v5499_v29 = vunpack.i.l.bf16 %v10032_v40  ;;  %v5529_v17 = vunpack.i.l.bf16 %v10033_v54  ;;  %v2927_v48 = vsel %vm2918_vm1, %v2909_v34, %v10034_v58  ;;  %v10048_v32 = vld [vmem:[#allocation35_spill] sm:$0xff] }
 0x3d4   : > { %v8627_v5 = vpop.permute.xlu0 %5617  ;;  %v3399_v6 = vsel %vm2918_vm1, %v3381_v61, %v8227_v38  ;;  %v2961_v47 = vsel %vm2954_vm3, %v2943_v4, %v5489_v21  ;;  %v5500_v28 = vunpack.i.h.bf16 %v10032_v40  ;;  %v5534_v30 = vunpack.i.l.bf16 %v10035_v62 }
 0x3d5   : > { %v3417_v27 = vsel %vm2936_vm2, %v3399_v6, %v8386_v42  ;;  %v2962_v38 = vsel %vm2954_vm3, %v2944_v43, %v5490_v36  ;;  %vm10036_vm15 = vcmask 490496   ;;  %v2910_v15 = vsel %vm10038_vm10, %v2892_v12, %v10037_v26 }
 0x3d6   : > { %v3469_v41 = vrot.slane %v3417_v27, 3  ;;  %v8647_v14 = vpop.permute.xlu1 %5582  ;;  %v2979_v33 = vsel %vm10036_vm15, %v2961_v47, %v5494_v51  ;;  %v5544_v44 = vunpack.i.l.bf16 %v10039_v2  ;;  %v5530_v42 = vunpack.i.h.bf16 %v10033_v54  ;;  %vm10043_vm12 = vmmov %vm10036_vm15 }
 0x3d7   : > { %v2945_v10 = vsel %vm2936_vm2, %v2927_v48, %v10040_v11  ;;  %v5580_v25 = vunpack.i.h.bf16 %v10041_v46  ;;  %v2980_v57 = vsel %vm10043_vm12, %v2962_v38, %v5495_v7  ;;  %v2997_v24 = vsel %vm2990_vm4, %v2979_v33, %v5499_v29  ;;  %vm10045_vm6 = vmmov %vm10043_vm12  ;;  %v10050_v7 = vld [vmem:[#allocation91_spill] sm:$0xff]  ;;  %v10056_v11 = vld [vmem:[#allocation86_spill] sm:$0xff] }
 0x3d8   : > { %v8654_v3 = vpop.permute.xlu0 %5622  ;;  %v3470_v0 = vsel %vm10042_vm11, %v3467_v8, %v3469_v41  ;;  %v2963_v45 = vsel %vm2954_vm3, %v2945_v10, %v5529_v17  ;;  %v5535_v4 = vunpack.i.h.bf16 %v10035_v62  ;;  %v5509_v31 = vunpack.i.l.bf16 %v10030_v53  ;;  %vm10051_vm15 = vmmov %vm10045_vm6  ;;  %v10052_v17 = vld [vmem:[#allocation130_spill] sm:$0xff]  ;;  %v10053_v48 = vld [vmem:[#allocation111_spill] sm:$0xff] }
 0x3d9   : > { %3503 = vrot.lane.b32.xlu1 %v3470_v0, %s5794_s16  ;;  %v2998_v43 = vsel %vm2990_vm4, %v2980_v57, %v5500_v28  ;;  %v2928_v23 = vsel %vm2918_vm1, %v2910_v15, %v10044_v50  ;;  %v2981_v1 = vsel %vm10045_vm6, %v2963_v45, %v5534_v30  ;;  %v5539_v34 = vunpack.i.l.bf16 %v10047_v9  ;;  %v10054_v28 = vld [vmem:[#allocation123_spill] sm:$0xff]  ;;  %v10055_v30 = vld [vmem:[#allocation133_spill] sm:$0xff]  ;;  %v10058_v45 = vld [vmem:[#allocation152_spill] sm:$0xff] }
 0x3da   : > { %v3480_v8 = vpop.permute.xlu1 %3479  ;;  %v2946_v21 = vsel %vm2936_vm2, %v2928_v23, %v10046_v22  ;;  %v2875_v59 = vsel %vm2864_vm13, %v10048_v32, %v5544_v44  ;;  %v5515_v51 = vunpack.i.h.bf16 %v10049_v35  ;;  %v3015_v61 = vsel %vm3008_vm9, %v2997_v24, %v5509_v31  ;;  %vm10059_vm11 = vmmov %vm10038_vm10 }
 0x3db   : > { %4654 = vmatprep.mubr.msk.f32.mxu1 %vm3566_vm7, %v3480_v8  ;;  %v3527_v36 = vsel %vm3522_vm8, %v3067_v20, %v3480_v8  ;;  %v2964_v53 = vsel %vm2954_vm3, %v2946_v21, %v5530_v42  ;;  %v2878_v63 = vsel %vm2864_vm13, %v10050_v7, %v5580_v25  ;;  %v5514_v12 = vunpack.i.l.bf16 %v10049_v35  ;;  %v10062_v21 = vld [vmem:[#allocation119_spill] sm:$0xff]  ;;  %v10064_v35 = vld [vmem:[#allocation157_spill] sm:$0xff] }
 0x3dc   : > { %v8676_v37 = vpop.permute.xlu0 %5632  ;;  %3689 = vmatmul.mubr.f32.gmra.mrb[8].mxu1 %v3527_v36  ;;  %v2982_v6 = vsel %vm10051_vm15, %v2964_v53, %v5535_v4  ;;  %v2999_v40 = vsel %vm2990_vm4, %v2981_v1, %v5539_v34  ;;  %v5545_v29 = vunpack.i.h.bf16 %v10039_v2  ;;  %v3016_v20 = vsel %vm3008_vm9, %v2998_v43, %v5510_v60  ;;  %v10061_v43 = vld [vmem:[#allocation108_spill] sm:$0xff]  ;;  %v10063_v34 = vld [vmem:[#allocation99_spill] sm:$0xff] }
 0x3dd   : > { %v5540_v54 = vunpack.i.h.bf16 %v10047_v9  ;;  %v5549_v58 = vunpack.i.l.bf16 %v10052_v17  ;;  %v2893_v27 = vsel %vm2882_vm14, %v2875_v59, %v10053_v48  ;;  %v5524_v62 = vunpack.i.l.bf16 %v10054_v28 }
 0x3de   : > { %v8694_v47 = vpop.permute.xlu1 %5587  ;;  %v5554_v41 = vunpack.i.l.bf16 %v10055_v30  ;;  %v2896_v38 = vsel %vm2882_vm14, %v2878_v63, %v9926_v16  ;;  %v3033_v26 = vsel %vm3026_vm0, %v3015_v61, %v5514_v12  ;;  %v5479_v60 = vunpack.i.l.bf16 %v10020_v39  ;;  %v10057_v16 = vld [vmem:[#allocation113_spill] sm:$0xff] }
 0x3df   : > { %v3000_v15 = vsel %vm2990_vm4, %v2982_v6, %v5540_v54  ;;  %v3017_v2 = vsel %vm3008_vm9, %v2999_v40, %v5549_v58  ;;  %v5550_v42 = vunpack.i.h.bf16 %v10052_v17  ;;  %v2876_v10 = vsel %vm2864_vm13, %v10056_v11, %v5545_v29  ;;  %v10067_v40 = vld [vmem:[#allocation121_spill] sm:$0xff]  ;;  %v10069_v54 = vld [vmem:[#allocation122_spill] sm:$0xff]  ;;  %v10070_v58 = vld [vmem:[#allocation88_spill] sm:$0xff] }
 0x3e0   : > { %v3482_v33 = vpop.permute.xlu0 %3481  ;;  %v2911_v25 = vsel %vm10038_vm10, %v2893_v27, %v10057_v16  ;;  %v3034_v0 = vsel %vm3026_vm0, %v3016_v20, %v5515_v51  ;;  %v5525_v57 = vunpack.i.h.bf16 %v10054_v28  ;;  %v5555_v24 = vunpack.i.h.bf16 %v10055_v30  ;;  %v10068_v20 = vld [vmem:[#allocation155_spill] sm:$0xff] }
 0x3e1   : > { %4655 = vmatprep.mubr.msk.f32.mxu1 %vm3566_vm7, %v3482_v33  ;;  %v3528_v44 = vsel %vm3522_vm8, %v8630_v52, %v3482_v33  ;;  %v2914_v4 = vsel %vm10059_vm11, %v2896_v38, %v10058_v45  ;;  %vm10060_vm12 = vcmask 687104   ;;  %v5519_v50 = vunpack.i.l.bf16 %v10061_v43  ;;  %v10071_v38 = vld [vmem:[#allocation159_spill] sm:$0xff] }
 0x3e2   : > { %3694 = vmatmul.mubr.f32.gmra.mrb[10].mxu1 %v3528_v44  ;;  %v8717_v31 = vpop.permute.xlu1 %5597  ;;  %v3051_v52 = vsel %vm10060_vm12, %v3033_v26, %v5479_v60  ;;  %v3018_v23 = vsel %vm3008_vm9, %v3000_v15, %v5550_v42  ;;  %v3035_v1 = vsel %vm3026_vm0, %v3017_v2, %v5554_v41  ;;  %v2894_v9 = vsel %vm2882_vm14, %v2876_v10, %v10062_v21  ;;  %vm10065_vm6 = vmmov %vm10060_vm12  ;;  %v10072_v60 = vld [vmem:[#allocation156_spill] sm:$0xff]  ;;  %v10075_v11 = vld [vmem:[#allocation143_spill] sm:$0xff] }
 0x3e3   : > { %v3069_v22 = vsel %vm3062_vm5, %v3051_v52, %v5524_v62  ;;  %v2929_v32 = vsel %vm2918_vm1, %v2911_v25, %v10063_v34  ;;  %v5579_v59 = vunpack.i.l.bf16 %v10041_v46  ;;  %v5564_v51 = vunpack.i.l.bf16 %v10064_v35  ;;  %vm10066_vm15 = vmmov %vm10065_vm6  ;;  %v10078_v21 = vld [vmem:[#allocation145_spill] sm:$0xff] }
 0x3e4   : > { %v3484_v8 = vpop.permute.xlu0 %3483  ;;  %v2932_v61 = vsel %vm2918_vm1, %v2914_v4, %v9933_v49  ;;  %v3052_v53 = vsel %vm10065_vm6, %v3034_v0, %v5480_v18  ;;  %v5520_v7 = vunpack.i.h.bf16 %v10061_v43  ;;  %v3036_v63 = vsel %vm3026_vm0, %v3018_v23, %v5555_v24  ;;  %vm10074_vm12 = vmmov %vm10065_vm6  ;;  %v10076_v24 = vld [vmem:[#allocation103_spill] sm:$0xff] }
 0x3e5   : > { %4656 = vmatprep.mubr.msk.f32.mxu1 %vm3566_vm7, %v3484_v8  ;;  %v3529_v36 = vsel %vm3522_vm8, %v3069_v22, %v3484_v8  ;;  %v3070_v46 = vsel %vm3062_vm5, %v3052_v53, %v5525_v57  ;;  %v3053_v6 = vsel %vm10066_vm15, %v3035_v1, %v5519_v50  ;;  %v2912_v29 = vsel %vm10038_vm10, %v2894_v9, %v10067_v40  ;;  %vm10079_vm15 = vmmov %vm10038_vm10  ;;  %v10080_v40 = vld [vmem:[#allocation136_spill] sm:$0xff] }
 0x3e6   : > { %3699 = vmatmul.mubr.f32.gmra.mrb[12].mxu1 %v3529_v36  ;;  %v8739_v12 = vpop.permute.xlu1 %5602  ;;  %v5559_v49 = vunpack.i.l.bf16 %v10068_v20  ;;  %v2947_v39 = vsel %vm2936_vm2, %v2929_v32, %v10069_v54  ;;  %v2877_v48 = vsel %vm2864_vm13, %v10070_v58, %v5579_v59  ;;  %v2950_v27 = vsel %vm2936_vm2, %v2932_v61, %v7816_v55  ;;  %vm10081_vm10 = vmmov %vm10074_vm12 }
 0x3e7   : > { %v5605_v18 = vunpack.i.h.bf16 %v8739_v12  ;;  %v5610_v28 = vunpack.i.h.bf16 %v8600_v19  ;;  %v5560_v30 = vunpack.i.h.bf16 %v10068_v20  ;;  %v2965_v41 = vsel %vm2954_vm3, %v2947_v39, %v5564_v51 }
 0x3e8   : > { %v3486_v17 = vpop.permute.xlu0 %3485  ;;  %v5574_v33 = vunpack.i.l.bf16 %v10071_v38  ;;  %v5569_v15 = vunpack.i.l.bf16 %v10072_v60  ;;  %v5584_v2 = vunpack.i.l.bf16 %v8647_v14  ;;  %vm10073_vm11 = vcmask 490496  }
 0x3e9   : > { %4657 = vmatprep.mubr.msk.f32.mxu1 %vm3566_vm7, %v3486_v17  ;;  %v3530_v62 = vsel %vm3522_vm8, %v3070_v46, %v3486_v17  ;;  %v2968_v26 = vsel %vm2954_vm3, %v2950_v27, %v5605_v18  ;;  %v3054_v42 = vsel %vm10074_vm12, %v3036_v63, %v5520_v7  ;;  %v2895_v10 = vsel %vm2882_vm14, %v2877_v48, %v10075_v11  ;;  %vm10077_vm6 = vmmov %vm10073_vm11 }
 0x3ea   : > { %3704 = vmatmul.mubr.f32.gmra.mrb[14].mxu1 %v3530_v62  ;;  %v5613_v55 = vpop.permute.xlu1 %5612  ;;  %v2986_v44 = vsel %vm10073_vm11, %v2968_v26, %v5610_v28  ;;  %v5589_v16 = vunpack.i.l.bf16 %v8694_v47  ;;  %v3071_v57 = vsel %vm3062_vm5, %v3053_v6, %v5559_v49  ;;  %v2930_v45 = vsel %vm2918_vm1, %v2912_v29, %v10076_v24  ;;  %v10082_v49 = vld [vmem:[#allocation137_spill] sm:$0xff]  ;;  %vm10083_vm11 = vmmov %vm10081_vm10  ;;  %v10084_v62 = vld [vmem:[#allocation146_spill] sm:$0xff] }
 0x3eb   : > { %v5615_v25 = vunpack.i.h.bf16 %v5613_v55  ;;  %v2983_v4 = vsel %vm10077_vm6, %v2965_v41, %v5569_v15  ;;  %v5620_v52 = vunpack.i.h.bf16 %v8627_v5  ;;  %v5625_v23 = vunpack.i.h.bf16 %v8654_v3  ;;  %vm10085_vm12 = vmmov %vm10077_vm6 }
 0x3ec   : > { %v3488_v0 = vpop.permute.xlu0 %3487  ;;  %v3001_v50 = vsel %vm2990_vm4, %v2983_v4, %v5574_v33  ;;  %v3072_v8 = vsel %vm3062_vm5, %v3054_v42, %v5560_v30  ;;  %v5565_v22 = vunpack.i.h.bf16 %v10064_v35  ;;  %v2913_v9 = vsel %vm10079_vm15, %v2895_v10, %v10078_v21  ;;  %vm10086_vm15 = vmmov %vm10081_vm10 }
 0x3ed   : > { %4658 = vmatprep.mubr.msk.f32.mxu1 %vm3566_vm7, %v3488_v0  ;;  %v3531_v43 = vsel %vm3522_vm8, %v3071_v57, %v3488_v0  ;;  %v3004_v1 = vsel %vm2990_vm4, %v2986_v44, %v5615_v25  ;;  %v3019_v34 = vsel %vm3008_vm9, %v3001_v50, %v5584_v2  ;;  %v5599_v51 = vunpack.i.l.bf16 %v8717_v31 }
 0x3ee   : > { %3709 = vmatmul.mubr.f32.gmra.mrb[16].mxu1 %v3531_v43  ;;  %v3022_v32 = vsel %vm3008_vm9, %v3004_v1, %v5620_v52  ;;  %v5628_v59 = vpop.permute.xlu1 %5627  ;;  %v3037_v36 = vsel %vm3026_vm0, %v3019_v34, %v5589_v16  ;;  %v5594_v63 = vunpack.i.l.bf16 %v8573_v56  ;;  %v5635_v35 = vunpack.i.h.bf16 %v8676_v37 }
 0x3ef   : > { %v5630_v61 = vunpack.i.h.bf16 %v5628_v59  ;;  %v3040_v7 = vsel %vm3026_vm0, %v3022_v32, %v5625_v23  ;;  %v5604_v6 = vunpack.i.l.bf16 %v8739_v12  ;;  %v2931_v29 = vsel %vm2918_vm1, %v2913_v9, %v10080_v40  ;;  %v10091_v40 = vld [vmem:[#allocation24_spill] sm:$0xff] }
 0x3f0   : > { %v3490_v53 = vpop.permute.xlu0 %3489  ;;  %v2948_v54 = vsel %vm2936_vm2, %v2930_v45, %v10082_v49  ;;  %v3055_v39 = vsel %vm10083_vm11, %v3037_v36, %v5594_v63  ;;  %v5575_v58 = vunpack.i.h.bf16 %v10071_v38  ;;  %v5570_v27 = vunpack.i.h.bf16 %v10072_v60  ;;  %v10087_v36 = vld [vmem:[#allocation16_spill] sm:$0xff] }
 0x3f1   : > { %4659 = vmatprep.mubr.msk.f32.mxu1 %vm3566_vm7, %v3490_v53  ;;  %v3532_v46 = vsel %vm3522_vm8, %v3072_v8, %v3490_v53  ;;  %v3058_v20 = vsel %vm10081_vm10, %v3040_v7, %v5630_v61  ;;  %v2966_v17 = vsel %vm2954_vm3, %v2948_v54, %v5565_v22  ;;  %v3073_v12 = vsel %vm3062_vm5, %v3055_v39, %v5599_v51  ;;  %v10088_v53 = vld [vmem:[#allocation163_spill] sm:$0xff]  ;;  %v10093_v54 = vld [vmem:[#allocation36_spill] sm:$0xff] }
 0x3f2   : > { %3714 = vmatmul.mubr.f32.gmra.mrb[18].mxu1 %v3532_v46  ;;  %v3076_v18 = vsel %vm3062_vm5, %v3058_v20, %v5635_v35  ;;  %v5585_v28 = vunpack.i.h.bf16 %v8647_v14  ;;  %v2949_v30 = vsel %vm2936_vm2, %v2931_v29, %v10084_v62  ;;  %v5590_v33 = vunpack.i.h.bf16 %v8694_v47  ;;  %v8817_v10 = vpop.permute.xlu1 %5642  ;;  %v10090_v35 = vld [vmem:[#allocation160_spill] sm:$0xff]  ;;  %v10092_v20 = vld [vmem:[#allocation162_spill] sm:$0xff] }
 0x3f3   : > { %v2967_v26 = vsel %vm2954_vm3, %v2949_v30, %v5604_v6  ;;  %v5614_v15 = vunpack.i.l.bf16 %v5613_v55  ;;  %v2984_v38 = vsel %vm10085_vm12, %v2966_v17, %v5570_v27  ;;  %v5609_v2 = vunpack.i.l.bf16 %v8600_v19 }
 0x3f4   : > { %v3492_v48 = vpop.permute.xlu0 %3491  ;;  %v3002_v60 = vsel %vm2990_vm4, %v2984_v38, %v5575_v58  ;;  %v5600_v11 = vunpack.i.h.bf16 %v8717_v31  ;;  %v5595_v55 = vunpack.i.h.bf16 %v8573_v56  ;;  %v5619_v16 = vunpack.i.l.bf16 %v8627_v5  ;;  %v10097_v38 = vld [vmem:[#allocation161_spill] sm:$0xff] }
 0x3f5   : > { %4660 = vmatprep.mubr.msk.f32.mxu1 %vm3566_vm7, %v3492_v48  ;;  %v3533_v41 = vsel %vm3522_vm8, %v3073_v12, %v3492_v48  ;;  %v3020_v14 = vsel %vm3008_vm9, %v3002_v60, %v5585_v28  ;;  %v2985_v44 = vsel %vm10077_vm6, %v2967_v26, %v5609_v2  ;;  %v5624_v57 = vunpack.i.l.bf16 %v8654_v3  ;;  %v10094_v28 = vld [vmem:[#allocation117_spill] sm:$0xff]  ;;  %v10098_v60 = vld [vmem:[#allocation19_spill] sm:$0xff] }
 0x3f6   : > { %3719 = vmatmul.mubr.f32.gmra.mrb[20].mxu1 %v3533_v41  ;;  %v3038_v42 = vsel %vm3026_vm0, %v3020_v14, %v5590_v33  ;;  %v3003_v47 = vsel %vm2990_vm4, %v2985_v44, %v5614_v15  ;;  %v5629_v4 = vunpack.i.l.bf16 %v5628_v59  ;;  %v5634_v43 = vunpack.i.l.bf16 %v8676_v37  ;;  %v10096_v41 = vld [vmem:[#allocation50_spill] sm:$0xff] }
 0x3f7   : > { %v3021_v19 = vsel %vm3008_vm9, %v3003_v47, %v5619_v16  ;;  %v3056_v0 = vsel %vm10086_vm15, %v3038_v42, %v5595_v55  ;;  %vm10089_vm11 = vcmask 293888   ;;  %v10099_v55 = vld [vmem:[#allocation18_spill] sm:$0xff]  ;;  %vm10102_vm15 = vmmov %vm10081_vm10 }
 0x3f8   : > { %v5638_v25 = vpop.permute.xlu0 %5637  ;;  %v3074_v45 = vsel %vm3062_vm5, %v3056_v0, %v5600_v11  ;;  %v3039_v56 = vsel %vm3026_vm0, %v3021_v19, %v5624_v57  ;;  %vm10095_vm12 = vmmov %vm10089_vm11  ;;  %v10100_v19 = vld [vmem:[#allocation107_spill] sm:$0xff]  ;;  %v5645_v57 = vunpack.i.h.bf16 %v8817_v10 }
 0x3f9   : > { %v3057_v5 = vsel %vm10081_vm10, %v3039_v56, %v5629_v4  ;;  %v5639_v9 = vunpack.i.l.bf16 %v5638_v25  ;;  %v5640_v63 = vunpack.i.h.bf16 %v5638_v25 }
 0x3fa   : > { %v3075_v3 = vsel %vm3062_vm5, %v3057_v5, %v5634_v43  ;;  %v10103_v5 = vld [vmem:[#allocation17_spill] sm:$0xff] }
 0x3fb   : > { %v2879_v59 = vsel %vm2864_vm13, %v8122_v13, %v5639_v9  ;;  %v2880_v29 = vsel %vm2864_vm13, %v10091_v40, %v5640_v63  ;;  %v5644_v13 = vunpack.i.l.bf16 %v8817_v10  ;;  %v10105_v9 = vld [vmem:[#allocation116_spill] sm:$0xff] }
 0x3fc   : > { %v8828_v52 = vpop.permute.xlu0 %5647  ;;  %v2897_v51 = vsel %vm2882_vm14, %v2879_v59, %v10087_v36  ;;  %v2898_v39 = vsel %vm2882_vm14, %v2880_v29, %v10093_v54 }
 0x3fd   : > { %v3494_v24 = vpop.permute.xlu1 %3493  ;;  %v2915_v7 = vsel %vm10089_vm11, %v2897_v51, %v10088_v53  ;;  %v5649_v48 = vunpack.i.l.bf16 %v8828_v52  ;;  %v2916_v62 = vsel %vm10095_vm12, %v2898_v39, %v10094_v28 }
 0x3fe   : > { %4661 = vmatprep.mubr.msk.f32.mxu1 %vm3566_vm7, %v3494_v24  ;;  %v3534_v31 = vsel %vm3522_vm8, %v3074_v45, %v3494_v24  ;;  %v2933_v46 = vsel %vm2918_vm1, %v2915_v7, %v10090_v35  ;;  %v2934_v2 = vsel %vm2918_vm1, %v2916_v62, %v10097_v38 }
 0x3ff   : > { %3724 = vmatmul.mubr.f32.gmra.mrb[22].mxu1 %v3534_v31  ;;  %v2951_v49 = vsel %vm2936_vm2, %v2933_v46, %v10092_v20  ;;  %v2952_v16 = vsel %vm2936_vm2, %v2934_v2, %v10099_v55 }
 0x400   : > { %v2091_v1 = vpop.permute.xlu0 %2090  ;;  %v2970_v31 = vsel %vm2954_vm3, %v2952_v16, %v5645_v57 }
 0x401   : > { %v2881_v33 = vsel %vm2864_vm13, %v10096_v41, %v2091_v1  ;;  %vm10101_vm13 = vmmov %vm10089_vm11 }
 0x402   : > { %v2899_v14 = vsel %vm2882_vm14, %v2881_v33, %v10098_v60  ;;  %vm10104_vm14 = vmmov %vm10077_vm6 }
 0x403   : > { %v2917_v25 = vsel %vm10101_vm13, %v2899_v14, %v10100_v19  ;;  %vm10116_vm13 = vcmask 1042432  }
 0x404   : > { %v8835_v8 = vpop.permute.xlu0 %5667  ;;  %v2935_v43 = vsel %vm2918_vm1, %v2917_v25, %v10103_v5  ;;  %vm10106_vm1 = vmmov %vm10077_vm6 }
 0x405   : > { %v3496_v50 = vpop.permute.xlu1 %3495  ;;  %v5669_v47 = vunpack.i.l.bf16 %v8835_v8  ;;  %v5670_v7 = vunpack.i.h.bf16 %v8835_v8 }
 0x406   : > { %4662 = vmatprep.mubr.msk.f32.mxu1 %vm3566_vm7, %v3496_v50  ;;  %v3535_v23 = vsel %vm3522_vm8, %v3075_v3, %v3496_v50  ;;  %v5650_v3 = vunpack.i.h.bf16 %v8828_v52 }
 0x407   : > { %3729 = vmatmul.mubr.f32.gmra.mrb[24].mxu1 %v3535_v23 }
 0x408   : > { %v2485_v22 = vpop.permute.xlu0 %2484  ;;  %v2988_v10 = vsel %vm10104_vm14, %v2970_v31, %v5650_v3 }
 0x409   : > { %v5653_v34 = vpop.permute.xlu1 %5652 }
 0x40a   : > { %v5654_v17 = vunpack.i.l.bf16 %v5653_v34  ;;  %v5655_v56 = vunpack.i.h.bf16 %v5653_v34 }
 0x40c   : > { %v8837_v21 = vpop.permute.xlu0 %2626 }
 0x40d   : > { %v5658_v61 = vpop.permute.xlu1 %5657 }
 0x40e   : > { %v5659_v12 = vunpack.i.l.bf16 %v5658_v61  ;;  %v5660_v23 = vunpack.i.h.bf16 %v5658_v61 }
 0x411   : > { %v5663_v6 = vpop.permute.xlu1 %5662 }
 0x412   : > { %v5664_v27 = vunpack.i.l.bf16 %v5663_v6  ;;  %v5665_v1 = vunpack.i.h.bf16 %v5663_v6 }
 0x415   : > { %v5673_v58 = vpop.permute.xlu1 %5672 }
 0x416   : > { %v5674_v42 = vunpack.i.l.bf16 %v5673_v58  ;;  %v5675_v51 = vunpack.i.h.bf16 %v5673_v58 }
 0x419   : > { %v2427_v11 = vpop.permute.xlu1 %2426 }
 0x41d   : > { %v2572_v50 = vpop.permute.xlu1 %2571 }
 0x41f   : > { %v3498_v32 = vpop.permute.xlu0 %3497 }
 0x420   : > { %4663 = vmatprep.mubr.msk.f32.mxu1 %vm3566_vm7, %v3498_v32  ;;  %v3536_v37 = vsel %vm3522_vm8, %v3076_v18, %v3498_v32  ;;  %v2969_v18 = vsel %vm2954_vm3, %v2951_v49, %v5644_v13  ;;  %v2953_v32 = vsel %vm2936_vm2, %v2935_v43, %v10105_v9 }
 0x421   : > { %3734 = vmatmul.mubr.f32.gmra.mrb[26].mxu1 %v3536_v37  ;;  %v2987_v30 = vsel %vm10077_vm6, %v2969_v18, %v5649_v48  ;;  %v3006_v37 = vsel %vm2990_vm4, %v2988_v10, %v5655_v56  ;;  %v2971_v59 = vsel %vm2954_vm3, %v2953_v32, %v2427_v11  ;;  %v2733_v53 = vpop.permute.xlu1 %2732  ;;  %vm10107_vm3 = vmmov %vm10081_vm10 }
 0x422   : > { %v3005_v26 = vsel %vm2990_vm4, %v2987_v30, %v5654_v17  ;;  %v3024_v34 = vsel %vm3008_vm9, %v3006_v37, %v5660_v23  ;;  %v2989_v52 = vsel %vm10106_vm1, %v2971_v59, %v2485_v22 }
 0x423   : > { %v3023_v15 = vsel %vm3008_vm9, %v3005_v26, %v5659_v12  ;;  %v3042_v36 = vsel %vm3026_vm0, %v3024_v34, %v5665_v1  ;;  %v3007_v63 = vsel %vm2990_vm4, %v2989_v52, %v2572_v50 }
 0x424   : > { %v3041_v44 = vsel %vm3026_vm0, %v3023_v15, %v5664_v27  ;;  %v3060_v35 = vsel %vm10081_vm10, %v3042_v36, %v5670_v7  ;;  %v3025_v40 = vsel %vm3008_vm9, %v3007_v63, %v8837_v21  ;;  %v8908_v21 = vld [vmem:[%s9404_s4] ss:$0 sm:$0xff] }
 0x425   : > { %v3059_v0 = vsel %vm10102_vm15, %v3041_v44, %v5669_v47  ;;  %v3078_v6 = vsel %vm3062_vm5, %v3060_v35, %v5675_v51  ;;  %vm10117_vm15 = vcmask 1043456  }
 0x426   : > { %v3077_v45 = vsel %vm3062_vm5, %v3059_v0, %v5674_v42 }
 0x439   : > { %v3500_v24 = vpop.permute.xlu0 %3499 }
 0x43a   : > { %4664 = vmatprep.mubr.msk.f32.mxu1 %vm3566_vm7, %v3500_v24  ;;  %v3537_v4 = vsel %vm3522_vm8, %v3077_v45, %v3500_v24 }
 0x43b   : > { %3739 = vmatmul.mubr.f32.gmra.mrb[28].mxu1 %v3537_v4 }
 0x43d   : > { %v2682_v61 = vpop.permute.xlu0 %2681 }
 0x43e   : > { %v3043_v20 = vsel %vm3026_vm0, %v3025_v40, %v2682_v61  ;;  %vm10108_vm0 = vcmask 1046528  }
 0x43f   : > { %v3061_v22 = vsel %vm10107_vm3, %v3043_v20, %v2733_v53  ;;  %vm10109_vm4 = vmmov %vm10108_vm0 }
 0x440   : > { %vm10118_vm14 = vmmov %vm10108_vm0 }
 0x441   : > { %v2792_v8 = vpop.permute.xlu0 %2791  ;;  %vm10119_vm1 = vmmov %vm10108_vm0 }
 0x442   : > { %v3079_v49 = vsel %vm3062_vm5, %v3061_v22, %v2792_v8  ;;  %vm10110_vm5 = vcmask 1041408  }
 0x443   : > { %vm10112_vm9 = vmmov %vm10110_vm5 }
 0x444   : > { %vm10115_vm6 = vmmov %vm10110_vm5 }
 0x445   : > { %v3502_v46 = vpop.permute.xlu1 %3501  ;;  %vm10120_vm10 = vmmov %vm10110_vm5 }
 0x446   : > { %4665 = vmatprep.mubr.msk.f32.mxu1 %vm3566_vm7, %v3502_v46  ;;  %v3538_v29 = vsel %vm3522_vm8, %v3078_v6, %v3502_v46 }
 0x447   : > { %3744 = vmatmul.mubr.f32.gmra.mrb[30].mxu1 %v3538_v29 }
 0x44b   : > { %v3504_v13 = vpop.permute.xlu1 %3503 }
 0x44c   : > { %4666 = vmatprep.mubr.msk.f32.mxu1 %vm3566_vm7, %v3504_v13  ;;  %v3539_v54 = vsel %vm3522_vm8, %v3079_v49, %v3504_v13  ;;  %vm10111_vm7 = vcmask 1040384  }
 0x44d   : > { %3749 = vmatmul.mubr.f32.gmra.mrb[32].mxu1 %v3539_v54  ;;  %vm10113_vm11 = vmmov %vm10111_vm7 }
 0x44e   : > { %vm10114_vm12 = vmmov %vm10111_vm7 }
 0x44f   : > { %vm10121_vm3 = vmmov %vm10111_vm7 }
 0x491   : > { %v3670_v39 = vpop.f32.mrb[0].mxu1 }
 0x492   : > { %v3671_v18 = vadd.f32 %v8908_v21, %v3670_v39  ;;  %v3672_v17 = vpop.f32.mrb[1].mxu1 }
 0x494   : > { %v3754_v48 = vmax.f32 %v3671_v18, 0.0 }
 0x495   : > { %v3675_v58 = vpop.f32.mrb[2].mxu1 }
 0x496   : > { %v3676_v12 = vadd.f32 %v8908_v21, %v3675_v58  ;;  %v3677_v27 = vpop.f32.mrb[3].mxu1  ;;  %v3785_v30 = vrot.slane %v3754_v48, 1 }
 0x498   : > { %v3755_v28 = vmax.f32 %v3676_v12, 0.0 }
 0x499   : > { %v3680_v62 = vpop.f32.mrb[4].mxu1 }
 0x49a   : > { %v3786_v41 = vrot.slane %v3755_v28, 1  ;;  %v3681_v33 = vadd.f32 %v8908_v21, %v3680_v62  ;;  %v3682_v26 = vpop.f32.mrb[5].mxu1  ;;  %v3831_v2 = vrot.slane %v3755_v28, 6  ;;  %v3874_v60 = vrot.slane %v3755_v28, 7 }
 0x49c   : > { %v3787_v15 = vsel %vm10108_vm0, %v3785_v30, %v3786_v41  ;;  %v3756_v38 = vmax.f32 %v3681_v33, 0.0  ;;  %vm10122_vm0 = vmmov %vm10110_vm5 }
 0x49d   : > { %v3818_v14 = vadd.f32 %v3787_v15, %v3754_v48  ;;  %v3685_v44 = vpop.f32.mrb[6].mxu1 }
 0x49e   : > { %v3788_v42 = vrot.slane %v3756_v38, 1  ;;  %v3832_v11 = vrot.slane %v3756_v38, 6  ;;  %v3875_v47 = vrot.slane %v3756_v38, 7  ;;  %v3686_v55 = vadd.f32 %v8908_v21, %v3685_v44  ;;  %v3687_v16 = vpop.f32.mrb[7].mxu1 }
 0x4a0   : > { %v3789_v19 = vsel %vm10109_vm4, %v3786_v41, %v3788_v42  ;;  %v3833_v25 = vsel %vm10110_vm5, %v3831_v2, %v3832_v11  ;;  %v3876_v0 = vsel %vm10111_vm7, %v3874_v60, %v3875_v47  ;;  %v3757_v57 = vmax.f32 %v3686_v55, 0.0  ;;  %vm10123_vm4 = vmmov %vm10121_vm3 }
 0x4a1   : > { %v3819_v24 = vadd.f32 %v3789_v19, %v3755_v28  ;;  %v3864_v45 = vadd.f32 %v3833_v25, %v3818_v14  ;;  %vm10124_vm5 = vcmask 1044480   ;;  %v4120_v19 = vld [vmem:[%s9405_s5 + $0x80] sm:$0xff]  ;;  %v4121_v25 = vld [vmem:[%s9405_s5 + $0x88] sm:$0xff]  ;;  %vm10125_vm7 = vcmask 1045504  }
 0x4a2   : > { %v3834_v4 = vrot.slane %v3757_v57, 6  ;;  %v3877_v31 = vrot.slane %v3757_v57, 7  ;;  %v3790_v52 = vrot.slane %v3757_v57, 1 }
 0x4a3   : > { %v3907_v56 = vadd.f32 %v3876_v0, %v3864_v45  ;;  %v4104_v0 = vld [vmem:[%s9405_s5] sm:$0xff]  ;;  %v5104_v45 = vpack.c.bf16 %v4121_v25, %v4120_v19 }
 0x4a4   : > { %v3835_v5 = vsel %vm10112_vm9, %v3832_v11, %v3834_v4  ;;  %v3878_v43 = vsel %vm10113_vm11, %v3875_v47, %v3877_v31  ;;  %v4105_v4 = vld [vmem:[%s9405_s5 + $0x8] sm:$0xff]  ;;  %v4122_v31 = vld [vmem:[%s9405_s5 + $0x90] sm:$0xff]  ;;  %vm10126_vm9 = vmmov %vm10119_vm1 }
 0x4a5   : > { %v3918_v50 = vrot.slane %v3907_v56, 1  ;;  %v3920_v3 = vrot.slane %v3907_v56, 2  ;;  %v3865_v23 = vadd.f32 %v3835_v5, %v3819_v24  ;;  %v3922_v1 = vrot.slane %v3907_v56, 3  ;;  %5105 = vmatprep.subr.bf16.mxu1 %v5104_v45  ;;  %vm10127_vm11 = vmmov %vm10119_vm1 }
 0x4a7   : > { %v3950_v10 = vsel %vm10114_vm12, %v3907_v56, %v3918_v50  ;;  %v3908_v9 = vadd.f32 %v3878_v43, %v3865_v23  ;;  %v4123_v56 = vld [vmem:[%s9405_s5 + $0x98] sm:$0xff]  ;;  %v5106_v50 = vpack.c.bf16 %v4105_v4, %v4104_v0  ;;  %vm10128_vm12 = vmmov %vm10119_vm1 }
 0x4a8   : > { %v3951_v32 = vsel %vm10115_vm6, %v3950_v10, %v3920_v3  ;;  %v4106_v3 = vld [vmem:[%s9405_s5 + $0x10] sm:$0xff]  ;;  %v4107_v23 = vld [vmem:[%s9405_s5 + $0x18] sm:$0xff]  ;;  %vm10129_vm6 = vmmov %vm10122_vm0 }
 0x4a9   : > { %v3925_v37 = vrot.slane %v3908_v9, 4  ;;  %v3952_v59 = vsel %vm10116_vm13, %v3951_v32, %v3922_v1  ;;  %5107 = vmatpush3.bf16.msra.mxu1 %v5106_v50  ;;  %vm10130_vm13 = vmmov %vm10121_vm3 }
 0x4ab   : > { %v3953_v34 = vsel %vm10117_vm15, %v3952_v59, %v3925_v37  ;;  %v4124_v37 = vld [vmem:[%s9405_s5 + $0xa0] sm:$0xff]  ;;  %v4125_v59 = vld [vmem:[%s9405_s5 + $0xa8] sm:$0xff]  ;;  %vm10131_vm15 = vmmov %vm10122_vm0 }
 0x4af   : > { %v3690_v36 = vpop.f32.mrb[8].mxu1 }
 0x4b0   : > { %v3691_v51 = vadd.f32 %v8908_v21, %v3690_v36  ;;  %v3692_v53 = vpop.f32.mrb[9].mxu1  ;;  %v5108_v36 = vpack.c.bf16 %v4123_v56, %v4122_v31 }
 0x4b1   : > { %v4108_v53 = vld [vmem:[%s9405_s5 + $0x20] sm:$0xff] }
 0x4b2   : > { %v3758_v7 = vmax.f32 %v3691_v51, 0.0  ;;  %v5110_v51 = vpack.c.bf16 %v4107_v23, %v4106_v3  ;;  %5109 = vmatprep.subr.bf16.mxu1 %v5108_v36 }
 0x4b4   : > { %v3791_v61 = vrot.slane %v3758_v7, 1  ;;  %v3836_v20 = vrot.slane %v3758_v7, 6  ;;  %v3879_v8 = vrot.slane %v3758_v7, 7  ;;  %5111 = vmatpush3.bf16.msra.mxu1 %v5110_v51 }
 0x4b5   : > { %v3695_v63 = vpop.f32.mrb[10].mxu1 }
 0x4b6   : > { %v3696_v35 = vadd.f32 %v8908_v21, %v3695_v63  ;;  %v3697_v46 = vpop.f32.mrb[11].mxu1  ;;  %v3792_v6 = vsel %vm10118_vm14, %v3790_v52, %v3791_v61  ;;  %v4109_v63 = vld [vmem:[%s9405_s5 + $0x28] sm:$0xff]  ;;  %vm10132_vm14 = vmmov %vm10121_vm3 }
 0x4b7   : > { %v3820_v29 = vadd.f32 %v3792_v6, %v3757_v57  ;;  %v4127_v46 = vld [vmem:[%s9405_s5 + $0xb8] sm:$0xff] }
 0x4b8   : > { %v3759_v40 = vmax.f32 %v3696_v35, 0.0  ;;  %v4126_v35 = vld [vmem:[%s9405_s5 + $0xb0] sm:$0xff] }
 0x4b9   : > { %v3700_v22 = vpop.f32.mrb[12].mxu1 }
 0x4ba   : > { %v3793_v49 = vrot.slane %v3759_v40, 1  ;;  %v3837_v13 = vrot.slane %v3759_v40, 6  ;;  %v3880_v54 = vrot.slane %v3759_v40, 7  ;;  %v3701_v39 = vadd.f32 %v8908_v21, %v3700_v22  ;;  %v3702_v18 = vpop.f32.mrb[13].mxu1 }
 0x4bb   : > { %v5116_v18 = vpack.c.bf16 %v4127_v46, %v4126_v35 }
 0x4bc   : > { %v3794_v17 = vsel %vm10119_vm1, %v3791_v61, %v3793_v49  ;;  %v3838_v58 = vsel %vm10120_vm10, %v3836_v20, %v3837_v13  ;;  %v3881_v48 = vsel %vm10121_vm3, %v3879_v8, %v3880_v54  ;;  %v3760_v12 = vmax.f32 %v3701_v39, 0.0  ;;  %vm10133_vm1 = vmmov %vm10121_vm3 }
 0x4bd   : > { %v3866_v27 = vadd.f32 %v3838_v58, %v3820_v29  ;;  %v3821_v28 = vadd.f32 %v3794_v17, %v3758_v7  ;;  %v3705_v62 = vpop.f32.mrb[14].mxu1  ;;  %v5112_v61 = vpack.c.bf16 %v4125_v59, %v4124_v37  ;;  %v5114_v39 = vpack.c.bf16 %v4109_v63, %v4108_v53  ;;  %vm10134_vm10 = vmmov %vm10122_vm0 }
 0x4be   : > { %v3839_v30 = vrot.slane %v3760_v12, 6  ;;  %v3882_v41 = vrot.slane %v3760_v12, 7  ;;  %v3706_v33 = vadd.f32 %v8908_v21, %v3705_v62  ;;  %v3707_v26 = vpop.f32.mrb[15].mxu1  ;;  %vm10135_vm3 = vcmask 1042432  }
 0x4bf   : > { %v3909_v15 = vadd.f32 %v3881_v48, %v3866_v27  ;;  %5113 = vmatprep.subr.bf16.mxu1 %v5112_v61  ;;  %v4110_v27 = vld [vmem:[%s9405_s5 + $0x30] sm:$0xff] }
 0x4c0   : > { %v3840_v38 = vsel %vm10122_vm0, %v3837_v13, %v3839_v30  ;;  %v3883_v2 = vsel %vm10123_vm4, %v3880_v54, %v3882_v41  ;;  %v3761_v42 = vmax.f32 %v3706_v33, 0.0  ;;  %5115 = vmatpush3.bf16.msra.mxu1 %v5114_v39  ;;  %vm10136_vm0 = vcmask 1043456   ;;  %vm10137_vm4 = vmmov %vm10124_vm5  ;;  %v4130_v39 = vld [vmem:[%s9405_s5 + $0xd0] sm:$0xff] }
 0x4c1   : > { %v3928_v60 = vrot.slane %v3909_v15, 7  ;;  %v3867_v14 = vadd.f32 %v3840_v38, %v3821_v28  ;;  %v3710_v44 = vpop.f32.mrb[16].mxu1  ;;  %v4111_v28 = vld [vmem:[%s9405_s5 + $0x38] sm:$0xff]  ;;  %5117 = vmatprep.subr.bf16.mxu1 %v5116_v18 }
 0x4c2   : > { %v3711_v11 = vadd.f32 %v8908_v21, %v3710_v44  ;;  %v3712_v47 = vpop.f32.mrb[17].mxu1  ;;  %v3795_v1 = vrot.slane %v3761_v42, 1  ;;  %v4131_v18 = vld [vmem:[%s9405_s5 + $0xd8] sm:$0xff] }
 0x4c3   : > { %v3954_v55 = vsel %vm10124_vm5, %v3953_v34, %v3928_v60  ;;  %v8936_v16 = vadd.f32 %v3883_v2, %v3867_v14  ;;  %v5118_v2 = vpack.c.bf16 %v4111_v28, %v4110_v27  ;;  %vm10138_vm5 = vmmov %vm10125_vm7 }
 0x4c4   : > { %v3955_v57 = vsel %vm10125_vm7, %v3954_v55, %v3909_v15  ;;  %v3762_v24 = vmax.f32 %v3711_v11, 0.0  ;;  %vm10139_vm7 = vmmov %vm10126_vm9 }
 0x4c5   : > { %v3931_v5 = vrot.slane %v8936_v16, 1  ;;  %v3715_v43 = vpop.f32.mrb[18].mxu1  ;;  %v3933_v41 = vrot.slane %v8936_v16, 2  ;;  %v3935_v33 = vrot.slane %v8936_v16, 3  ;;  %5119 = vmatpush3.bf16.msra.mxu1 %v5118_v2 }
 0x4c6   : > { %v3796_v10 = vrot.slane %v3762_v24, 1  ;;  %v3716_v9 = vadd.f32 %v8908_v21, %v3715_v43  ;;  %v3717_v32 = vpop.f32.mrb[19].mxu1  ;;  %v3841_v6 = vrot.slane %v3762_v24, 6  ;;  %v3884_v40 = vrot.slane %v3762_v24, 7 }
 0x4c7   : > { %v8972_v34 = vsel %vm10126_vm9, %v3955_v57, %v3931_v5  ;;  %v3957_v47 = vsel %vm10133_vm1, %v3933_v41, %v3935_v33  ;;  %vm10140_vm9 = vmmov %vm10139_vm7  ;;  %v4132_v41 = vld [vmem:[%s9405_s5 + $0xe0] sm:$0xff]  ;;  %v4133_v33 = vld [vmem:[%s9405_s5 + $0xe8] sm:$0xff] }
 0x4c8   : > { %v3797_v7 = vsel %vm10127_vm11, %v3795_v1, %v3796_v10  ;;  %v3763_v52 = vmax.f32 %v3716_v9, 0.0  ;;  %vm10141_vm11 = vmmov %vm10129_vm6 }
 0x4c9   : > { %v3822_v29 = vadd.f32 %v3797_v7, %v3761_v42  ;;  %v3720_v20 = vpop.f32.mrb[20].mxu1 }
 0x4ca   : > { %v3798_v8 = vrot.slane %v3763_v52, 1  ;;  %v3842_v22 = vrot.slane %v3763_v52, 6  ;;  %v3885_v49 = vrot.slane %v3763_v52, 7  ;;  %v3721_v13 = vadd.f32 %v8908_v21, %v3720_v20  ;;  %v3722_v54 = vpop.f32.mrb[21].mxu1 }
 0x4cc   : > { %v3799_v17 = vsel %vm10128_vm12, %v3796_v10, %v3798_v8  ;;  %v3843_v58 = vsel %vm10129_vm6, %v3841_v6, %v3842_v22  ;;  %v3886_v48 = vsel %vm10130_vm13, %v3884_v40, %v3885_v49  ;;  %v3764_v12 = vmax.f32 %v3721_v13, 0.0  ;;  %vm10142_vm12 = vmmov %vm10133_vm1  ;;  %v4128_v6 = vld [vmem:[%s9405_s5 + $0xc0] sm:$0xff]  ;;  %v4129_v40 = vld [vmem:[%s9405_s5 + $0xc8] sm:$0xff] }
 0x4cd   : > { %v3823_v62 = vadd.f32 %v3799_v17, %v3762_v24  ;;  %v3868_v30 = vadd.f32 %v3843_v58, %v3822_v29  ;;  %v4112_v29 = vld [vmem:[%s9405_s5 + $0x40] sm:$0xff]  ;;  %v5120_v20 = vpack.c.bf16 %v4129_v40, %v4128_v6  ;;  %v4113_v8 = vld [vmem:[%s9405_s5 + $0x48] sm:$0xff]  ;;  %v9040_v13 = vmul.f32 0.25, %v8972_v34  ;;  %vm10143_vm6 = vmmov %vm10139_vm7 }
 0x4ce   : > { %v3844_v26 = vrot.slane %v3764_v12, 6  ;;  %v3887_v15 = vrot.slane %v3764_v12, 7  ;;  %v3800_v43 = vrot.slane %v3764_v12, 1  ;;  %v4114_v17 = vld [vmem:[%s9405_s5 + $0x50] sm:$0xff]  ;;  %v5124_v34 = vpack.c.bf16 %v4131_v18, %v4130_v39  ;;  %vm10145_vm13 = vmmov %vm10134_vm10 }
 0x4cf   : > { %v3911_v38 = vadd.f32 %v3886_v48, %v3868_v30  ;;  %5121 = vmatprep.subr.bf16.mxu1 %v5120_v20  ;;  %v4115_v48 = vld [vmem:[%s9405_s5 + $0x58] sm:$0xff]  ;;  %v3996_v27 = vrot.slane %v9040_v13, 2 }
 0x4d0   : > { %v3845_v60 = vsel %vm10131_vm15, %v3842_v22, %v3844_v26  ;;  %v3888_v14 = vsel %vm10132_vm14, %v3885_v49, %v3887_v15  ;;  %v5122_v49 = vpack.c.bf16 %v4113_v8, %v4112_v29  ;;  %v4116_v26 = vld [vmem:[%s9405_s5 + $0x60] sm:$0xff]  ;;  %vm10146_vm15 = vmmov %vm10133_vm1 }
 0x4d1   : > { %v3938_v44 = vrot.slane %v3911_v38, 6  ;;  %v3940_v42 = vrot.slane %v3911_v38, 7  ;;  %v3869_v11 = vadd.f32 %v3845_v60, %v3823_v62  ;;  %v3942_v16 = vrot.slane %v3911_v38, 1  ;;  %vm10147_vm14 = vmmov %vm10133_vm1 }
 0x4d2   : > { %v3725_v25 = vpop.f32.mrb[22].mxu1  ;;  %5123 = vmatpush3.bf16.msra.mxu1 %v5122_v49  ;;  %v3992_v62 = vrot.slane %v9040_v13, 1  ;;  %vm10148_vm1 = vmmov %vm10134_vm10 }
 0x4d3   : > { %v3958_v55 = vsel %vm10134_vm10, %v3957_v47, %v3938_v44  ;;  %v3912_v19 = vadd.f32 %v3888_v14, %v3869_v11  ;;  %v3726_v57 = vadd.f32 %v8908_v21, %v3725_v25  ;;  %v3727_v24 = vpop.f32.mrb[23].mxu1  ;;  %5125 = vmatprep.subr.bf16.mxu1 %v5124_v34  ;;  %v4117_v14 = vld [vmem:[%s9405_s5 + $0x68] sm:$0xff]  ;;  %v5128_v44 = vpack.c.bf16 %v4133_v33, %v4132_v41  ;;  %v4135_v11 = vld [vmem:[%s9405_s5 + $0xf8] sm:$0xff]  ;;  %v4118_v47 = vld [vmem:[%s9405_s5 + $0x70] sm:$0xff] }
 0x4d4   : > { %v3959_v0 = vsel %vm10135_vm3, %v3958_v55, %v3940_v42  ;;  %v4134_v42 = vld [vmem:[%s9405_s5 + $0xf0] sm:$0xff]  ;;  %v4004_v55 = vrot.slane %v9040_v13, 4  ;;  %v5130_v25 = vpack.c.bf16 %v4117_v14, %v4116_v26  ;;  %vm10149_vm10 = vmmov %vm10135_vm3 }
 0x4d5   : > { %v3960_v45 = vsel %vm10136_vm0, %v3959_v0, %v3911_v38  ;;  %v3945_v4 = vrot.slane %v3912_v19, 2  ;;  %v3765_v56 = vmax.f32 %v3726_v57, 0.0  ;;  %v4000_v19 = vrot.slane %v9040_v13, 3  ;;  %v4119_v0 = vld [vmem:[%s9405_s5 + $0x78] sm:$0xff]  ;;  %vm10150_vm3 = vmmov %vm10143_vm6 }
 0x4d6   : > { %v3961_v31 = vsel %vm10137_vm4, %v3960_v45, %v3942_v16  ;;  %v5132_v16 = vpack.c.bf16 %v4135_v11, %v4134_v42  ;;  %vm10151_vm0 = vmmov %vm10148_vm1 }
 0x4d7   : > { %v3962_v5 = vsel %vm10138_vm5, %v3961_v31, %v3945_v4  ;;  %v3801_v50 = vrot.slane %v3765_v56, 1  ;;  %v3846_v37 = vrot.slane %v3765_v56, 6  ;;  %v3889_v59 = vrot.slane %v3765_v56, 7  ;;  %vm10152_vm4 = vmmov %vm10142_vm12 }
 0x4d8   : > { %v5134_v31 = vpack.c.bf16 %v4119_v0, %v4118_v47  ;;  %vm10153_vm5 = vcmask 1043456  }
 0x4d9   : > { %v3802_v3 = vsel %vm10139_vm7, %v3800_v43, %v3801_v50  ;;  %v4008_v43 = vrot.slane %v9040_v13, 5  ;;  %vm10154_vm7 = vcmask 1044480  }
 0x4da   : > { %v3730_v23 = vpop.f32.mrb[24].mxu1  ;;  %v3824_v1 = vadd.f32 %v3802_v3, %v3764_v12  ;;  %v5126_v12 = vpack.c.bf16 %v4115_v48, %v4114_v17 }
 0x4db   : > { %v3731_v10 = vadd.f32 %v8908_v21, %v3730_v23  ;;  %v3732_v9 = vpop.f32.mrb[25].mxu1 }
 0x4dc   : > { %5127 = vmatpush3.bf16.msra.mxu1 %v5126_v12 }
 0x4dd   : > { %v9010_v32 = vmax.f32 %v3731_v10, 0.0  ;;  %5129 = vmatprep.subr.bf16.mxu1 %v5128_v44 }
 0x4df   : > { %v3803_v36 = vrot.slane %v9010_v32, 1  ;;  %v3847_v51 = vrot.slane %v9010_v32, 6  ;;  %v3890_v53 = vrot.slane %v9010_v32, 7 }
 0x4e0   : > { %5131 = vmatpush3.bf16.msra.mxu1 %v5130_v25 }
 0x4e1   : > { %v3804_v7 = vsel %vm10140_vm9, %v3801_v50, %v3803_v36  ;;  %v3848_v52 = vsel %vm10141_vm11, %v3846_v37, %v3847_v51  ;;  %v3891_v61 = vsel %vm10142_vm12, %v3889_v59, %v3890_v53  ;;  %5133 = vmatprep.subr.bf16.mxu1 %v5132_v16  ;;  %v10144_v37 = vmov 0.0|0.0   ;;  %vm10156_vm11 = vmmov %vm10150_vm3 }
 0x4e2   : > { %v3870_v63 = vadd.f32 %v3848_v52, %v3824_v1  ;;  %v9022_v35 = vadd.f32 %v3804_v7, %v3765_v56  ;;  %v4016_v59 = vrot.slane %v9040_v13, 7  ;;  %vm10155_vm9 = vcmask 1045504  }
 0x4e3   : > { %vm4049_vm12 = vcmask 130048  }
 0x4e4   : > { %v9024_v46 = vadd.f32 %v3891_v61, %v3870_v63  ;;  %5135 = vmatpush3.bf16.msra.mxu1 %v5134_v31 }
 0x4e5   : > { %5136 = vmatprep.subr.bf16.mxu1 %v10144_v37 }
 0x4e6   : > { %v3948_v22 = vrot.slane %v9024_v46, 5  ;;  %v3964_v29 = vrot.slane %v9024_v46, 6 }
 0x4e8   : > { %v3963_v54 = vsel %vm10143_vm6, %v3962_v5, %v3948_v22  ;;  %v4012_v5 = vrot.slane %v9040_v13, 6  ;;  %vm4051_vm6 = vcmask 261120  }
 0x4e9   : > { %v9052_v58 = vmul.f32 0.25, %v3963_v54 }
 0x4eb   : > { %v4025_v28 = vrot.slane %v9052_v58, 2  ;;  %v4021_v30 = vrot.slane %v9052_v58, 1  ;;  %v4033_v2 = vrot.slane %v9052_v58, 4  ;;  %v4029_v60 = vrot.slane %v9052_v58, 3 }
 0x4ec   : > { %v4041_v57 = vrot.slane %v9052_v58, 6  ;;  %v4037_v4 = vrot.slane %v9052_v58, 5  ;;  %v4045_v10 = vrot.slane %v9052_v58, 7 }
 0x4ed   : > { %v5681_v15 = vpack.i.bf16 %v3996_v27, %v4025_v28  ;;  %v5676_v38 = vpack.i.bf16 %v3992_v62, %v4021_v30  ;;  %v5691_v24 = vpack.i.bf16 %v4004_v55, %v4033_v2  ;;  %v5686_v45 = vpack.i.bf16 %v4000_v19, %v4029_v60 }
 0x4ee   : > { %v5701_v23 = vpack.i.bf16 %v4012_v5, %v4041_v57  ;;  %v5696_v1 = vpack.i.bf16 %v4008_v43, %v4037_v4  ;;  %v5706_v52 = vpack.i.bf16 %v4016_v59, %v4045_v10 }
 0x4ef   : > { %5682 = vrot.lane.b32.xlu1 %v5681_v15, %s5795_s23  ;;  %5677 = vrot.lane.b32.xlu0 %v5676_v38, %s5796_s28 }
 0x4f3   : > { %5692 = vrot.lane.b32.xlu1 %v5691_v24, %s5797_s0  ;;  %5687 = vrot.lane.b32.xlu0 %v5686_v45, %s9671_s22 }
 0x4f4   : > { %v3735_v56 = vpop.f32.mrb[26].mxu1 }
 0x4f5   : > { %v3736_v50 = vadd.f32 %v8908_v21, %v3735_v56  ;;  %v3737_v3 = vpop.f32.mrb[27].mxu1 }
 0x4f7   : > { %v3767_v9 = vmax.f32 %v3736_v50, 0.0  ;;  %5702 = vrot.lane.b32.xlu1 %v5701_v23, %s5794_s16  ;;  %5697 = vrot.lane.b32.xlu0 %v5696_v1, %s5798_s1 }
 0x4f9   : > { %v3849_v36 = vrot.slane %v3767_v9, 6  ;;  %v3892_v7 = vrot.slane %v3767_v9, 7 }
 0x4fb   : > { %v3850_v61 = vsel %vm10145_vm13, %v3847_v51, %v3849_v36  ;;  %v3893_v63 = vsel %vm10146_vm15, %v3890_v53, %v3892_v7  ;;  %5707 = vrot.lane.b32.xlu0 %v5706_v52, %s5799_s2  ;;  %vm4054_vm13 = vcmask 523264   ;;  %vm4056_vm15 = vcmask 654336  }
 0x4fc   : > { %v3871_v6 = vadd.f32 %v3850_v61, %v9022_v35 }
 0x4fe   : > { %v3914_v40 = vadd.f32 %v3893_v63, %v3871_v6 }
 0x500   : > { %v3967_v20 = vrot.slane %v3914_v40, 7  ;;  %v3969_v8 = vrot.slane %v3914_v40, 1 }
 0x502   : > { %v3980_v22 = vsel %vm10147_vm14, %v3964_v29, %v3967_v20  ;;  %vm4059_vm14 = vcmask 916480  }
 0x503   : > { %v3981_v49 = vsel %vm10148_vm1, %v3980_v22, %v3914_v40 }
 0x504   : > { %v3982_v51 = vsel %vm10149_vm10, %v3981_v49, %v3969_v8 }
 0x50e   : > { %v3740_v54 = vpop.f32.mrb[28].mxu1 }
 0x50f   : > { %v3742_v32 = vpop.f32.mrb[29].mxu1  ;;  %v3741_v53 = vadd.f32 %v8908_v21, %v3740_v54 }
 0x511   : > { %v3768_v35 = vmax.f32 %v3741_v53, 0.0 }
 0x513   : > { %v3805_v48 = vrot.slane %v3768_v35, 1 }
 0x51a   : > { %v3745_v39 = vpop.f32.mrb[30].mxu1 }
 0x51b   : > { %v3746_v18 = vadd.f32 %v8908_v21, %v3745_v39  ;;  %v3747_v17 = vpop.f32.mrb[31].mxu1 }
 0x51d   : > { %v3769_v34 = vmax.f32 %v3746_v18, 0.0 }
 0x51f   : > { %v3806_v46 = vrot.slane %v3769_v34, 1  ;;  %v3851_v26 = vrot.slane %v3769_v34, 6  ;;  %v3894_v15 = vrot.slane %v3769_v34, 7 }
 0x520   : > { %v3750_v12 = vpop.f32.mrb[32].mxu1 }
 0x521   : > { %v3751_v27 = vadd.f32 %v8908_v21, %v3750_v12  ;;  %v3807_v28 = vsel %vm10150_vm3, %v3805_v48, %v3806_v46  ;;  %v3827_v62 = vadd.f32 %v3806_v46, %v3769_v34  ;;  %v3752_v30 = vpop.f32.mrb[33].mxu1  ;;  %v4136_v48 = vld [vmem:[%s9405_s5 + $0x100] sm:$0xff]  ;;  %v4137_v46 = vld [vmem:[%s9405_s5 + $0x108] sm:$0xff] }
 0x522   : > { %v3826_v41 = vadd.f32 %v3807_v28, %v3768_v35 }
 0x523   : > { %v3770_v33 = vmax.f32 %v3751_v27, 0.0 }
 0x525   : > { %v3852_v38 = vrot.slane %v3770_v33, 6  ;;  %v3895_v2 = vrot.slane %v3770_v33, 7 }
 0x527   : > { %v3853_v60 = vsel %vm10151_vm0, %v3851_v26, %v3852_v38  ;;  %v3873_v14 = vadd.f32 %v3852_v38, %v3827_v62  ;;  %v3896_v44 = vsel %vm10152_vm4, %v3894_v15, %v3895_v2  ;;  %v4138_v15 = vld [vmem:[%s9405_s5 + $0x110] sm:$0xff]  ;;  %v4139_v38 = vld [vmem:[%s9405_s5 + $0x118] sm:$0xff] }
 0x528   : > { %v3872_v42 = vadd.f32 %v3853_v60, %v3826_v41  ;;  %v5137_v41 = vpack.c.bf16 %v4137_v46, %v4136_v48  ;;  %v5140_v60 = vpack.c.bf16 %v4139_v38, %v4138_v15  ;;  %v4309_v46 = vld [vmem:[%s9407_s7 + $0x50] sm:$0xff]  ;;  %v10157_v15 = vmov 0.0   ;;  %v4387_v38 = vld [vmem:[%s9409_s9] sm:$0xff] }
 0x529   : > { %v9121_v11 = vadd.f32 %v3895_v2, %v3873_v14  ;;  %v4140_v14 = vld [vmem:[%s9405_s5 + $0x120] sm:$0xff] }
 0x52a   : > { %v3915_v47 = vadd.f32 %v3896_v44, %v3872_v42  ;;  %v4141_v44 = vld [vmem:[%s9405_s5 + $0x128] sm:$0xff] }
 0x52b   : > { %v3990_v2 = vmul.f32 0.25, %v9121_v11  ;;  %v5143_v42 = vpack.c.bf16 %v4141_v44, %v4140_v14  ;;  %v4142_v11 = vld [vmem:[%s9405_s5 + $0x130] sm:$0xff]  ;;  %v4390_v44 = vld [vmem:[%s9409_s9 + $0x18] sm:$0xff] }
 0x52c   : > { %v3972_v21 = vrot.slane %v3915_v47, 4  ;;  %v3974_v55 = vrot.slane %v3915_v47, 5  ;;  %v3976_v19 = vrot.slane %v3915_v47, 6  ;;  %v3978_v16 = vrot.slane %v3915_v47, 7  ;;  %v4143_v47 = vld [vmem:[%s9405_s5 + $0x138] sm:$0xff] }
 0x52e   : > { %v3983_v25 = vsel %vm10153_vm5, %v3982_v51, %v3972_v21  ;;  %v5146_v21 = vpack.c.bf16 %v4143_v47, %v4142_v11  ;;  %v4391_v11 = vld [vmem:[%s9409_s9 + $0x20] sm:$0xff]  ;;  %v4392_v47 = vld [vmem:[%s9409_s9 + $0x28] sm:$0xff] }
 0x52f   : > { %v3984_v0 = vsel %vm10154_vm7, %v3983_v25, %v3974_v55  ;;  %v4144_v55 = vld [vmem:[%s9405_s5 + $0x140] sm:$0xff] }
 0x530   : > { %v3985_v57 = vsel %vm10155_vm9, %v3984_v0, %v3976_v19  ;;  %v4145_v19 = vld [vmem:[%s9405_s5 + $0x148] sm:$0xff]  ;;  %v4147_v0 = vld [vmem:[%s9405_s5 + $0x158] sm:$0xff] }
 0x531   : > { %v3986_v24 = vsel %vm10156_vm11, %v3985_v57, %v3978_v16  ;;  %v5149_v25 = vpack.c.bf16 %v4145_v19, %v4144_v55  ;;  %v4146_v16 = vld [vmem:[%s9405_s5 + $0x150] sm:$0xff]  ;;  %v4394_v19 = vld [vmem:[%s9409_s9 + $0x38] sm:$0xff] }
 0x532   : > { %v9127_v45 = vmul.f32 0.25, %v3986_v24  ;;  %v5152_v57 = vpack.c.bf16 %v4147_v0, %v4146_v16  ;;  %v4148_v24 = vld [vmem:[%s9405_s5 + $0x160] sm:$0xff]  ;;  %v4393_v55 = vld [vmem:[%s9409_s9 + $0x30] sm:$0xff]  ;;  %v4396_v0 = vld [vmem:[%s9409_s9 + $0x48] sm:$0xff] }
 0x533   : > { %v4395_v16 = vld [vmem:[%s9409_s9 + $0x40] sm:$0xff] }
 0x534   : > { %v4069_v4 = vrot.slane %v9127_v45, 1  ;;  %v4073_v31 = vrot.slane %v9127_v45, 2  ;;  %v4077_v56 = vrot.slane %v9127_v45, 3  ;;  %v4081_v5 = vrot.slane %v9127_v45, 4 }
 0x535   : > { %v4085_v43 = vrot.slane %v9127_v45, 5  ;;  %v4089_v50 = vrot.slane %v9127_v45, 6  ;;  %v4093_v3 = vrot.slane %v9127_v45, 7 }
 0x536   : > { %4070 = vrot.lane.b32.xlu1 %v4069_v4, %s5796_s28  ;;  %4074 = vrot.lane.b32.xlu0 %v4073_v31, %s5795_s23  ;;  %v4149_v4 = vld [vmem:[%s9405_s5 + $0x168] sm:$0xff]  ;;  %s4668_s23 = sshll.u32 %s5883_s21, 4  ;;  %s378_s28 = scalar_lea.vmem [#allocation2], %s377_s14 }
 0x537   : > { %v5155_v31 = vpack.c.bf16 %v4149_v4, %v4148_v24  ;;  %v4397_v24 = vld [vmem:[%s9409_s9 + $0x50] sm:$0xff]  ;;  %v4398_v4 = vld [vmem:[%s9409_s9 + $0x58] sm:$0xff]  ;;  %s4488_s15 = sshll.u32 %s378_s28, 4  ;;  %s5801_s21 = smov [#allocation2]   ;;  %s9360_s15 = int_to_ptr.vmem [resolvable:$true] %s4488_s15 }
 0x53a   : > { %4078 = vrot.lane.b32.xlu1 %v4077_v56, %s9671_s22  ;;  %4082 = vrot.lane.b32.xlu0 %v4081_v5, %s5797_s0  ;;  %v4150_v56 = vld [vmem:[%s9405_s5 + $0x170] sm:$0xff]  ;;  %v4151_v5 = vld [vmem:[%s9405_s5 + $0x178] sm:$0xff]  ;;  %s5712_s22 = scalar_lea.vmem %s9360_s15, 16 }
 0x53b   : > { %p5713_p11 = scmp.ne.s32.totalorder %s9360_s15, %s5712_s22 }
 0x53d   : > { %p5714_p12 = pnand %p5713_p11, %p5900_p5 }
 0x53e   : > { %4086 = vrot.lane.b32.xlu1 %v4085_v43, %s5798_s1  ;;  %4090 = vrot.lane.b32.xlu0 %v4089_v50, %s5794_s16  ;;  %v5158_v43 = vpack.c.bf16 %v4151_v5, %v4150_v56  ;;  %v4152_v50 = vld [vmem:[%s9405_s5 + $0x180] sm:$0xff]  ;;  %v4400_v5 = vld [vmem:[%s9409_s9 + $0x68] sm:$0xff]  ;;  %s9358_s1 = scalar_lea.hbm %s9411_s11, %s4668_s23  ;;  %s5716_s16 = sshll.u32 %s5801_s21, 4  ;;  %s5717_s16 = int_to_ptr.vmem [resolvable:$false] %s5716_s16 }
 0x53f   : > { %v4399_v56 = vld [vmem:[%s9409_s9 + $0x60] sm:$0xff]  ;;  %p5715_p13 = pneg %p5714_p12  ;;  %s5718_s19 = scalar_lea.vmem %s5717_s16, 32 }
 0x540   : > { %p5719_p0 = scmp.lt.s32.totalorder %s9360_s15, %s5717_s16  ;;  %p5720_p1 = scmp.lt.s32.totalorder %s5718_s19, %s5712_s22 }
 0x542   : > { %4094 = vrot.lane.b32.xlu1 %v4093_v3, %s5799_s2  ;;  %v4153_v3 = vld [vmem:[%s9405_s5 + $0x188] sm:$0xff]  ;;  %s4476_s2 = scalar_lea.sflag [#allocation3], %s377_s14  ;;  %p5721_p2 = por %p5720_p1, %p5719_p0 }
 0x544   : > { %p5722_p3 = pnand %p5721_p2, %p5715_p13 }
 0x561   : > { %v5683_v23 = vpop.permute.xlu1 %5682  ;;  %v5678_v1 = vpop.permute.xlu0 %5677 }
 0x562   : > { %v5680_v10 = vunpack.i.h.bf16 %v5678_v1  ;;  %v5679_v9 = vunpack.i.l.bf16 %v5678_v1  ;;  %v5685_v59 = vunpack.i.h.bf16 %v5683_v23  ;;  %v5684_v36 = vunpack.i.l.bf16 %v5683_v23 }
 0x563   : > { %v5161_v23 = vpack.c.bf16 %v4153_v3, %v4152_v50  ;;  %v4401_v50 = vld [vmem:[%s9409_s9 + $0x70] sm:$0xff]  ;;  %v4402_v3 = vld [vmem:[%s9409_s9 + $0x78] sm:$0xff] }
 0x564   : > { %v4050_v7 = vsel %vm4049_vm12, %v9040_v13, %v5680_v10  ;;  %v4061_v52 = vsel %vm4049_vm12, %v9052_v58, %v5679_v9 }
 0x565   : > { %v5693_v61 = vpop.permute.xlu1 %5692  ;;  %v5688_v63 = vpop.permute.xlu0 %5687  ;;  %v4052_v8 = vsel %vm4051_vm6, %v4050_v7, %v5685_v59  ;;  %v4062_v22 = vsel %vm4051_vm6, %v4061_v52, %v5684_v36 }
 0x566   : > { %v5690_v6 = vunpack.i.h.bf16 %v5688_v63  ;;  %v5689_v40 = vunpack.i.l.bf16 %v5688_v63  ;;  %v5695_v29 = vunpack.i.h.bf16 %v5693_v61  ;;  %v5694_v20 = vunpack.i.l.bf16 %v5693_v61 }
 0x568   : > { %v4053_v49 = vsel %vm2936_vm2, %v4052_v8, %v5690_v6  ;;  %v4063_v51 = vsel %vm2936_vm2, %v4062_v22, %v5689_v40  ;;  %v4300_v22 = vld [vmem:[%s9407_s7 + $0x8] sm:$0xff] }
 0x569   : > { %v5703_v13 = vpop.permute.xlu1 %5702  ;;  %v5698_v54 = vpop.permute.xlu0 %5697  ;;  %v4055_v35 = vsel %vm4054_vm13, %v4053_v49, %v5695_v29  ;;  %v4064_v18 = vsel %vm4054_vm13, %v4063_v51, %v5694_v20  ;;  %v4301_v49 = vld [vmem:[%s9407_s7 + $0x10] sm:$0xff] }
 0x56a   : > { %v5700_v58 = vunpack.i.h.bf16 %v5698_v54  ;;  %v5699_v32 = vunpack.i.l.bf16 %v5698_v54  ;;  %v5705_v53 = vunpack.i.h.bf16 %v5703_v13  ;;  %v5704_v39 = vunpack.i.l.bf16 %v5703_v13  ;;  %v4302_v13 = vld [vmem:[%s9407_s7 + $0x18] sm:$0xff] }
 0x56b   : > { %v5167_v54 = vpack.c.bf16 %v4302_v13, %v4301_v49 }
 0x56c   : > { %v4057_v17 = vsel %vm4056_vm15, %v4055_v35, %v5700_v58  ;;  %v4065_v34 = vsel %vm4056_vm15, %v4064_v18, %v5699_v32  ;;  %v4303_v58 = vld [vmem:[%s9407_s7 + $0x20] sm:$0xff]  ;;  %v4304_v32 = vld [vmem:[%s9407_s7 + $0x28] sm:$0xff]  ;;  %v4306_v35 = vld [vmem:[%s9407_s7 + $0x38] sm:$0xff] }
 0x56d   : > { %v5708_v12 = vpop.permute.xlu0 %5707  ;;  %v4066_v62 = vsel %vm3522_vm8, %v4065_v34, %v5704_v39  ;;  %v4058_v30 = vsel %vm3522_vm8, %v4057_v17, %v5705_v53  ;;  %v5170_v53 = vpack.c.bf16 %v4304_v32, %v4303_v58  ;;  %v4305_v39 = vld [vmem:[%s9407_s7 + $0x30] sm:$0xff]  ;;  %v4307_v17 = vld [vmem:[%s9407_s7 + $0x40] sm:$0xff]  ;;  %v4308_v34 = vld [vmem:[%s9407_s7 + $0x48] sm:$0xff] }
 0x56e   : > { %v5710_v27 = vunpack.i.h.bf16 %v5708_v12  ;;  %v5709_v28 = vunpack.i.l.bf16 %v5708_v12  ;;  %v5173_v18 = vpack.c.bf16 %v4306_v35, %v4305_v39  ;;  %v5176_v48 = vpack.c.bf16 %v4308_v34, %v4307_v17  ;;  %v4310_v12 = vld [vmem:[%s9407_s7 + $0x58] sm:$0xff] }
 0x570   : > { %v4067_v33 = vsel %vm4059_vm14, %v4066_v62, %v5709_v28  ;;  %v4060_v26 = vsel %vm4059_vm14, %v4058_v30, %v5710_v27  ;;  %v5179_v27 = vpack.c.bf16 %v4310_v12, %v4309_v46  ;;  %v4311_v28 = vld [vmem:[%s9407_s7 + $0x60] sm:$0xff]  ;;  %v4312_v62 = vld [vmem:[%s9407_s7 + $0x68] sm:$0xff] }
 0x571   : > { %4222 = vmatprep.mubr.f32.mxu1 %v4067_v33  ;;  %v5182_v30 = vpack.c.bf16 %v4312_v62, %v4311_v28  ;;  %v4314_v33 = vld [vmem:[%s9407_s7 + $0x78] sm:$0xff] }
 0x572   : > { %4223 = vmatmul.mubr.f32.vlgmr.msra.gmra.mrb[34].mxu1 %v4060_v26 }
 0x573   : > { %4667 = vmatprep.mubr.msk.f32.mxu1 %vm4049_vm12, %v3990_v2  ;;  %5138 = vmatpush1.bf16.msra.mxu1 %v5137_v41  ;;  %v4313_v41 = vld [vmem:[%s9407_s7 + $0x70] sm:$0xff]  ;;  %v4388_v2 = vld [vmem:[%s9409_s9 + $0x8] sm:$0xff] }
 0x574   : > { %5139 = vmatprep.subr.bf16.mxu1 %v10144_v37  ;;  %v5185_v26 = vpack.c.bf16 %v4314_v33, %v4313_v41  ;;  %v5188_v14 = vpack.c.bf16 %v4388_v2, %v4387_v38 }
 0x576   : > { %5189 = vmatpush3.bf16.msra.mxu0 %v5188_v14 }
 0x577   : > { %5141 = vmatpush1.bf16.msra.mxu1 %v5140_v60  ;;  %v4389_v60 = vld [vmem:[%s9409_s9 + $0x10] sm:$0xff]  ;;  %5190 = vmatprep.subr.bf16.mxu0 %v10144_v37 }
 0x578   : > { %5142 = vmatprep.subr.bf16.mxu1 %v10144_v37 }
 0x57b   : > { %5144 = vmatpush1.bf16.msra.mxu1 %v5143_v42  ;;  %v5191_v42 = vpack.c.bf16 %v4390_v44, %v4389_v60 }
 0x57c   : > { %5145 = vmatprep.subr.bf16.mxu1 %v10144_v37 }
 0x57d   : > { %5192 = vmatpush3.bf16.msra.mxu0 %v5191_v42 }
 0x57e   : > { %5193 = vmatprep.subr.bf16.mxu0 %v10144_v37 }
 0x57f   : > { %5147 = vmatpush1.bf16.msra.mxu1 %v5146_v21  ;;  %v5194_v21 = vpack.c.bf16 %v4392_v47, %v4391_v11 }
 0x580   : > { %5148 = vmatprep.subr.bf16.mxu1 %v10144_v37 }
 0x581   : > { %5195 = vmatpush3.bf16.msra.mxu0 %v5194_v21 }
 0x582   : > { %5196 = vmatprep.subr.bf16.mxu0 %v10144_v37 }
 0x583   : > { %5150 = vmatpush1.bf16.msra.mxu1 %v5149_v25  ;;  %v5197_v25 = vpack.c.bf16 %v4394_v19, %v4393_v55 }
 0x584   : > { %5151 = vmatprep.subr.bf16.mxu1 %v10144_v37 }
 0x585   : > { %5198 = vmatpush3.bf16.msra.mxu0 %v5197_v25 }
 0x586   : > { %5199 = vmatprep.subr.bf16.mxu0 %v10144_v37 }
 0x587   : > { %5153 = vmatpush1.bf16.msra.mxu1 %v5152_v57  ;;  %v5200_v57 = vpack.c.bf16 %v4396_v0, %v4395_v16 }
 0x588   : > { %5154 = vmatprep.subr.bf16.mxu1 %v10144_v37 }
 0x589   : > { %5201 = vmatpush3.bf16.msra.mxu0 %v5200_v57 }
 0x58a   : > { %5202 = vmatprep.subr.bf16.mxu0 %v10144_v37 }
 0x58b   : > { %5156 = vmatpush1.bf16.msra.mxu1 %v5155_v31  ;;  %v5203_v31 = vpack.c.bf16 %v4398_v4, %v4397_v24 }
 0x58c   : > { %5157 = vmatprep.subr.bf16.mxu1 %v10144_v37 }
 0x58d   : > { %5204 = vmatpush3.bf16.msra.mxu0 %v5203_v31 }
 0x58e   : > { %5205 = vmatprep.subr.bf16.mxu0 %v10144_v37 }
 0x58f   : > { %5159 = vmatpush1.bf16.msra.mxu1 %v5158_v43  ;;  %v5206_v43 = vpack.c.bf16 %v4400_v5, %v4399_v56 }
 0x590   : > { %5160 = vmatprep.subr.bf16.mxu1 %v10144_v37 }
 0x591   : > { %5207 = vmatpush3.bf16.msra.mxu0 %v5206_v43 }
 0x592   : > { %5208 = vmatprep.subr.bf16.mxu0 %v10144_v37 }
 0x593   : > { %5162 = vmatpush1.bf16.msra.mxu1 %v5161_v23  ;;  %v5209_v23 = vpack.c.bf16 %v4402_v3, %v4401_v50 }
 0x594   : > { %5163 = vmatprep.subr.bf16.mxu1 %v10144_v37 }
 0x595   : > { %5210 = vmatpush3.bf16.msra.mxu0 %v5209_v23 }
 0x5a8   : > { %v4071_v1 = vpop.permute.xlu1 %4070  ;;  %v4075_v10 = vpop.permute.xlu0 %4074 }
 0x5a9   : > { %v4097_v9 = vsel %vm4049_vm12, %v9127_v45, %v4071_v1  ;;  %v4299_v45 = vld [vmem:[%s9407_s7] sm:$0xff] }
 0x5aa   : > { %v4098_v59 = vsel %vm4051_vm6, %v4097_v9, %v4075_v10  ;;  %v5164_v51 = vpack.c.bf16 %v4300_v22, %v4299_v45 }
 0x5ac   : > { %v4079_v36 = vpop.permute.xlu1 %4078  ;;  %v4083_v7 = vpop.permute.xlu0 %4082 }
 0x5ad   : > { %v4099_v52 = vsel %vm2936_vm2, %v4098_v59, %v4079_v36  ;;  %v4154_v59 = vld [vmem:[%s9406_s6] sm:$0x1] }
 0x5ae   : > { %v4100_v61 = vsel %vm4054_vm13, %v4099_v52, %v4083_v7 }
 0x5b0   : > { %v4087_v63 = vpop.permute.xlu1 %4086  ;;  %v4091_v40 = vpop.permute.xlu0 %4090 }
 0x5b1   : > { %v4101_v6 = vsel %vm4056_vm15, %v4100_v61, %v4087_v63 }
 0x5b2   : > { %v4102_v29 = vsel %vm3522_vm8, %v4101_v6, %v4091_v40  ;;  %vm5800_vm8 = vmmov 0  }
 0x5b3   : > { %5064 = vmatprep.mubr.msk.f32.mxu0 %vm5800_vm8, %v10157_v15 }
 0x5b4   : > { %v4095_v20 = vpop.permute.xlu1 %4094 }
 0x5b5   : > { %v4103_v8 = vsel %vm4059_vm14, %v4102_v29, %v4095_v20 }
 0x5b6   : > { %4293 = vmatmul.mubr.f32.vlgmr.msra.gmra.mrb[36].mxu1 %v4103_v8  ;;  %v4403_v8 = vld [vmem:[%s9410_s10] sm:$0x1] }
 0x5b7   : > { %5165 = vmatpush3.bf16.msra.mxu1 %v5164_v51  ;;  %5029 = vmatprep.mubr.msk.f32.mxu1 %vm5800_vm8, %v10157_v15 }
 0x5b8   : > { %5166 = vmatprep.subr.bf16.mxu1 %v10144_v37 }
 0x5bb   : > { %5168 = vmatpush3.bf16.msra.mxu1 %v5167_v54 }
 0x5bc   : > { %5169 = vmatprep.subr.bf16.mxu1 %v10144_v37 }
 0x5bf   : > { %5171 = vmatpush3.bf16.msra.mxu1 %v5170_v53 }
 0x5c0   : > { %5172 = vmatprep.subr.bf16.mxu1 %v10144_v37 }
 0x5c3   : > { %5174 = vmatpush3.bf16.msra.mxu1 %v5173_v18 }
 0x5c4   : > { %5175 = vmatprep.subr.bf16.mxu1 %v10144_v37 }
 0x5c7   : > { %5177 = vmatpush3.bf16.msra.mxu1 %v5176_v48 }
 0x5c8   : > { %5178 = vmatprep.subr.bf16.mxu1 %v10144_v37 }
 0x5cb   : > { %5180 = vmatpush3.bf16.msra.mxu1 %v5179_v27 }
 0x5cc   : > { %5181 = vmatprep.subr.bf16.mxu1 %v10144_v37 }
 0x5cf   : > { %5183 = vmatpush3.bf16.msra.mxu1 %v5182_v30 }
 0x5d0   : > { %5184 = vmatprep.subr.bf16.mxu1 %v10144_v37  ;;  %v4315_v37 = vld [vmem:[%s9408_s8] sm:$0x1] }
 0x5d3   : > { %5186 = vmatpush3.bf16.msra.mxu1 %v5185_v26 }
 0x645   : > { %v4805_v1 = vpop.f32.mrb[34].mxu1 }
 0x646   : > { %v4806_v10 = vpop.f32.mrb[35].mxu1 }
 0x647   : > { %v4807_v9 = vadd.f32 %v4806_v10, %v4805_v1 }
 0x649   : > { %v4225_v36 = vadd.f32 %v4807_v9, %v4154_v59 }
 0x689   : > { %v4294_v7 = vpop.f32.mrb[36].mxu1 }
 0x68a   : > { %v4295_v52 = vadd.f32 %v4294_v7, %v4225_v36  ;;  %v4296_v61 = vpop.f32.mrb[37].mxu1 }
 0x68c   : > { %v4298_v63 = vmax.f32 %v4295_v52, 0.0 }
 0x68e   : > { %5030 = vmatmul.mubr.f32.vlgmr.msra.gmra.mrb[38].mxu1 %v4298_v63 }
 0x761   : > { %v4382_v6 = vpop.f32.mrb[38].mxu1 }
 0x762   : > { %v4383_v40 = vadd.f32 %v4382_v6, %v4315_v37  ;;  %v5031_v29 = vpop.f32.mrb[39].mxu1 }
 0x764   : > { %v4386_v20 = vmax.f32 %v4383_v40, 0.0 }
 0x766   : > { %5065 = vmatmul.mubr.f32.vlgmr.msra.gmra.mrb[98].mxu0 %v4386_v20 }
 0x839   : > { %v4470_v45 = vpop.f32.mrb[98].mxu0 }
 0x83a   : > { %v4471_v22 = vadd.f32 %v4470_v45, %v4403_v8  ;;  %v5066_v49 = vpop.f32.mrb[99].mxu0 }
 0x83c   : > { %4474 = vst [vmem:[%s378_s28] sm:$0x1] %v4471_v22 }
 0x83d   : > { %5725 = shalt.err (!%p5722_p3)
}
 0x83e   : > { %s5726_s24 = scalar_lea.hbm %s9358_s1, 16  ;;  %s5730_s30 = scalar_lea.hbm %s9411_s11, 32 }
 0x83f   : > { %p5727_p4 = scmp.ne.s32.totalorder %s9358_s1, %s5726_s24  ;;  %p5731_p9 = scmp.lt.u32.totalorder %s9358_s1, %s9411_s11 }
 0x840   : > { %p5732_p10 = scmp.lt.u32.totalorder %s5730_s30, %s5726_s24  ;;  %p5734_p12 = scmp.lt.u32.totalorder %s5726_s24, %s9358_s1 }
 0x841   : > { %p5728_p7 = pnand %p5727_p4, %p5900_p5 }
 0x842   : > { %p5733_p11 = por %p5732_p10, %p5731_p9 }
 0x843   : > { %p5729_p8 = pneg %p5728_p7 }
 0x844   : > { %p5735_p13 = por %p5734_p12, %p5733_p11 }
 0x846   : > { %p5736_p0 = pnand %p5735_p13, %p5729_p8 }
 0x848   : > { %5739 = shalt.err (!%p5736_p0)
}
 0x849   : > { %5212 = dma.vmem_to_hbm [thread:$0]  (%p5900_p5), %s9360_s15, 16, %s9358_s1, %s4476_s2  }
 0x84a PF: > { %s10158_s14 = sld [smem:[#allocation7_spill]]  ;;  %s10159_s17 = sld [smem:[#allocation5_spill]] }
 0x850   : > { %p5218_p1 = scmp.ge.s32.totalorder %s10158_s14, 2  ;;  %s4500_s23 = sand.u32 1, %s10159_s17  }
 0x851   : > { %s4501_s28 = scalar_lea.sflag [#allocation3], %s4500_s23 }
 0x852   : > { %p5215_p2 = pnand %p5218_p1, %p5904_p6 }
 0x854   : > { %5757 = dma.done.wait (!%p5215_p2), %s4501_s28, 16  }
 0x855   : > { %5759 = vsyncadd (!%p5215_p2), %s4501_s28, 4294967280  ;;  %s10161_s20 = sld [smem:[#allocation8_spill]]  ;;  %s10162_s26 = sld [smem:[#allocation6_spill]] }
 0x856   : > { %s10163_s19 = sld [smem:[#allocation9_spill]]  ;;  %s10164_s17 = smov %s5766_s18 }
 0x85b   : > { %p21_p3 = scmp.ge.s32.totalorder %s10161_s20, 4   ;;  %s10165_s18 = smov %s10162_s26 }
 0x85d   :  { %23 = sbr.rel (!%p21_p3) target bundleno = 7 (0x7), region = 99 }
 0x864   :  { %4505 = vsyncpa [#allocation3], 1 }
 0x865   :  { %4507 = vsyncpa [#allocation3 + $0x1], 1 }

</bundles_post_ra>
